<compile_context>
chip_gen: v6e
topology: v6e:2x2x1
jax: 0.10.0
libtpu: 0.0.40
codegen_flags: <defaults>
</compile_context>

<pallas_src>
import functools

import jax
import jax.numpy as jnp
from jax import lax
from jax.experimental import pallas as pl
from jax.experimental.pallas import tpu as pltpu

# Constants from the PyTorch module (coeffs buffer + surrogate threshold).
COEFF0, COEFF1, COEFF2 = 0.04, 5.0, 140.0
THRESHOLD = 30.0
V_RESET = -65.0


def _snn_kernel(x_ref, p_ref, w_ref, out_ref, v_ref, u_ref, *,
                num_layers, time_block, unroll):
    L = num_layers
    tb = pl.program_id(0)

    # reset(): v <- -65, u <- b * v   (chunk 0 only; v/u scratch persists across
    # the sequential time-chunk grid axis).
    @pl.when(tb == 0)
    def _():
        v_ref[...] = jnp.full_like(v_ref, V_RESET)
        u_ref[...] = p_ref[1] * V_RESET

    # Hoist the small loop-invariant per-layer parameter slices (one vreg each).
    # COEFF2 (140) is folded into the bias once per chunk.  Weights are NOT
    # hoisted -- they are re-read from VMEM at the use site to keep vreg
    # pressure low (spills would add vst+vld on the serial critical path).
    a_p, b_p, c_p, d_p, bias_p = (p_ref[j] for j in range(5))
    a_l = [a_p[i] for i in range(L)]
    b_l = [b_p[i] for i in range(L)]
    c_l = [c_p[i] for i in range(L)]
    d_l = [d_p[i] for i in range(L)]
    bias140_l = [bias_p[i] + COEFF2 for i in range(L)]

    # Membrane state lives in vregs for the whole chunk: one VMEM read here and
    # one write-back at chunk end instead of 4*L sub-vreg accesses per timestep.
    v0 = tuple(v_ref[i] for i in range(L))
    u0 = tuple(u_ref[i] for i in range(L))

    def step(t_local, carry):
        v_st, u_st = carry
        v_st, u_st = list(v_st), list(u_st)
        s = x_ref[t_local]                            # (B, N) layer-0 current
        for i in range(L):
            if i > 0:
                # torch.bmm(s.unsqueeze(1), w).squeeze(1):
                #   out[b, m] = sum_n s[b, n] * w[b, n, m]
                # Weights kept in the original (B, Nin, Nout) layout; the
                # reduction runs over the sublane (Nin) axis so the (B, Nout)
                # result is already lane-major for the elementwise dynamics
                # below (no post-reduce relayout).  Pure VPU multiply + XLU
                # reduce; no M=1 MXU round-trips at this tiny N.
                s = jnp.sum(s[:, :, None] * w_ref[i - 1], axis=1)
            vi, ui = v_st[i], u_st[i]
            # dv = 0.04 v^2 + 5 v + 140 - u + I + bias  (Horner, 140 pre-folded)
            dv = (COEFF0 * vi + COEFF1) * vi + bias140_l[i] - ui + s
            du = a_l[i] * (b_l[i] * vi - ui)
            v_new = vi + dv
            u_new = ui + du
            spiked = v_new > THRESHOLD                # fused spike test
            s = spiked.astype(jnp.float32)            # surrogate fwd = hard spike
            v_st[i] = jnp.where(spiked, c_l[i], v_new)
            u_st[i] = jnp.where(spiked, u_new + d_l[i], u_new)
            # TODO(synk): last_spike_time is write-only state in the PyTorch
            # module (never read / returned), so it is not tracked here.
        out_ref[t_local] = s                          # last layer's spikes
        return tuple(v_st), tuple(u_st)

    v_fin, u_fin = lax.fori_loop(0, time_block, step, (v0, u0), unroll=unroll)

    # Persist membrane state for the next sequential chunk (once per chunk).
    for i in range(L):
        v_ref[i] = v_fin[i]
        u_ref[i] = u_fin[i]


def trainable_snn_forward(x, a, b, c, d, bias, w, *, steps, time_block=None):
    """Pallas implementation of TrainableSNN.forward(input_series, steps)."""
    T, B, N = x.shape
    L = a.shape[0]
    assert T >= steps and L >= 2
    x = x[:steps]

    # Big time chunks amortize the ~0.35 us/grid-step overhead and turn the
    # per-step x/out DMAs into slab transfers.  Awkward step counts are
    # zero-padded up to a multiple of the block (output sliced afterwards).
    if time_block is None:
        time_block = steps if steps <= 512 else 512
    time_block = min(time_block, steps)
    padded_steps = ((steps + time_block - 1) // time_block) * time_block
    if padded_steps != steps:
        x = jnp.concatenate(
            [x, jnp.zeros((padded_steps - steps, B, N), x.dtype)], axis=0)
    num_chunks = padded_steps // time_block

    # Pack the five per-layer parameter arrays -> one resident input / one DMA.
    params = jnp.stack([a, b, c, d, bias], axis=0)    # (5, L, B, N)

    unroll = True if time_block <= 64 else 16

    kernel = functools.partial(_snn_kernel, num_layers=L,
                               time_block=time_block, unroll=unroll)

    out = pl.pallas_call(
        kernel,
        out_shape=jax.ShapeDtypeStruct((padded_steps, B, N), jnp.float32),
        grid_spec=pltpu.PrefetchScalarGridSpec(
            num_scalar_prefetch=0,
            grid=(num_chunks,),
            in_specs=[
                pl.BlockSpec((time_block, B, N), lambda t: (t, 0, 0)),   # x chunk
                pl.BlockSpec((5, L, B, N), lambda t: (0, 0, 0, 0)),      # params
                pl.BlockSpec((L - 1, B, N, N), lambda t: (0, 0, 0, 0)),  # weights
            ],
            out_specs=pl.BlockSpec((time_block, B, N), lambda t: (t, 0, 0)),
            scratch_shapes=[
                pltpu.VMEM((L, B, N), jnp.float32),   # v state (all layers)
                pltpu.VMEM((L, B, N), jnp.float32),   # u state (all layers)
            ],
        ),
        compiler_params=pltpu.CompilerParams(
            # Time chunks carry membrane state -> sequential axis.
            dimension_semantics=("arbitrary",),
            vmem_limit_bytes=32 * 1024 * 1024,
        ),
    )(x, params, w)
    return out[:steps]


def snn_reference(x, a, b, c, d, bias, w, *, steps):
    """Pure-JAX reference mirroring the PyTorch semantics."""
    L, B, N = a.shape
    v = jnp.full((L, B, N), V_RESET, jnp.float32)
    u = b * V_RESET
    outs = []
    for t in range(steps):
        s = x[t]
        v_next, u_next = [], []
        for i in range(L):
            if i > 0:
                s = jnp.einsum('bn,bnm->bm', s, w[i - 1],
                               precision=jax.lax.Precision.HIGHEST)
            vi, ui = v[i], u[i]
            dv = COEFF0 * vi * vi + COEFF1 * vi + COEFF2 - ui + s + bias[i]
            du = a[i] * (b[i] * vi - ui)
            v_new = vi + dv
            u_new = ui + du
            fired = (v_new > THRESHOLD).astype(jnp.float32)
            spiked = fired > 0.5
            v_next.append(jnp.where(spiked, c[i], v_new))
            u_next.append(jnp.where(spiked, u_new + d[i], u_new))
            s = fired
        v = jnp.stack(v_next)
        u = jnp.stack(u_next)
        outs.append(s)
    return jnp.stack(outs)


if __name__ == "__main__":
    key = jax.random.PRNGKey(0)
    k_x, k_w = jax.random.split(key)

    # layer_sizes = [32, 32, 32], batch_size = 2, steps = 8
    B, N, L, steps = 2, 32, 3, 8

    # Deterministic synthetic parameters (shapes from IzhikevichLayer.__init__).
    a = jnp.full((L, B, N), 0.02, jnp.float32)
    b = jnp.full((L, B, N), 0.2, jnp.float32)
    c = jnp.full((L, B, N), -65.0, jnp.float32)
    d = jnp.full((L, B, N), 8.0, jnp.float32)
    bias = jnp.full((L, B, N), 98.0, jnp.float32)
    # randn * 0.5 analogue; quantized to multiples of 1/4 so the synaptic sum is
    # order-independent (spikes are 0/1) and kernel/reference agree.
    w = jnp.round(jax.random.normal(k_w, (L - 1, B, N, N), jnp.float32) * 2.0) / 4.0
    x = jnp.round(jax.random.normal(k_x, (steps, B, N), jnp.float32) * 20.0) / 4.0

    out = jax.block_until_ready(
        trainable_snn_forward(x, a, b, c, d, bias, w, steps=steps))

    ref = snn_reference(x, a, b, c, d, bias, w, steps=steps)

    assert out.shape == (steps, B, N)
    # Spikes are binary.
    assert bool(jnp.all((out == 0.0) | (out == 1.0)))
    # Allow an (extremely unlikely) handful of threshold-boundary flips.
    mismatch_frac = float(jnp.mean((jnp.abs(out - ref) > 0.5).astype(jnp.float32)))
    assert mismatch_frac < 0.02, f"mismatch fraction too high: {mismatch_frac}"

    print("KERNEL_OK")
</pallas_src>

<mosaic_0001>
module attributes {stable_mosaic.version = 11 : i64} {
  func.func @_snn_kernel(%arg0: i32, %arg1: memref<8x2x32xf32, #tpu.memory_space<vmem>>, %arg2: memref<5x3x2x32xf32, #tpu.memory_space<vmem>>, %arg3: memref<2x2x32x32xf32, #tpu.memory_space<vmem>>, %arg4: memref<8x2x32xf32, #tpu.memory_space<vmem>>, %arg5: memref<3x2x32xf32, #tpu.memory_space<vmem>>, %arg6: memref<3x2x32xf32, #tpu.memory_space<vmem>>) attributes {dimension_semantics = [#tpu.dimension_semantics<arbitrary>], iteration_bounds = array<i64: 1>, scalar_prefetch = 0 : i64, scratch_operands = 2 : i64, tpu.core_type = #tpu.core_type<tc>, window_params = [{transform_indices = @transform_0, window_bounds = array<i64: 8, 2, 32>}, {pipeline_mode = #tpu.pipeline_mode<synchronous>, transform_indices = @transform_1, window_bounds = array<i64: 5, 3, 2, 32>}, {pipeline_mode = #tpu.pipeline_mode<synchronous>, transform_indices = @transform_2, window_bounds = array<i64: 2, 2, 32, 32>}, {transform_indices = @transform_3, window_bounds = array<i64: 8, 2, 32>}]} {
    %c0_i32 = arith.constant 0 : i32
    %0 = arith.cmpi eq, %arg0, %c0_i32 : i32
    %1 = arith.extui %0 : i1 to i32
    %c0_i32_0 = arith.constant 0 : i32
    %2 = arith.cmpi ne, %1, %c0_i32_0 : i32
    scf.if %2 {
      %cst_239 = arith.constant -6.500000e+01 : f32
      %711 = vector.broadcast %cst_239 : f32 to vector<3x2x32xf32>
      %c0_240 = arith.constant 0 : index
      %c0_241 = arith.constant 0 : index
      %c0_242 = arith.constant 0 : index
      %712 = vector.load %arg5[%c0_240, %c0_241, %c0_242] : memref<3x2x32xf32, #tpu.memory_space<vmem>>, vector<3x2x32xf32>
      tpu.vector_store %arg5[%c0_240, %c0_241, %c0_242], %711 {strides = array<i32>} : memref<3x2x32xf32, #tpu.memory_space<vmem>>, vector<3x2x32xf32>,
      %c1_243 = arith.constant 1 : index
      %c0_244 = arith.constant 0 : index
      %c0_245 = arith.constant 0 : index
      %c0_246 = arith.constant 0 : index
      %713 = vector.load %arg2[%c1_243, %c0_244, %c0_245, %c0_246] : memref<5x3x2x32xf32, #tpu.memory_space<vmem>>, vector<1x3x2x32xf32>
      %714 = vector.shape_cast %713 : vector<1x3x2x32xf32> to vector<3x2x32xf32>
      %cst_247 = arith.constant -6.500000e+01 : f32
      %715 = vector.broadcast %cst_247 : f32 to vector<3x2x32xf32>
      %716 = arith.mulf %714, %715 : vector<3x2x32xf32>
      %c0_248 = arith.constant 0 : index
      %c0_249 = arith.constant 0 : index
      %c0_250 = arith.constant 0 : index
      %717 = vector.load %arg6[%c0_248, %c0_249, %c0_250] : memref<3x2x32xf32, #tpu.memory_space<vmem>>, vector<3x2x32xf32>
      tpu.vector_store %arg6[%c0_248, %c0_249, %c0_250], %716 {strides = array<i32>} : memref<3x2x32xf32, #tpu.memory_space<vmem>>, vector<3x2x32xf32>,
    } else {
    }
    %c0 = arith.constant 0 : index
    %c0_1 = arith.constant 0 : index
    %c0_2 = arith.constant 0 : index
    %c0_3 = arith.constant 0 : index
    %3 = vector.load %arg2[%c0, %c0_1, %c0_2, %c0_3] : memref<5x3x2x32xf32, #tpu.memory_space<vmem>>, vector<1x3x2x32xf32>
    %4 = vector.shape_cast %3 : vector<1x3x2x32xf32> to vector<3x2x32xf32>
    %c1 = arith.constant 1 : index
    %c0_4 = arith.constant 0 : index
    %c0_5 = arith.constant 0 : index
    %c0_6 = arith.constant 0 : index
    %5 = vector.load %arg2[%c1, %c0_4, %c0_5, %c0_6] : memref<5x3x2x32xf32, #tpu.memory_space<vmem>>, vector<1x3x2x32xf32>
    %6 = vector.shape_cast %5 : vector<1x3x2x32xf32> to vector<3x2x32xf32>
    %c2 = arith.constant 2 : index
    %c0_7 = arith.constant 0 : index
    %c0_8 = arith.constant 0 : index
    %c0_9 = arith.constant 0 : index
    %7 = vector.load %arg2[%c2, %c0_7, %c0_8, %c0_9] : memref<5x3x2x32xf32, #tpu.memory_space<vmem>>, vector<1x3x2x32xf32>
    %8 = vector.shape_cast %7 : vector<1x3x2x32xf32> to vector<3x2x32xf32>
    %c3 = arith.constant 3 : index
    %c0_10 = arith.constant 0 : index
    %c0_11 = arith.constant 0 : index
    %c0_12 = arith.constant 0 : index
    %9 = vector.load %arg2[%c3, %c0_10, %c0_11, %c0_12] : memref<5x3x2x32xf32, #tpu.memory_space<vmem>>, vector<1x3x2x32xf32>
    %10 = vector.shape_cast %9 : vector<1x3x2x32xf32> to vector<3x2x32xf32>
    %c4 = arith.constant 4 : index
    %c0_13 = arith.constant 0 : index
    %c0_14 = arith.constant 0 : index
    %c0_15 = arith.constant 0 : index
    %11 = vector.load %arg2[%c4, %c0_13, %c0_14, %c0_15] : memref<5x3x2x32xf32, #tpu.memory_space<vmem>>, vector<1x3x2x32xf32>
    %12 = vector.shape_cast %11 : vector<1x3x2x32xf32> to vector<3x2x32xf32>
    %13 = vector.extract_strided_slice %4 {offsets = [0, 0, 0], sizes = [1, 2, 32], strides = [1, 1, 1]} : vector<3x2x32xf32> to vector<1x2x32xf32>
    %14 = vector.shape_cast %13 : vector<1x2x32xf32> to vector<2x32xf32>
    %15 = vector.extract_strided_slice %4 {offsets = [1, 0, 0], sizes = [1, 2, 32], strides = [1, 1, 1]} : vector<3x2x32xf32> to vector<1x2x32xf32>
    %16 = vector.shape_cast %15 : vector<1x2x32xf32> to vector<2x32xf32>
    %17 = vector.extract_strided_slice %4 {offsets = [2, 0, 0], sizes = [1, 2, 32], strides = [1, 1, 1]} : vector<3x2x32xf32> to vector<1x2x32xf32>
    %18 = vector.shape_cast %17 : vector<1x2x32xf32> to vector<2x32xf32>
    %19 = vector.extract_strided_slice %6 {offsets = [0, 0, 0], sizes = [1, 2, 32], strides = [1, 1, 1]} : vector<3x2x32xf32> to vector<1x2x32xf32>
    %20 = vector.shape_cast %19 : vector<1x2x32xf32> to vector<2x32xf32>
    %21 = vector.extract_strided_slice %6 {offsets = [1, 0, 0], sizes = [1, 2, 32], strides = [1, 1, 1]} : vector<3x2x32xf32> to vector<1x2x32xf32>
    %22 = vector.shape_cast %21 : vector<1x2x32xf32> to vector<2x32xf32>
    %23 = vector.extract_strided_slice %6 {offsets = [2, 0, 0], sizes = [1, 2, 32], strides = [1, 1, 1]} : vector<3x2x32xf32> to vector<1x2x32xf32>
    %24 = vector.shape_cast %23 : vector<1x2x32xf32> to vector<2x32xf32>
    %25 = vector.extract_strided_slice %8 {offsets = [0, 0, 0], sizes = [1, 2, 32], strides = [1, 1, 1]} : vector<3x2x32xf32> to vector<1x2x32xf32>
    %26 = vector.shape_cast %25 : vector<1x2x32xf32> to vector<2x32xf32>
    %27 = vector.extract_strided_slice %8 {offsets = [1, 0, 0], sizes = [1, 2, 32], strides = [1, 1, 1]} : vector<3x2x32xf32> to vector<1x2x32xf32>
    %28 = vector.shape_cast %27 : vector<1x2x32xf32> to vector<2x32xf32>
    %29 = vector.extract_strided_slice %8 {offsets = [2, 0, 0], sizes = [1, 2, 32], strides = [1, 1, 1]} : vector<3x2x32xf32> to vector<1x2x32xf32>
    %30 = vector.shape_cast %29 : vector<1x2x32xf32> to vector<2x32xf32>
    %31 = vector.extract_strided_slice %10 {offsets = [0, 0, 0], sizes = [1, 2, 32], strides = [1, 1, 1]} : vector<3x2x32xf32> to vector<1x2x32xf32>
    %32 = vector.shape_cast %31 : vector<1x2x32xf32> to vector<2x32xf32>
    %33 = vector.extract_strided_slice %10 {offsets = [1, 0, 0], sizes = [1, 2, 32], strides = [1, 1, 1]} : vector<3x2x32xf32> to vector<1x2x32xf32>
    %34 = vector.shape_cast %33 : vector<1x2x32xf32> to vector<2x32xf32>
    %35 = vector.extract_strided_slice %10 {offsets = [2, 0, 0], sizes = [1, 2, 32], strides = [1, 1, 1]} : vector<3x2x32xf32> to vector<1x2x32xf32>
    %36 = vector.shape_cast %35 : vector<1x2x32xf32> to vector<2x32xf32>
    %37 = vector.extract_strided_slice %12 {offsets = [0, 0, 0], sizes = [1, 2, 32], strides = [1, 1, 1]} : vector<3x2x32xf32> to vector<1x2x32xf32>
    %38 = vector.shape_cast %37 : vector<1x2x32xf32> to vector<2x32xf32>
    %cst = arith.constant 1.400000e+02 : f32
    %39 = vector.broadcast %cst : f32 to vector<2x32xf32>
    %40 = arith.addf %38, %39 : vector<2x32xf32>
    %41 = vector.extract_strided_slice %12 {offsets = [1, 0, 0], sizes = [1, 2, 32], strides = [1, 1, 1]} : vector<3x2x32xf32> to vector<1x2x32xf32>
    %42 = vector.shape_cast %41 : vector<1x2x32xf32> to vector<2x32xf32>
    %cst_16 = arith.constant 1.400000e+02 : f32
    %43 = vector.broadcast %cst_16 : f32 to vector<2x32xf32>
    %44 = arith.addf %42, %43 : vector<2x32xf32>
    %45 = vector.extract_strided_slice %12 {offsets = [2, 0, 0], sizes = [1, 2, 32], strides = [1, 1, 1]} : vector<3x2x32xf32> to vector<1x2x32xf32>
    %46 = vector.shape_cast %45 : vector<1x2x32xf32> to vector<2x32xf32>
    %cst_17 = arith.constant 1.400000e+02 : f32
    %47 = vector.broadcast %cst_17 : f32 to vector<2x32xf32>
    %48 = arith.addf %46, %47 : vector<2x32xf32>
    %c0_18 = arith.constant 0 : index
    %c0_19 = arith.constant 0 : index
    %c0_20 = arith.constant 0 : index
    %49 = vector.load %arg5[%c0_18, %c0_19, %c0_20] : memref<3x2x32xf32, #tpu.memory_space<vmem>>, vector<1x2x32xf32>
    %50 = vector.shape_cast %49 : vector<1x2x32xf32> to vector<2x32xf32>
    %c1_21 = arith.constant 1 : index
    %c0_22 = arith.constant 0 : index
    %c0_23 = arith.constant 0 : index
    %51 = vector.load %arg5[%c1_21, %c0_22, %c0_23] : memref<3x2x32xf32, #tpu.memory_space<vmem>>, vector<1x2x32xf32>
    %52 = vector.shape_cast %51 : vector<1x2x32xf32> to vector<2x32xf32>
    %c2_24 = arith.constant 2 : index
    %c0_25 = arith.constant 0 : index
    %c0_26 = arith.constant 0 : index
    %53 = vector.load %arg5[%c2_24, %c0_25, %c0_26] : memref<3x2x32xf32, #tpu.memory_space<vmem>>, vector<1x2x32xf32>
    %54 = vector.shape_cast %53 : vector<1x2x32xf32> to vector<2x32xf32>
    %c0_27 = arith.constant 0 : index
    %c0_28 = arith.constant 0 : index
    %c0_29 = arith.constant 0 : index
    %55 = vector.load %arg6[%c0_27, %c0_28, %c0_29] : memref<3x2x32xf32, #tpu.memory_space<vmem>>, vector<1x2x32xf32>
    %56 = vector.shape_cast %55 : vector<1x2x32xf32> to vector<2x32xf32>
    %c1_30 = arith.constant 1 : index
    %c0_31 = arith.constant 0 : index
    %c0_32 = arith.constant 0 : index
    %57 = vector.load %arg6[%c1_30, %c0_31, %c0_32] : memref<3x2x32xf32, #tpu.memory_space<vmem>>, vector<1x2x32xf32>
    %58 = vector.shape_cast %57 : vector<1x2x32xf32> to vector<2x32xf32>
    %c2_33 = arith.constant 2 : index
    %c0_34 = arith.constant 0 : index
    %c0_35 = arith.constant 0 : index
    %59 = vector.load %arg6[%c2_33, %c0_34, %c0_35] : memref<3x2x32xf32, #tpu.memory_space<vmem>>, vector<1x2x32xf32>
    %60 = vector.shape_cast %59 : vector<1x2x32xf32> to vector<2x32xf32>
    %c0_i32_36 = arith.constant 0 : i32
    %61 = arith.index_cast %c0_i32_36 : i32 to index
    %c0_37 = arith.constant 0 : index
    %c0_38 = arith.constant 0 : index
    %62 = vector.load %arg1[%61, %c0_37, %c0_38] : memref<8x2x32xf32, #tpu.memory_space<vmem>>, vector<1x2x32xf32>
    %63 = vector.shape_cast %62 : vector<1x2x32xf32> to vector<2x32xf32>
    %cst_39 = arith.constant 4.000000e-02 : f32
    %64 = vector.broadcast %cst_39 : f32 to vector<2x32xf32>
    %65 = arith.mulf %64, %50 : vector<2x32xf32>
    %cst_40 = arith.constant 5.000000e+00 : f32
    %66 = vector.broadcast %cst_40 : f32 to vector<2x32xf32>
    %67 = arith.addf %65, %66 : vector<2x32xf32>
    %68 = arith.mulf %67, %50 : vector<2x32xf32>
    %69 = arith.addf %68, %40 : vector<2x32xf32>
    %70 = arith.subf %69, %56 : vector<2x32xf32>
    %71 = arith.addf %70, %63 : vector<2x32xf32>
    %72 = arith.mulf %20, %50 : vector<2x32xf32>
    %73 = arith.subf %72, %56 : vector<2x32xf32>
    %74 = arith.mulf %14, %73 : vector<2x32xf32>
    %75 = arith.addf %50, %71 : vector<2x32xf32>
    %76 = arith.addf %56, %74 : vector<2x32xf32>
    %cst_41 = arith.constant 3.000000e+01 : f32
    %77 = vector.broadcast %cst_41 : f32 to vector<2x32xf32>
    %78 = arith.cmpf ogt, %75, %77 : vector<2x32xf32>
    %79 = arith.extui %78 : vector<2x32xi1> to vector<2x32xi32>
    %80 = arith.sitofp %79 : vector<2x32xi32> to vector<2x32xf32>
    %81 = arith.select %78, %26, %75 : vector<2x32xi1>, vector<2x32xf32>
    %82 = arith.addf %76, %32 : vector<2x32xf32>
    %83 = arith.select %78, %82, %76 : vector<2x32xi1>, vector<2x32xf32>
    %84 = vector.shape_cast %80 : vector<2x32xf32> to vector<2x32x1xf32>
    %c0_42 = arith.constant 0 : index
    %c0_43 = arith.constant 0 : index
    %c0_44 = arith.constant 0 : index
    %c0_45 = arith.constant 0 : index
    %85 = vector.load %arg3[%c0_42, %c0_43, %c0_44, %c0_45] : memref<2x2x32x32xf32, #tpu.memory_space<vmem>>, vector<1x2x32x32xf32>
    %86 = vector.shape_cast %85 : vector<1x2x32x32xf32> to vector<2x32x32xf32>
    %87 = vector.broadcast %84 : vector<2x32x1xf32> to vector<2x32x32xf32>
    %88 = arith.mulf %87, %86 : vector<2x32x32xf32>
    %cst_46 = arith.constant dense<0.000000e+00> : vector<2x32xf32>
    %89 = vector.multi_reduction <add>, %88, %cst_46 [1] : vector<2x32x32xf32> to vector<2x32xf32>
    %cst_47 = arith.constant 4.000000e-02 : f32
    %90 = vector.broadcast %cst_47 : f32 to vector<2x32xf32>
    %91 = arith.mulf %90, %52 : vector<2x32xf32>
    %cst_48 = arith.constant 5.000000e+00 : f32
    %92 = vector.broadcast %cst_48 : f32 to vector<2x32xf32>
    %93 = arith.addf %91, %92 : vector<2x32xf32>
    %94 = arith.mulf %93, %52 : vector<2x32xf32>
    %95 = arith.addf %94, %44 : vector<2x32xf32>
    %96 = arith.subf %95, %58 : vector<2x32xf32>
    %97 = arith.addf %96, %89 : vector<2x32xf32>
    %98 = arith.mulf %22, %52 : vector<2x32xf32>
    %99 = arith.subf %98, %58 : vector<2x32xf32>
    %100 = arith.mulf %16, %99 : vector<2x32xf32>
    %101 = arith.addf %52, %97 : vector<2x32xf32>
    %102 = arith.addf %58, %100 : vector<2x32xf32>
    %cst_49 = arith.constant 3.000000e+01 : f32
    %103 = vector.broadcast %cst_49 : f32 to vector<2x32xf32>
    %104 = arith.cmpf ogt, %101, %103 : vector<2x32xf32>
    %105 = arith.extui %104 : vector<2x32xi1> to vector<2x32xi32>
    %106 = arith.sitofp %105 : vector<2x32xi32> to vector<2x32xf32>
    %107 = arith.select %104, %28, %101 : vector<2x32xi1>, vector<2x32xf32>
    %108 = arith.addf %102, %34 : vector<2x32xf32>
    %109 = arith.select %104, %108, %102 : vector<2x32xi1>, vector<2x32xf32>
    %110 = vector.shape_cast %106 : vector<2x32xf32> to vector<2x32x1xf32>
    %c1_50 = arith.constant 1 : index
    %c0_51 = arith.constant 0 : index
    %c0_52 = arith.constant 0 : index
    %c0_53 = arith.constant 0 : index
    %111 = vector.load %arg3[%c1_50, %c0_51, %c0_52, %c0_53] : memref<2x2x32x32xf32, #tpu.memory_space<vmem>>, vector<1x2x32x32xf32>
    %112 = vector.shape_cast %111 : vector<1x2x32x32xf32> to vector<2x32x32xf32>
    %113 = vector.broadcast %110 : vector<2x32x1xf32> to vector<2x32x32xf32>
    %114 = arith.mulf %113, %112 : vector<2x32x32xf32>
    %cst_54 = arith.constant dense<0.000000e+00> : vector<2x32xf32>
    %115 = vector.multi_reduction <add>, %114, %cst_54 [1] : vector<2x32x32xf32> to vector<2x32xf32>
    %cst_55 = arith.constant 4.000000e-02 : f32
    %116 = vector.broadcast %cst_55 : f32 to vector<2x32xf32>
    %117 = arith.mulf %116, %54 : vector<2x32xf32>
    %cst_56 = arith.constant 5.000000e+00 : f32
    %118 = vector.broadcast %cst_56 : f32 to vector<2x32xf32>
    %119 = arith.addf %117, %118 : vector<2x32xf32>
    %120 = arith.mulf %119, %54 : vector<2x32xf32>
    %121 = arith.addf %120, %48 : vector<2x32xf32>
    %122 = arith.subf %121, %60 : vector<2x32xf32>
    %123 = arith.addf %122, %115 : vector<2x32xf32>
    %124 = arith.mulf %24, %54 : vector<2x32xf32>
    %125 = arith.subf %124, %60 : vector<2x32xf32>
    %126 = arith.mulf %18, %125 : vector<2x32xf32>
    %127 = arith.addf %54, %123 : vector<2x32xf32>
    %128 = arith.addf %60, %126 : vector<2x32xf32>
    %cst_57 = arith.constant 3.000000e+01 : f32
    %129 = vector.broadcast %cst_57 : f32 to vector<2x32xf32>
    %130 = arith.cmpf ogt, %127, %129 : vector<2x32xf32>
    %131 = arith.extui %130 : vector<2x32xi1> to vector<2x32xi32>
    %132 = arith.sitofp %131 : vector<2x32xi32> to vector<2x32xf32>
    %133 = arith.select %130, %30, %127 : vector<2x32xi1>, vector<2x32xf32>
    %134 = arith.addf %128, %36 : vector<2x32xf32>
    %135 = arith.select %130, %134, %128 : vector<2x32xi1>, vector<2x32xf32>
    %136 = arith.index_cast %c0_i32_36 : i32 to index
    %c0_58 = arith.constant 0 : index
    %c0_59 = arith.constant 0 : index
    %137 = vector.load %arg4[%136, %c0_58, %c0_59] : memref<8x2x32xf32, #tpu.memory_space<vmem>>, vector<1x2x32xf32>
    %138 = vector.shape_cast %137 : vector<1x2x32xf32> to vector<2x32xf32>
    %139 = vector.shape_cast %132 : vector<2x32xf32> to vector<1x2x32xf32>
    tpu.vector_store %arg4[%136, %c0_58, %c0_59], %139 {strides = array<i32>} : memref<8x2x32xf32, #tpu.memory_space<vmem>>, vector<1x2x32xf32>,
    %c1_i32 = arith.constant 1 : i32
    %140 = arith.index_cast %c1_i32 : i32 to index
    %c0_60 = arith.constant 0 : index
    %c0_61 = arith.constant 0 : index
    %141 = vector.load %arg1[%140, %c0_60, %c0_61] : memref<8x2x32xf32, #tpu.memory_space<vmem>>, vector<1x2x32xf32>
    %142 = vector.shape_cast %141 : vector<1x2x32xf32> to vector<2x32xf32>
    %cst_62 = arith.constant 4.000000e-02 : f32
    %143 = vector.broadcast %cst_62 : f32 to vector<2x32xf32>
    %144 = arith.mulf %143, %81 : vector<2x32xf32>
    %cst_63 = arith.constant 5.000000e+00 : f32
    %145 = vector.broadcast %cst_63 : f32 to vector<2x32xf32>
    %146 = arith.addf %144, %145 : vector<2x32xf32>
    %147 = arith.mulf %146, %81 : vector<2x32xf32>
    %148 = arith.addf %147, %40 : vector<2x32xf32>
    %149 = arith.subf %148, %83 : vector<2x32xf32>
    %150 = arith.addf %149, %142 : vector<2x32xf32>
    %151 = arith.mulf %20, %81 : vector<2x32xf32>
    %152 = arith.subf %151, %83 : vector<2x32xf32>
    %153 = arith.mulf %14, %152 : vector<2x32xf32>
    %154 = arith.addf %81, %150 : vector<2x32xf32>
    %155 = arith.addf %83, %153 : vector<2x32xf32>
    %cst_64 = arith.constant 3.000000e+01 : f32
    %156 = vector.broadcast %cst_64 : f32 to vector<2x32xf32>
    %157 = arith.cmpf ogt, %154, %156 : vector<2x32xf32>
    %158 = arith.extui %157 : vector<2x32xi1> to vector<2x32xi32>
    %159 = arith.sitofp %158 : vector<2x32xi32> to vector<2x32xf32>
    %160 = arith.select %157, %26, %154 : vector<2x32xi1>, vector<2x32xf32>
    %161 = arith.addf %155, %32 : vector<2x32xf32>
    %162 = arith.select %157, %161, %155 : vector<2x32xi1>, vector<2x32xf32>
    %163 = vector.shape_cast %159 : vector<2x32xf32> to vector<2x32x1xf32>
    %c0_65 = arith.constant 0 : index
    %c0_66 = arith.constant 0 : index
    %c0_67 = arith.constant 0 : index
    %c0_68 = arith.constant 0 : index
    %164 = vector.load %arg3[%c0_65, %c0_66, %c0_67, %c0_68] : memref<2x2x32x32xf32, #tpu.memory_space<vmem>>, vector<1x2x32x32xf32>
    %165 = vector.shape_cast %164 : vector<1x2x32x32xf32> to vector<2x32x32xf32>
    %166 = vector.broadcast %163 : vector<2x32x1xf32> to vector<2x32x32xf32>
    %167 = arith.mulf %166, %165 : vector<2x32x32xf32>
    %cst_69 = arith.constant dense<0.000000e+00> : vector<2x32xf32>
    %168 = vector.multi_reduction <add>, %167, %cst_69 [1] : vector<2x32x32xf32> to vector<2x32xf32>
    %cst_70 = arith.constant 4.000000e-02 : f32
    %169 = vector.broadcast %cst_70 : f32 to vector<2x32xf32>
    %170 = arith.mulf %169, %107 : vector<2x32xf32>
    %cst_71 = arith.constant 5.000000e+00 : f32
    %171 = vector.broadcast %cst_71 : f32 to vector<2x32xf32>
    %172 = arith.addf %170, %171 : vector<2x32xf32>
    %173 = arith.mulf %172, %107 : vector<2x32xf32>
    %174 = arith.addf %173, %44 : vector<2x32xf32>
    %175 = arith.subf %174, %109 : vector<2x32xf32>
    %176 = arith.addf %175, %168 : vector<2x32xf32>
    %177 = arith.mulf %22, %107 : vector<2x32xf32>
    %178 = arith.subf %177, %109 : vector<2x32xf32>
    %179 = arith.mulf %16, %178 : vector<2x32xf32>
    %180 = arith.addf %107, %176 : vector<2x32xf32>
    %181 = arith.addf %109, %179 : vector<2x32xf32>
    %cst_72 = arith.constant 3.000000e+01 : f32
    %182 = vector.broadcast %cst_72 : f32 to vector<2x32xf32>
    %183 = arith.cmpf ogt, %180, %182 : vector<2x32xf32>
    %184 = arith.extui %183 : vector<2x32xi1> to vector<2x32xi32>
    %185 = arith.sitofp %184 : vector<2x32xi32> to vector<2x32xf32>
    %186 = arith.select %183, %28, %180 : vector<2x32xi1>, vector<2x32xf32>
    %187 = arith.addf %181, %34 : vector<2x32xf32>
    %188 = arith.select %183, %187, %181 : vector<2x32xi1>, vector<2x32xf32>
    %189 = vector.shape_cast %185 : vector<2x32xf32> to vector<2x32x1xf32>
    %c1_73 = arith.constant 1 : index
    %c0_74 = arith.constant 0 : index
    %c0_75 = arith.constant 0 : index
    %c0_76 = arith.constant 0 : index
    %190 = vector.load %arg3[%c1_73, %c0_74, %c0_75, %c0_76] : memref<2x2x32x32xf32, #tpu.memory_space<vmem>>, vector<1x2x32x32xf32>
    %191 = vector.shape_cast %190 : vector<1x2x32x32xf32> to vector<2x32x32xf32>
    %192 = vector.broadcast %189 : vector<2x32x1xf32> to vector<2x32x32xf32>
    %193 = arith.mulf %192, %191 : vector<2x32x32xf32>
    %cst_77 = arith.constant dense<0.000000e+00> : vector<2x32xf32>
    %194 = vector.multi_reduction <add>, %193, %cst_77 [1] : vector<2x32x32xf32> to vector<2x32xf32>
    %cst_78 = arith.constant 4.000000e-02 : f32
    %195 = vector.broadcast %cst_78 : f32 to vector<2x32xf32>
    %196 = arith.mulf %195, %133 : vector<2x32xf32>
    %cst_79 = arith.constant 5.000000e+00 : f32
    %197 = vector.broadcast %cst_79 : f32 to vector<2x32xf32>
    %198 = arith.addf %196, %197 : vector<2x32xf32>
    %199 = arith.mulf %198, %133 : vector<2x32xf32>
    %200 = arith.addf %199, %48 : vector<2x32xf32>
    %201 = arith.subf %200, %135 : vector<2x32xf32>
    %202 = arith.addf %201, %194 : vector<2x32xf32>
    %203 = arith.mulf %24, %133 : vector<2x32xf32>
    %204 = arith.subf %203, %135 : vector<2x32xf32>
    %205 = arith.mulf %18, %204 : vector<2x32xf32>
    %206 = arith.addf %133, %202 : vector<2x32xf32>
    %207 = arith.addf %135, %205 : vector<2x32xf32>
    %cst_80 = arith.constant 3.000000e+01 : f32
    %208 = vector.broadcast %cst_80 : f32 to vector<2x32xf32>
    %209 = arith.cmpf ogt, %206, %208 : vector<2x32xf32>
    %210 = arith.extui %209 : vector<2x32xi1> to vector<2x32xi32>
    %211 = arith.sitofp %210 : vector<2x32xi32> to vector<2x32xf32>
    %212 = arith.select %209, %30, %206 : vector<2x32xi1>, vector<2x32xf32>
    %213 = arith.addf %207, %36 : vector<2x32xf32>
    %214 = arith.select %209, %213, %207 : vector<2x32xi1>, vector<2x32xf32>
    %215 = arith.index_cast %c1_i32 : i32 to index
    %c0_81 = arith.constant 0 : index
    %c0_82 = arith.constant 0 : index
    %216 = vector.load %arg4[%215, %c0_81, %c0_82] : memref<8x2x32xf32, #tpu.memory_space<vmem>>, vector<1x2x32xf32>
    %217 = vector.shape_cast %216 : vector<1x2x32xf32> to vector<2x32xf32>
    %218 = vector.shape_cast %211 : vector<2x32xf32> to vector<1x2x32xf32>
    tpu.vector_store %arg4[%215, %c0_81, %c0_82], %218 {strides = array<i32>} : memref<8x2x32xf32, #tpu.memory_space<vmem>>, vector<1x2x32xf32>,
    %c2_i32 = arith.constant 2 : i32
    %219 = arith.index_cast %c2_i32 : i32 to index
    %c0_83 = arith.constant 0 : index
    %c0_84 = arith.constant 0 : index
    %220 = vector.load %arg1[%219, %c0_83, %c0_84] : memref<8x2x32xf32, #tpu.memory_space<vmem>>, vector<1x2x32xf32>
    %221 = vector.shape_cast %220 : vector<1x2x32xf32> to vector<2x32xf32>
    %cst_85 = arith.constant 4.000000e-02 : f32
    %222 = vector.broadcast %cst_85 : f32 to vector<2x32xf32>
    %223 = arith.mulf %222, %160 : vector<2x32xf32>
    %cst_86 = arith.constant 5.000000e+00 : f32
    %224 = vector.broadcast %cst_86 : f32 to vector<2x32xf32>
    %225 = arith.addf %223, %224 : vector<2x32xf32>
    %226 = arith.mulf %225, %160 : vector<2x32xf32>
    %227 = arith.addf %226, %40 : vector<2x32xf32>
    %228 = arith.subf %227, %162 : vector<2x32xf32>
    %229 = arith.addf %228, %221 : vector<2x32xf32>
    %230 = arith.mulf %20, %160 : vector<2x32xf32>
    %231 = arith.subf %230, %162 : vector<2x32xf32>
    %232 = arith.mulf %14, %231 : vector<2x32xf32>
    %233 = arith.addf %160, %229 : vector<2x32xf32>
    %234 = arith.addf %162, %232 : vector<2x32xf32>
    %cst_87 = arith.constant 3.000000e+01 : f32
    %235 = vector.broadcast %cst_87 : f32 to vector<2x32xf32>
    %236 = arith.cmpf ogt, %233, %235 : vector<2x32xf32>
    %237 = arith.extui %236 : vector<2x32xi1> to vector<2x32xi32>
    %238 = arith.sitofp %237 : vector<2x32xi32> to vector<2x32xf32>
    %239 = arith.select %236, %26, %233 : vector<2x32xi1>, vector<2x32xf32>
    %240 = arith.addf %234, %32 : vector<2x32xf32>
    %241 = arith.select %236, %240, %234 : vector<2x32xi1>, vector<2x32xf32>
    %242 = vector.shape_cast %238 : vector<2x32xf32> to vector<2x32x1xf32>
    %c0_88 = arith.constant 0 : index
    %c0_89 = arith.constant 0 : index
    %c0_90 = arith.constant 0 : index
    %c0_91 = arith.constant 0 : index
    %243 = vector.load %arg3[%c0_88, %c0_89, %c0_90, %c0_91] : memref<2x2x32x32xf32, #tpu.memory_space<vmem>>, vector<1x2x32x32xf32>
    %244 = vector.shape_cast %243 : vector<1x2x32x32xf32> to vector<2x32x32xf32>
    %245 = vector.broadcast %242 : vector<2x32x1xf32> to vector<2x32x32xf32>
    %246 = arith.mulf %245, %244 : vector<2x32x32xf32>
    %cst_92 = arith.constant dense<0.000000e+00> : vector<2x32xf32>
    %247 = vector.multi_reduction <add>, %246, %cst_92 [1] : vector<2x32x32xf32> to vector<2x32xf32>
    %cst_93 = arith.constant 4.000000e-02 : f32
    %248 = vector.broadcast %cst_93 : f32 to vector<2x32xf32>
    %249 = arith.mulf %248, %186 : vector<2x32xf32>
    %cst_94 = arith.constant 5.000000e+00 : f32
    %250 = vector.broadcast %cst_94 : f32 to vector<2x32xf32>
    %251 = arith.addf %249, %250 : vector<2x32xf32>
    %252 = arith.mulf %251, %186 : vector<2x32xf32>
    %253 = arith.addf %252, %44 : vector<2x32xf32>
    %254 = arith.subf %253, %188 : vector<2x32xf32>
    %255 = arith.addf %254, %247 : vector<2x32xf32>
    %256 = arith.mulf %22, %186 : vector<2x32xf32>
    %257 = arith.subf %256, %188 : vector<2x32xf32>
    %258 = arith.mulf %16, %257 : vector<2x32xf32>
    %259 = arith.addf %186, %255 : vector<2x32xf32>
    %260 = arith.addf %188, %258 : vector<2x32xf32>
    %cst_95 = arith.constant 3.000000e+01 : f32
    %261 = vector.broadcast %cst_95 : f32 to vector<2x32xf32>
    %262 = arith.cmpf ogt, %259, %261 : vector<2x32xf32>
    %263 = arith.extui %262 : vector<2x32xi1> to vector<2x32xi32>
    %264 = arith.sitofp %263 : vector<2x32xi32> to vector<2x32xf32>
    %265 = arith.select %262, %28, %259 : vector<2x32xi1>, vector<2x32xf32>
    %266 = arith.addf %260, %34 : vector<2x32xf32>
    %267 = arith.select %262, %266, %260 : vector<2x32xi1>, vector<2x32xf32>
    %268 = vector.shape_cast %264 : vector<2x32xf32> to vector<2x32x1xf32>
    %c1_96 = arith.constant 1 : index
    %c0_97 = arith.constant 0 : index
    %c0_98 = arith.constant 0 : index
    %c0_99 = arith.constant 0 : index
    %269 = vector.load %arg3[%c1_96, %c0_97, %c0_98, %c0_99] : memref<2x2x32x32xf32, #tpu.memory_space<vmem>>, vector<1x2x32x32xf32>
    %270 = vector.shape_cast %269 : vector<1x2x32x32xf32> to vector<2x32x32xf32>
    %271 = vector.broadcast %268 : vector<2x32x1xf32> to vector<2x32x32xf32>
    %272 = arith.mulf %271, %270 : vector<2x32x32xf32>
    %cst_100 = arith.constant dense<0.000000e+00> : vector<2x32xf32>
    %273 = vector.multi_reduction <add>, %272, %cst_100 [1] : vector<2x32x32xf32> to vector<2x32xf32>
    %cst_101 = arith.constant 4.000000e-02 : f32
    %274 = vector.broadcast %cst_101 : f32 to vector<2x32xf32>
    %275 = arith.mulf %274, %212 : vector<2x32xf32>
    %cst_102 = arith.constant 5.000000e+00 : f32
    %276 = vector.broadcast %cst_102 : f32 to vector<2x32xf32>
    %277 = arith.addf %275, %276 : vector<2x32xf32>
    %278 = arith.mulf %277, %212 : vector<2x32xf32>
    %279 = arith.addf %278, %48 : vector<2x32xf32>
    %280 = arith.subf %279, %214 : vector<2x32xf32>
    %281 = arith.addf %280, %273 : vector<2x32xf32>
    %282 = arith.mulf %24, %212 : vector<2x32xf32>
    %283 = arith.subf %282, %214 : vector<2x32xf32>
    %284 = arith.mulf %18, %283 : vector<2x32xf32>
    %285 = arith.addf %212, %281 : vector<2x32xf32>
    %286 = arith.addf %214, %284 : vector<2x32xf32>
    %cst_103 = arith.constant 3.000000e+01 : f32
    %287 = vector.broadcast %cst_103 : f32 to vector<2x32xf32>
    %288 = arith.cmpf ogt, %285, %287 : vector<2x32xf32>
    %289 = arith.extui %288 : vector<2x32xi1> to vector<2x32xi32>
    %290 = arith.sitofp %289 : vector<2x32xi32> to vector<2x32xf32>
    %291 = arith.select %288, %30, %285 : vector<2x32xi1>, vector<2x32xf32>
    %292 = arith.addf %286, %36 : vector<2x32xf32>
    %293 = arith.select %288, %292, %286 : vector<2x32xi1>, vector<2x32xf32>
    %294 = arith.index_cast %c2_i32 : i32 to index
    %c0_104 = arith.constant 0 : index
    %c0_105 = arith.constant 0 : index
    %295 = vector.load %arg4[%294, %c0_104, %c0_105] : memref<8x2x32xf32, #tpu.memory_space<vmem>>, vector<1x2x32xf32>
    %296 = vector.shape_cast %295 : vector<1x2x32xf32> to vector<2x32xf32>
    %297 = vector.shape_cast %290 : vector<2x32xf32> to vector<1x2x32xf32>
    tpu.vector_store %arg4[%294, %c0_104, %c0_105], %297 {strides = array<i32>} : memref<8x2x32xf32, #tpu.memory_space<vmem>>, vector<1x2x32xf32>,
    %c3_i32 = arith.constant 3 : i32
    %298 = arith.index_cast %c3_i32 : i32 to index
    %c0_106 = arith.constant 0 : index
    %c0_107 = arith.constant 0 : index
    %299 = vector.load %arg1[%298, %c0_106, %c0_107] : memref<8x2x32xf32, #tpu.memory_space<vmem>>, vector<1x2x32xf32>
    %300 = vector.shape_cast %299 : vector<1x2x32xf32> to vector<2x32xf32>
    %cst_108 = arith.constant 4.000000e-02 : f32
    %301 = vector.broadcast %cst_108 : f32 to vector<2x32xf32>
    %302 = arith.mulf %301, %239 : vector<2x32xf32>
    %cst_109 = arith.constant 5.000000e+00 : f32
    %303 = vector.broadcast %cst_109 : f32 to vector<2x32xf32>
    %304 = arith.addf %302, %303 : vector<2x32xf32>
    %305 = arith.mulf %304, %239 : vector<2x32xf32>
    %306 = arith.addf %305, %40 : vector<2x32xf32>
    %307 = arith.subf %306, %241 : vector<2x32xf32>
    %308 = arith.addf %307, %300 : vector<2x32xf32>
    %309 = arith.mulf %20, %239 : vector<2x32xf32>
    %310 = arith.subf %309, %241 : vector<2x32xf32>
    %311 = arith.mulf %14, %310 : vector<2x32xf32>
    %312 = arith.addf %239, %308 : vector<2x32xf32>
    %313 = arith.addf %241, %311 : vector<2x32xf32>
    %cst_110 = arith.constant 3.000000e+01 : f32
    %314 = vector.broadcast %cst_110 : f32 to vector<2x32xf32>
    %315 = arith.cmpf ogt, %312, %314 : vector<2x32xf32>
    %316 = arith.extui %315 : vector<2x32xi1> to vector<2x32xi32>
    %317 = arith.sitofp %316 : vector<2x32xi32> to vector<2x32xf32>
    %318 = arith.select %315, %26, %312 : vector<2x32xi1>, vector<2x32xf32>
    %319 = arith.addf %313, %32 : vector<2x32xf32>
    %320 = arith.select %315, %319, %313 : vector<2x32xi1>, vector<2x32xf32>
    %321 = vector.shape_cast %317 : vector<2x32xf32> to vector<2x32x1xf32>
    %c0_111 = arith.constant 0 : index
    %c0_112 = arith.constant 0 : index
    %c0_113 = arith.constant 0 : index
    %c0_114 = arith.constant 0 : index
    %322 = vector.load %arg3[%c0_111, %c0_112, %c0_113, %c0_114] : memref<2x2x32x32xf32, #tpu.memory_space<vmem>>, vector<1x2x32x32xf32>
    %323 = vector.shape_cast %322 : vector<1x2x32x32xf32> to vector<2x32x32xf32>
    %324 = vector.broadcast %321 : vector<2x32x1xf32> to vector<2x32x32xf32>
    %325 = arith.mulf %324, %323 : vector<2x32x32xf32>
    %cst_115 = arith.constant dense<0.000000e+00> : vector<2x32xf32>
    %326 = vector.multi_reduction <add>, %325, %cst_115 [1] : vector<2x32x32xf32> to vector<2x32xf32>
    %cst_116 = arith.constant 4.000000e-02 : f32
    %327 = vector.broadcast %cst_116 : f32 to vector<2x32xf32>
    %328 = arith.mulf %327, %265 : vector<2x32xf32>
    %cst_117 = arith.constant 5.000000e+00 : f32
    %329 = vector.broadcast %cst_117 : f32 to vector<2x32xf32>
    %330 = arith.addf %328, %329 : vector<2x32xf32>
    %331 = arith.mulf %330, %265 : vector<2x32xf32>
    %332 = arith.addf %331, %44 : vector<2x32xf32>
    %333 = arith.subf %332, %267 : vector<2x32xf32>
    %334 = arith.addf %333, %326 : vector<2x32xf32>
    %335 = arith.mulf %22, %265 : vector<2x32xf32>
    %336 = arith.subf %335, %267 : vector<2x32xf32>
    %337 = arith.mulf %16, %336 : vector<2x32xf32>
    %338 = arith.addf %265, %334 : vector<2x32xf32>
    %339 = arith.addf %267, %337 : vector<2x32xf32>
    %cst_118 = arith.constant 3.000000e+01 : f32
    %340 = vector.broadcast %cst_118 : f32 to vector<2x32xf32>
    %341 = arith.cmpf ogt, %338, %340 : vector<2x32xf32>
    %342 = arith.extui %341 : vector<2x32xi1> to vector<2x32xi32>
    %343 = arith.sitofp %342 : vector<2x32xi32> to vector<2x32xf32>
    %344 = arith.select %341, %28, %338 : vector<2x32xi1>, vector<2x32xf32>
    %345 = arith.addf %339, %34 : vector<2x32xf32>
    %346 = arith.select %341, %345, %339 : vector<2x32xi1>, vector<2x32xf32>
    %347 = vector.shape_cast %343 : vector<2x32xf32> to vector<2x32x1xf32>
    %c1_119 = arith.constant 1 : index
    %c0_120 = arith.constant 0 : index
    %c0_121 = arith.constant 0 : index
    %c0_122 = arith.constant 0 : index
    %348 = vector.load %arg3[%c1_119, %c0_120, %c0_121, %c0_122] : memref<2x2x32x32xf32, #tpu.memory_space<vmem>>, vector<1x2x32x32xf32>
    %349 = vector.shape_cast %348 : vector<1x2x32x32xf32> to vector<2x32x32xf32>
    %350 = vector.broadcast %347 : vector<2x32x1xf32> to vector<2x32x32xf32>
    %351 = arith.mulf %350, %349 : vector<2x32x32xf32>
    %cst_123 = arith.constant dense<0.000000e+00> : vector<2x32xf32>
    %352 = vector.multi_reduction <add>, %351, %cst_123 [1] : vector<2x32x32xf32> to vector<2x32xf32>
    %cst_124 = arith.constant 4.000000e-02 : f32
    %353 = vector.broadcast %cst_124 : f32 to vector<2x32xf32>
    %354 = arith.mulf %353, %291 : vector<2x32xf32>
    %cst_125 = arith.constant 5.000000e+00 : f32
    %355 = vector.broadcast %cst_125 : f32 to vector<2x32xf32>
    %356 = arith.addf %354, %355 : vector<2x32xf32>
    %357 = arith.mulf %356, %291 : vector<2x32xf32>
    %358 = arith.addf %357, %48 : vector<2x32xf32>
    %359 = arith.subf %358, %293 : vector<2x32xf32>
    %360 = arith.addf %359, %352 : vector<2x32xf32>
    %361 = arith.mulf %24, %291 : vector<2x32xf32>
    %362 = arith.subf %361, %293 : vector<2x32xf32>
    %363 = arith.mulf %18, %362 : vector<2x32xf32>
    %364 = arith.addf %291, %360 : vector<2x32xf32>
    %365 = arith.addf %293, %363 : vector<2x32xf32>
    %cst_126 = arith.constant 3.000000e+01 : f32
    %366 = vector.broadcast %cst_126 : f32 to vector<2x32xf32>
    %367 = arith.cmpf ogt, %364, %366 : vector<2x32xf32>
    %368 = arith.extui %367 : vector<2x32xi1> to vector<2x32xi32>
    %369 = arith.sitofp %368 : vector<2x32xi32> to vector<2x32xf32>
    %370 = arith.select %367, %30, %364 : vector<2x32xi1>, vector<2x32xf32>
    %371 = arith.addf %365, %36 : vector<2x32xf32>
    %372 = arith.select %367, %371, %365 : vector<2x32xi1>, vector<2x32xf32>
    %373 = arith.index_cast %c3_i32 : i32 to index
    %c0_127 = arith.constant 0 : index
    %c0_128 = arith.constant 0 : index
    %374 = vector.load %arg4[%373, %c0_127, %c0_128] : memref<8x2x32xf32, #tpu.memory_space<vmem>>, vector<1x2x32xf32>
    %375 = vector.shape_cast %374 : vector<1x2x32xf32> to vector<2x32xf32>
    %376 = vector.shape_cast %369 : vector<2x32xf32> to vector<1x2x32xf32>
    tpu.vector_store %arg4[%373, %c0_127, %c0_128], %376 {strides = array<i32>} : memref<8x2x32xf32, #tpu.memory_space<vmem>>, vector<1x2x32xf32>,
    %c4_i32 = arith.constant 4 : i32
    %377 = arith.index_cast %c4_i32 : i32 to index
    %c0_129 = arith.constant 0 : index
    %c0_130 = arith.constant 0 : index
    %378 = vector.load %arg1[%377, %c0_129, %c0_130] : memref<8x2x32xf32, #tpu.memory_space<vmem>>, vector<1x2x32xf32>
    %379 = vector.shape_cast %378 : vector<1x2x32xf32> to vector<2x32xf32>
    %cst_131 = arith.constant 4.000000e-02 : f32
    %380 = vector.broadcast %cst_131 : f32 to vector<2x32xf32>
    %381 = arith.mulf %380, %318 : vector<2x32xf32>
    %cst_132 = arith.constant 5.000000e+00 : f32
    %382 = vector.broadcast %cst_132 : f32 to vector<2x32xf32>
    %383 = arith.addf %381, %382 : vector<2x32xf32>
    %384 = arith.mulf %383, %318 : vector<2x32xf32>
    %385 = arith.addf %384, %40 : vector<2x32xf32>
    %386 = arith.subf %385, %320 : vector<2x32xf32>
    %387 = arith.addf %386, %379 : vector<2x32xf32>
    %388 = arith.mulf %20, %318 : vector<2x32xf32>
    %389 = arith.subf %388, %320 : vector<2x32xf32>
    %390 = arith.mulf %14, %389 : vector<2x32xf32>
    %391 = arith.addf %318, %387 : vector<2x32xf32>
    %392 = arith.addf %320, %390 : vector<2x32xf32>
    %cst_133 = arith.constant 3.000000e+01 : f32
    %393 = vector.broadcast %cst_133 : f32 to vector<2x32xf32>
    %394 = arith.cmpf ogt, %391, %393 : vector<2x32xf32>
    %395 = arith.extui %394 : vector<2x32xi1> to vector<2x32xi32>
    %396 = arith.sitofp %395 : vector<2x32xi32> to vector<2x32xf32>
    %397 = arith.select %394, %26, %391 : vector<2x32xi1>, vector<2x32xf32>
    %398 = arith.addf %392, %32 : vector<2x32xf32>
    %399 = arith.select %394, %398, %392 : vector<2x32xi1>, vector<2x32xf32>
    %400 = vector.shape_cast %396 : vector<2x32xf32> to vector<2x32x1xf32>
    %c0_134 = arith.constant 0 : index
    %c0_135 = arith.constant 0 : index
    %c0_136 = arith.constant 0 : index
    %c0_137 = arith.constant 0 : index
    %401 = vector.load %arg3[%c0_134, %c0_135, %c0_136, %c0_137] : memref<2x2x32x32xf32, #tpu.memory_space<vmem>>, vector<1x2x32x32xf32>
    %402 = vector.shape_cast %401 : vector<1x2x32x32xf32> to vector<2x32x32xf32>
    %403 = vector.broadcast %400 : vector<2x32x1xf32> to vector<2x32x32xf32>
    %404 = arith.mulf %403, %402 : vector<2x32x32xf32>
    %cst_138 = arith.constant dense<0.000000e+00> : vector<2x32xf32>
    %405 = vector.multi_reduction <add>, %404, %cst_138 [1] : vector<2x32x32xf32> to vector<2x32xf32>
    %cst_139 = arith.constant 4.000000e-02 : f32
    %406 = vector.broadcast %cst_139 : f32 to vector<2x32xf32>
    %407 = arith.mulf %406, %344 : vector<2x32xf32>
    %cst_140 = arith.constant 5.000000e+00 : f32
    %408 = vector.broadcast %cst_140 : f32 to vector<2x32xf32>
    %409 = arith.addf %407, %408 : vector<2x32xf32>
    %410 = arith.mulf %409, %344 : vector<2x32xf32>
    %411 = arith.addf %410, %44 : vector<2x32xf32>
    %412 = arith.subf %411, %346 : vector<2x32xf32>
    %413 = arith.addf %412, %405 : vector<2x32xf32>
    %414 = arith.mulf %22, %344 : vector<2x32xf32>
    %415 = arith.subf %414, %346 : vector<2x32xf32>
    %416 = arith.mulf %16, %415 : vector<2x32xf32>
    %417 = arith.addf %344, %413 : vector<2x32xf32>
    %418 = arith.addf %346, %416 : vector<2x32xf32>
    %cst_141 = arith.constant 3.000000e+01 : f32
    %419 = vector.broadcast %cst_141 : f32 to vector<2x32xf32>
    %420 = arith.cmpf ogt, %417, %419 : vector<2x32xf32>
    %421 = arith.extui %420 : vector<2x32xi1> to vector<2x32xi32>
    %422 = arith.sitofp %421 : vector<2x32xi32> to vector<2x32xf32>
    %423 = arith.select %420, %28, %417 : vector<2x32xi1>, vector<2x32xf32>
    %424 = arith.addf %418, %34 : vector<2x32xf32>
    %425 = arith.select %420, %424, %418 : vector<2x32xi1>, vector<2x32xf32>
    %426 = vector.shape_cast %422 : vector<2x32xf32> to vector<2x32x1xf32>
    %c1_142 = arith.constant 1 : index
    %c0_143 = arith.constant 0 : index
    %c0_144 = arith.constant 0 : index
    %c0_145 = arith.constant 0 : index
    %427 = vector.load %arg3[%c1_142, %c0_143, %c0_144, %c0_145] : memref<2x2x32x32xf32, #tpu.memory_space<vmem>>, vector<1x2x32x32xf32>
    %428 = vector.shape_cast %427 : vector<1x2x32x32xf32> to vector<2x32x32xf32>
    %429 = vector.broadcast %426 : vector<2x32x1xf32> to vector<2x32x32xf32>
    %430 = arith.mulf %429, %428 : vector<2x32x32xf32>
    %cst_146 = arith.constant dense<0.000000e+00> : vector<2x32xf32>
    %431 = vector.multi_reduction <add>, %430, %cst_146 [1] : vector<2x32x32xf32> to vector<2x32xf32>
    %cst_147 = arith.constant 4.000000e-02 : f32
    %432 = vector.broadcast %cst_147 : f32 to vector<2x32xf32>
    %433 = arith.mulf %432, %370 : vector<2x32xf32>
    %cst_148 = arith.constant 5.000000e+00 : f32
    %434 = vector.broadcast %cst_148 : f32 to vector<2x32xf32>
    %435 = arith.addf %433, %434 : vector<2x32xf32>
    %436 = arith.mulf %435, %370 : vector<2x32xf32>
    %437 = arith.addf %436, %48 : vector<2x32xf32>
    %438 = arith.subf %437, %372 : vector<2x32xf32>
    %439 = arith.addf %438, %431 : vector<2x32xf32>
    %440 = arith.mulf %24, %370 : vector<2x32xf32>
    %441 = arith.subf %440, %372 : vector<2x32xf32>
    %442 = arith.mulf %18, %441 : vector<2x32xf32>
    %443 = arith.addf %370, %439 : vector<2x32xf32>
    %444 = arith.addf %372, %442 : vector<2x32xf32>
    %cst_149 = arith.constant 3.000000e+01 : f32
    %445 = vector.broadcast %cst_149 : f32 to vector<2x32xf32>
    %446 = arith.cmpf ogt, %443, %445 : vector<2x32xf32>
    %447 = arith.extui %446 : vector<2x32xi1> to vector<2x32xi32>
    %448 = arith.sitofp %447 : vector<2x32xi32> to vector<2x32xf32>
    %449 = arith.select %446, %30, %443 : vector<2x32xi1>, vector<2x32xf32>
    %450 = arith.addf %444, %36 : vector<2x32xf32>
    %451 = arith.select %446, %450, %444 : vector<2x32xi1>, vector<2x32xf32>
    %452 = arith.index_cast %c4_i32 : i32 to index
    %c0_150 = arith.constant 0 : index
    %c0_151 = arith.constant 0 : index
    %453 = vector.load %arg4[%452, %c0_150, %c0_151] : memref<8x2x32xf32, #tpu.memory_space<vmem>>, vector<1x2x32xf32>
    %454 = vector.shape_cast %453 : vector<1x2x32xf32> to vector<2x32xf32>
    %455 = vector.shape_cast %448 : vector<2x32xf32> to vector<1x2x32xf32>
    tpu.vector_store %arg4[%452, %c0_150, %c0_151], %455 {strides = array<i32>} : memref<8x2x32xf32, #tpu.memory_space<vmem>>, vector<1x2x32xf32>,
    %c5_i32 = arith.constant 5 : i32
    %456 = arith.index_cast %c5_i32 : i32 to index
    %c0_152 = arith.constant 0 : index
    %c0_153 = arith.constant 0 : index
    %457 = vector.load %arg1[%456, %c0_152, %c0_153] : memref<8x2x32xf32, #tpu.memory_space<vmem>>, vector<1x2x32xf32>
    %458 = vector.shape_cast %457 : vector<1x2x32xf32> to vector<2x32xf32>
    %cst_154 = arith.constant 4.000000e-02 : f32
    %459 = vector.broadcast %cst_154 : f32 to vector<2x32xf32>
    %460 = arith.mulf %459, %397 : vector<2x32xf32>
    %cst_155 = arith.constant 5.000000e+00 : f32
    %461 = vector.broadcast %cst_155 : f32 to vector<2x32xf32>
    %462 = arith.addf %460, %461 : vector<2x32xf32>
    %463 = arith.mulf %462, %397 : vector<2x32xf32>
    %464 = arith.addf %463, %40 : vector<2x32xf32>
    %465 = arith.subf %464, %399 : vector<2x32xf32>
    %466 = arith.addf %465, %458 : vector<2x32xf32>
    %467 = arith.mulf %20, %397 : vector<2x32xf32>
    %468 = arith.subf %467, %399 : vector<2x32xf32>
    %469 = arith.mulf %14, %468 : vector<2x32xf32>
    %470 = arith.addf %397, %466 : vector<2x32xf32>
    %471 = arith.addf %399, %469 : vector<2x32xf32>
    %cst_156 = arith.constant 3.000000e+01 : f32
    %472 = vector.broadcast %cst_156 : f32 to vector<2x32xf32>
    %473 = arith.cmpf ogt, %470, %472 : vector<2x32xf32>
    %474 = arith.extui %473 : vector<2x32xi1> to vector<2x32xi32>
    %475 = arith.sitofp %474 : vector<2x32xi32> to vector<2x32xf32>
    %476 = arith.select %473, %26, %470 : vector<2x32xi1>, vector<2x32xf32>
    %477 = arith.addf %471, %32 : vector<2x32xf32>
    %478 = arith.select %473, %477, %471 : vector<2x32xi1>, vector<2x32xf32>
    %479 = vector.shape_cast %475 : vector<2x32xf32> to vector<2x32x1xf32>
    %c0_157 = arith.constant 0 : index
    %c0_158 = arith.constant 0 : index
    %c0_159 = arith.constant 0 : index
    %c0_160 = arith.constant 0 : index
    %480 = vector.load %arg3[%c0_157, %c0_158, %c0_159, %c0_160] : memref<2x2x32x32xf32, #tpu.memory_space<vmem>>, vector<1x2x32x32xf32>
    %481 = vector.shape_cast %480 : vector<1x2x32x32xf32> to vector<2x32x32xf32>
    %482 = vector.broadcast %479 : vector<2x32x1xf32> to vector<2x32x32xf32>
    %483 = arith.mulf %482, %481 : vector<2x32x32xf32>
    %cst_161 = arith.constant dense<0.000000e+00> : vector<2x32xf32>
    %484 = vector.multi_reduction <add>, %483, %cst_161 [1] : vector<2x32x32xf32> to vector<2x32xf32>
    %cst_162 = arith.constant 4.000000e-02 : f32
    %485 = vector.broadcast %cst_162 : f32 to vector<2x32xf32>
    %486 = arith.mulf %485, %423 : vector<2x32xf32>
    %cst_163 = arith.constant 5.000000e+00 : f32
    %487 = vector.broadcast %cst_163 : f32 to vector<2x32xf32>
    %488 = arith.addf %486, %487 : vector<2x32xf32>
    %489 = arith.mulf %488, %423 : vector<2x32xf32>
    %490 = arith.addf %489, %44 : vector<2x32xf32>
    %491 = arith.subf %490, %425 : vector<2x32xf32>
    %492 = arith.addf %491, %484 : vector<2x32xf32>
    %493 = arith.mulf %22, %423 : vector<2x32xf32>
    %494 = arith.subf %493, %425 : vector<2x32xf32>
    %495 = arith.mulf %16, %494 : vector<2x32xf32>
    %496 = arith.addf %423, %492 : vector<2x32xf32>
    %497 = arith.addf %425, %495 : vector<2x32xf32>
    %cst_164 = arith.constant 3.000000e+01 : f32
    %498 = vector.broadcast %cst_164 : f32 to vector<2x32xf32>
    %499 = arith.cmpf ogt, %496, %498 : vector<2x32xf32>
    %500 = arith.extui %499 : vector<2x32xi1> to vector<2x32xi32>
    %501 = arith.sitofp %500 : vector<2x32xi32> to vector<2x32xf32>
    %502 = arith.select %499, %28, %496 : vector<2x32xi1>, vector<2x32xf32>
    %503 = arith.addf %497, %34 : vector<2x32xf32>
    %504 = arith.select %499, %503, %497 : vector<2x32xi1>, vector<2x32xf32>
    %505 = vector.shape_cast %501 : vector<2x32xf32> to vector<2x32x1xf32>
    %c1_165 = arith.constant 1 : index
    %c0_166 = arith.constant 0 : index
    %c0_167 = arith.constant 0 : index
    %c0_168 = arith.constant 0 : index
    %506 = vector.load %arg3[%c1_165, %c0_166, %c0_167, %c0_168] : memref<2x2x32x32xf32, #tpu.memory_space<vmem>>, vector<1x2x32x32xf32>
    %507 = vector.shape_cast %506 : vector<1x2x32x32xf32> to vector<2x32x32xf32>
    %508 = vector.broadcast %505 : vector<2x32x1xf32> to vector<2x32x32xf32>
    %509 = arith.mulf %508, %507 : vector<2x32x32xf32>
    %cst_169 = arith.constant dense<0.000000e+00> : vector<2x32xf32>
    %510 = vector.multi_reduction <add>, %509, %cst_169 [1] : vector<2x32x32xf32> to vector<2x32xf32>
    %cst_170 = arith.constant 4.000000e-02 : f32
    %511 = vector.broadcast %cst_170 : f32 to vector<2x32xf32>
    %512 = arith.mulf %511, %449 : vector<2x32xf32>
    %cst_171 = arith.constant 5.000000e+00 : f32
    %513 = vector.broadcast %cst_171 : f32 to vector<2x32xf32>
    %514 = arith.addf %512, %513 : vector<2x32xf32>
    %515 = arith.mulf %514, %449 : vector<2x32xf32>
    %516 = arith.addf %515, %48 : vector<2x32xf32>
    %517 = arith.subf %516, %451 : vector<2x32xf32>
    %518 = arith.addf %517, %510 : vector<2x32xf32>
    %519 = arith.mulf %24, %449 : vector<2x32xf32>
    %520 = arith.subf %519, %451 : vector<2x32xf32>
    %521 = arith.mulf %18, %520 : vector<2x32xf32>
    %522 = arith.addf %449, %518 : vector<2x32xf32>
    %523 = arith.addf %451, %521 : vector<2x32xf32>
    %cst_172 = arith.constant 3.000000e+01 : f32
    %524 = vector.broadcast %cst_172 : f32 to vector<2x32xf32>
    %525 = arith.cmpf ogt, %522, %524 : vector<2x32xf32>
    %526 = arith.extui %525 : vector<2x32xi1> to vector<2x32xi32>
    %527 = arith.sitofp %526 : vector<2x32xi32> to vector<2x32xf32>
    %528 = arith.select %525, %30, %522 : vector<2x32xi1>, vector<2x32xf32>
    %529 = arith.addf %523, %36 : vector<2x32xf32>
    %530 = arith.select %525, %529, %523 : vector<2x32xi1>, vector<2x32xf32>
    %531 = arith.index_cast %c5_i32 : i32 to index
    %c0_173 = arith.constant 0 : index
    %c0_174 = arith.constant 0 : index
    %532 = vector.load %arg4[%531, %c0_173, %c0_174] : memref<8x2x32xf32, #tpu.memory_space<vmem>>, vector<1x2x32xf32>
    %533 = vector.shape_cast %532 : vector<1x2x32xf32> to vector<2x32xf32>
    %534 = vector.shape_cast %527 : vector<2x32xf32> to vector<1x2x32xf32>
    tpu.vector_store %arg4[%531, %c0_173, %c0_174], %534 {strides = array<i32>} : memref<8x2x32xf32, #tpu.memory_space<vmem>>, vector<1x2x32xf32>,
    %c6_i32 = arith.constant 6 : i32
    %535 = arith.index_cast %c6_i32 : i32 to index
    %c0_175 = arith.constant 0 : index
    %c0_176 = arith.constant 0 : index
    %536 = vector.load %arg1[%535, %c0_175, %c0_176] : memref<8x2x32xf32, #tpu.memory_space<vmem>>, vector<1x2x32xf32>
    %537 = vector.shape_cast %536 : vector<1x2x32xf32> to vector<2x32xf32>
    %cst_177 = arith.constant 4.000000e-02 : f32
    %538 = vector.broadcast %cst_177 : f32 to vector<2x32xf32>
    %539 = arith.mulf %538, %476 : vector<2x32xf32>
    %cst_178 = arith.constant 5.000000e+00 : f32
    %540 = vector.broadcast %cst_178 : f32 to vector<2x32xf32>
    %541 = arith.addf %539, %540 : vector<2x32xf32>
    %542 = arith.mulf %541, %476 : vector<2x32xf32>
    %543 = arith.addf %542, %40 : vector<2x32xf32>
    %544 = arith.subf %543, %478 : vector<2x32xf32>
    %545 = arith.addf %544, %537 : vector<2x32xf32>
    %546 = arith.mulf %20, %476 : vector<2x32xf32>
    %547 = arith.subf %546, %478 : vector<2x32xf32>
    %548 = arith.mulf %14, %547 : vector<2x32xf32>
    %549 = arith.addf %476, %545 : vector<2x32xf32>
    %550 = arith.addf %478, %548 : vector<2x32xf32>
    %cst_179 = arith.constant 3.000000e+01 : f32
    %551 = vector.broadcast %cst_179 : f32 to vector<2x32xf32>
    %552 = arith.cmpf ogt, %549, %551 : vector<2x32xf32>
    %553 = arith.extui %552 : vector<2x32xi1> to vector<2x32xi32>
    %554 = arith.sitofp %553 : vector<2x32xi32> to vector<2x32xf32>
    %555 = arith.select %552, %26, %549 : vector<2x32xi1>, vector<2x32xf32>
    %556 = arith.addf %550, %32 : vector<2x32xf32>
    %557 = arith.select %552, %556, %550 : vector<2x32xi1>, vector<2x32xf32>
    %558 = vector.shape_cast %554 : vector<2x32xf32> to vector<2x32x1xf32>
    %c0_180 = arith.constant 0 : index
    %c0_181 = arith.constant 0 : index
    %c0_182 = arith.constant 0 : index
    %c0_183 = arith.constant 0 : index
    %559 = vector.load %arg3[%c0_180, %c0_181, %c0_182, %c0_183] : memref<2x2x32x32xf32, #tpu.memory_space<vmem>>, vector<1x2x32x32xf32>
    %560 = vector.shape_cast %559 : vector<1x2x32x32xf32> to vector<2x32x32xf32>
    %561 = vector.broadcast %558 : vector<2x32x1xf32> to vector<2x32x32xf32>
    %562 = arith.mulf %561, %560 : vector<2x32x32xf32>
    %cst_184 = arith.constant dense<0.000000e+00> : vector<2x32xf32>
    %563 = vector.multi_reduction <add>, %562, %cst_184 [1] : vector<2x32x32xf32> to vector<2x32xf32>
    %cst_185 = arith.constant 4.000000e-02 : f32
    %564 = vector.broadcast %cst_185 : f32 to vector<2x32xf32>
    %565 = arith.mulf %564, %502 : vector<2x32xf32>
    %cst_186 = arith.constant 5.000000e+00 : f32
    %566 = vector.broadcast %cst_186 : f32 to vector<2x32xf32>
    %567 = arith.addf %565, %566 : vector<2x32xf32>
    %568 = arith.mulf %567, %502 : vector<2x32xf32>
    %569 = arith.addf %568, %44 : vector<2x32xf32>
    %570 = arith.subf %569, %504 : vector<2x32xf32>
    %571 = arith.addf %570, %563 : vector<2x32xf32>
    %572 = arith.mulf %22, %502 : vector<2x32xf32>
    %573 = arith.subf %572, %504 : vector<2x32xf32>
    %574 = arith.mulf %16, %573 : vector<2x32xf32>
    %575 = arith.addf %502, %571 : vector<2x32xf32>
    %576 = arith.addf %504, %574 : vector<2x32xf32>
    %cst_187 = arith.constant 3.000000e+01 : f32
    %577 = vector.broadcast %cst_187 : f32 to vector<2x32xf32>
    %578 = arith.cmpf ogt, %575, %577 : vector<2x32xf32>
    %579 = arith.extui %578 : vector<2x32xi1> to vector<2x32xi32>
    %580 = arith.sitofp %579 : vector<2x32xi32> to vector<2x32xf32>
    %581 = arith.select %578, %28, %575 : vector<2x32xi1>, vector<2x32xf32>
    %582 = arith.addf %576, %34 : vector<2x32xf32>
    %583 = arith.select %578, %582, %576 : vector<2x32xi1>, vector<2x32xf32>
    %584 = vector.shape_cast %580 : vector<2x32xf32> to vector<2x32x1xf32>
    %c1_188 = arith.constant 1 : index
    %c0_189 = arith.constant 0 : index
    %c0_190 = arith.constant 0 : index
    %c0_191 = arith.constant 0 : index
    %585 = vector.load %arg3[%c1_188, %c0_189, %c0_190, %c0_191] : memref<2x2x32x32xf32, #tpu.memory_space<vmem>>, vector<1x2x32x32xf32>
    %586 = vector.shape_cast %585 : vector<1x2x32x32xf32> to vector<2x32x32xf32>
    %587 = vector.broadcast %584 : vector<2x32x1xf32> to vector<2x32x32xf32>
    %588 = arith.mulf %587, %586 : vector<2x32x32xf32>
    %cst_192 = arith.constant dense<0.000000e+00> : vector<2x32xf32>
    %589 = vector.multi_reduction <add>, %588, %cst_192 [1] : vector<2x32x32xf32> to vector<2x32xf32>
    %cst_193 = arith.constant 4.000000e-02 : f32
    %590 = vector.broadcast %cst_193 : f32 to vector<2x32xf32>
    %591 = arith.mulf %590, %528 : vector<2x32xf32>
    %cst_194 = arith.constant 5.000000e+00 : f32
    %592 = vector.broadcast %cst_194 : f32 to vector<2x32xf32>
    %593 = arith.addf %591, %592 : vector<2x32xf32>
    %594 = arith.mulf %593, %528 : vector<2x32xf32>
    %595 = arith.addf %594, %48 : vector<2x32xf32>
    %596 = arith.subf %595, %530 : vector<2x32xf32>
    %597 = arith.addf %596, %589 : vector<2x32xf32>
    %598 = arith.mulf %24, %528 : vector<2x32xf32>
    %599 = arith.subf %598, %530 : vector<2x32xf32>
    %600 = arith.mulf %18, %599 : vector<2x32xf32>
    %601 = arith.addf %528, %597 : vector<2x32xf32>
    %602 = arith.addf %530, %600 : vector<2x32xf32>
    %cst_195 = arith.constant 3.000000e+01 : f32
    %603 = vector.broadcast %cst_195 : f32 to vector<2x32xf32>
    %604 = arith.cmpf ogt, %601, %603 : vector<2x32xf32>
    %605 = arith.extui %604 : vector<2x32xi1> to vector<2x32xi32>
    %606 = arith.sitofp %605 : vector<2x32xi32> to vector<2x32xf32>
    %607 = arith.select %604, %30, %601 : vector<2x32xi1>, vector<2x32xf32>
    %608 = arith.addf %602, %36 : vector<2x32xf32>
    %609 = arith.select %604, %608, %602 : vector<2x32xi1>, vector<2x32xf32>
    %610 = arith.index_cast %c6_i32 : i32 to index
    %c0_196 = arith.constant 0 : index
    %c0_197 = arith.constant 0 : index
    %611 = vector.load %arg4[%610, %c0_196, %c0_197] : memref<8x2x32xf32, #tpu.memory_space<vmem>>, vector<1x2x32xf32>
    %612 = vector.shape_cast %611 : vector<1x2x32xf32> to vector<2x32xf32>
    %613 = vector.shape_cast %606 : vector<2x32xf32> to vector<1x2x32xf32>
    tpu.vector_store %arg4[%610, %c0_196, %c0_197], %613 {strides = array<i32>} : memref<8x2x32xf32, #tpu.memory_space<vmem>>, vector<1x2x32xf32>,
    %c7_i32 = arith.constant 7 : i32
    %614 = arith.index_cast %c7_i32 : i32 to index
    %c0_198 = arith.constant 0 : index
    %c0_199 = arith.constant 0 : index
    %615 = vector.load %arg1[%614, %c0_198, %c0_199] : memref<8x2x32xf32, #tpu.memory_space<vmem>>, vector<1x2x32xf32>
    %616 = vector.shape_cast %615 : vector<1x2x32xf32> to vector<2x32xf32>
    %cst_200 = arith.constant 4.000000e-02 : f32
    %617 = vector.broadcast %cst_200 : f32 to vector<2x32xf32>
    %618 = arith.mulf %617, %555 : vector<2x32xf32>
    %cst_201 = arith.constant 5.000000e+00 : f32
    %619 = vector.broadcast %cst_201 : f32 to vector<2x32xf32>
    %620 = arith.addf %618, %619 : vector<2x32xf32>
    %621 = arith.mulf %620, %555 : vector<2x32xf32>
    %622 = arith.addf %621, %40 : vector<2x32xf32>
    %623 = arith.subf %622, %557 : vector<2x32xf32>
    %624 = arith.addf %623, %616 : vector<2x32xf32>
    %625 = arith.mulf %20, %555 : vector<2x32xf32>
    %626 = arith.subf %625, %557 : vector<2x32xf32>
    %627 = arith.mulf %14, %626 : vector<2x32xf32>
    %628 = arith.addf %555, %624 : vector<2x32xf32>
    %629 = arith.addf %557, %627 : vector<2x32xf32>
    %cst_202 = arith.constant 3.000000e+01 : f32
    %630 = vector.broadcast %cst_202 : f32 to vector<2x32xf32>
    %631 = arith.cmpf ogt, %628, %630 : vector<2x32xf32>
    %632 = arith.extui %631 : vector<2x32xi1> to vector<2x32xi32>
    %633 = arith.sitofp %632 : vector<2x32xi32> to vector<2x32xf32>
    %634 = arith.select %631, %26, %628 : vector<2x32xi1>, vector<2x32xf32>
    %635 = arith.addf %629, %32 : vector<2x32xf32>
    %636 = arith.select %631, %635, %629 : vector<2x32xi1>, vector<2x32xf32>
    %637 = vector.shape_cast %633 : vector<2x32xf32> to vector<2x32x1xf32>
    %c0_203 = arith.constant 0 : index
    %c0_204 = arith.constant 0 : index
    %c0_205 = arith.constant 0 : index
    %c0_206 = arith.constant 0 : index
    %638 = vector.load %arg3[%c0_203, %c0_204, %c0_205, %c0_206] : memref<2x2x32x32xf32, #tpu.memory_space<vmem>>, vector<1x2x32x32xf32>
    %639 = vector.shape_cast %638 : vector<1x2x32x32xf32> to vector<2x32x32xf32>
    %640 = vector.broadcast %637 : vector<2x32x1xf32> to vector<2x32x32xf32>
    %641 = arith.mulf %640, %639 : vector<2x32x32xf32>
    %cst_207 = arith.constant dense<0.000000e+00> : vector<2x32xf32>
    %642 = vector.multi_reduction <add>, %641, %cst_207 [1] : vector<2x32x32xf32> to vector<2x32xf32>
    %cst_208 = arith.constant 4.000000e-02 : f32
    %643 = vector.broadcast %cst_208 : f32 to vector<2x32xf32>
    %644 = arith.mulf %643, %581 : vector<2x32xf32>
    %cst_209 = arith.constant 5.000000e+00 : f32
    %645 = vector.broadcast %cst_209 : f32 to vector<2x32xf32>
    %646 = arith.addf %644, %645 : vector<2x32xf32>
    %647 = arith.mulf %646, %581 : vector<2x32xf32>
    %648 = arith.addf %647, %44 : vector<2x32xf32>
    %649 = arith.subf %648, %583 : vector<2x32xf32>
    %650 = arith.addf %649, %642 : vector<2x32xf32>
    %651 = arith.mulf %22, %581 : vector<2x32xf32>
    %652 = arith.subf %651, %583 : vector<2x32xf32>
    %653 = arith.mulf %16, %652 : vector<2x32xf32>
    %654 = arith.addf %581, %650 : vector<2x32xf32>
    %655 = arith.addf %583, %653 : vector<2x32xf32>
    %cst_210 = arith.constant 3.000000e+01 : f32
    %656 = vector.broadcast %cst_210 : f32 to vector<2x32xf32>
    %657 = arith.cmpf ogt, %654, %656 : vector<2x32xf32>
    %658 = arith.extui %657 : vector<2x32xi1> to vector<2x32xi32>
    %659 = arith.sitofp %658 : vector<2x32xi32> to vector<2x32xf32>
    %660 = arith.select %657, %28, %654 : vector<2x32xi1>, vector<2x32xf32>
    %661 = arith.addf %655, %34 : vector<2x32xf32>
    %662 = arith.select %657, %661, %655 : vector<2x32xi1>, vector<2x32xf32>
    %663 = vector.shape_cast %659 : vector<2x32xf32> to vector<2x32x1xf32>
    %c1_211 = arith.constant 1 : index
    %c0_212 = arith.constant 0 : index
    %c0_213 = arith.constant 0 : index
    %c0_214 = arith.constant 0 : index
    %664 = vector.load %arg3[%c1_211, %c0_212, %c0_213, %c0_214] : memref<2x2x32x32xf32, #tpu.memory_space<vmem>>, vector<1x2x32x32xf32>
    %665 = vector.shape_cast %664 : vector<1x2x32x32xf32> to vector<2x32x32xf32>
    %666 = vector.broadcast %663 : vector<2x32x1xf32> to vector<2x32x32xf32>
    %667 = arith.mulf %666, %665 : vector<2x32x32xf32>
    %cst_215 = arith.constant dense<0.000000e+00> : vector<2x32xf32>
    %668 = vector.multi_reduction <add>, %667, %cst_215 [1] : vector<2x32x32xf32> to vector<2x32xf32>
    %cst_216 = arith.constant 4.000000e-02 : f32
    %669 = vector.broadcast %cst_216 : f32 to vector<2x32xf32>
    %670 = arith.mulf %669, %607 : vector<2x32xf32>
    %cst_217 = arith.constant 5.000000e+00 : f32
    %671 = vector.broadcast %cst_217 : f32 to vector<2x32xf32>
    %672 = arith.addf %670, %671 : vector<2x32xf32>
    %673 = arith.mulf %672, %607 : vector<2x32xf32>
    %674 = arith.addf %673, %48 : vector<2x32xf32>
    %675 = arith.subf %674, %609 : vector<2x32xf32>
    %676 = arith.addf %675, %668 : vector<2x32xf32>
    %677 = arith.mulf %24, %607 : vector<2x32xf32>
    %678 = arith.subf %677, %609 : vector<2x32xf32>
    %679 = arith.mulf %18, %678 : vector<2x32xf32>
    %680 = arith.addf %607, %676 : vector<2x32xf32>
    %681 = arith.addf %609, %679 : vector<2x32xf32>
    %cst_218 = arith.constant 3.000000e+01 : f32
    %682 = vector.broadcast %cst_218 : f32 to vector<2x32xf32>
    %683 = arith.cmpf ogt, %680, %682 : vector<2x32xf32>
    %684 = arith.extui %683 : vector<2x32xi1> to vector<2x32xi32>
    %685 = arith.sitofp %684 : vector<2x32xi32> to vector<2x32xf32>
    %686 = arith.select %683, %30, %680 : vector<2x32xi1>, vector<2x32xf32>
    %687 = arith.addf %681, %36 : vector<2x32xf32>
    %688 = arith.select %683, %687, %681 : vector<2x32xi1>, vector<2x32xf32>
    %689 = arith.index_cast %c7_i32 : i32 to index
    %c0_219 = arith.constant 0 : index
    %c0_220 = arith.constant 0 : index
    %690 = vector.load %arg4[%689, %c0_219, %c0_220] : memref<8x2x32xf32, #tpu.memory_space<vmem>>, vector<1x2x32xf32>
    %691 = vector.shape_cast %690 : vector<1x2x32xf32> to vector<2x32xf32>
    %692 = vector.shape_cast %685 : vector<2x32xf32> to vector<1x2x32xf32>
    tpu.vector_store %arg4[%689, %c0_219, %c0_220], %692 {strides = array<i32>} : memref<8x2x32xf32, #tpu.memory_space<vmem>>, vector<1x2x32xf32>,
    %c8_i32 = arith.constant 8 : i32
    %c0_221 = arith.constant 0 : index
    %c0_222 = arith.constant 0 : index
    %c0_223 = arith.constant 0 : index
    %693 = vector.load %arg5[%c0_221, %c0_222, %c0_223] : memref<3x2x32xf32, #tpu.memory_space<vmem>>, vector<1x2x32xf32>
    %694 = vector.shape_cast %693 : vector<1x2x32xf32> to vector<2x32xf32>
    %695 = vector.shape_cast %634 : vector<2x32xf32> to vector<1x2x32xf32>
    tpu.vector_store %arg5[%c0_221, %c0_222, %c0_223], %695 {strides = array<i32>} : memref<3x2x32xf32, #tpu.memory_space<vmem>>, vector<1x2x32xf32>,
    %c0_224 = arith.constant 0 : index
    %c0_225 = arith.constant 0 : index
    %c0_226 = arith.constant 0 : index
    %696 = vector.load %arg6[%c0_224, %c0_225, %c0_226] : memref<3x2x32xf32, #tpu.memory_space<vmem>>, vector<1x2x32xf32>
    %697 = vector.shape_cast %696 : vector<1x2x32xf32> to vector<2x32xf32>
    %698 = vector.shape_cast %636 : vector<2x32xf32> to vector<1x2x32xf32>
    tpu.vector_store %arg6[%c0_224, %c0_225, %c0_226], %698 {strides = array<i32>} : memref<3x2x32xf32, #tpu.memory_space<vmem>>, vector<1x2x32xf32>,
    %c1_227 = arith.constant 1 : index
    %c0_228 = arith.constant 0 : index
    %c0_229 = arith.constant 0 : index
    %699 = vector.load %arg5[%c1_227, %c0_228, %c0_229] : memref<3x2x32xf32, #tpu.memory_space<vmem>>, vector<1x2x32xf32>
    %700 = vector.shape_cast %699 : vector<1x2x32xf32> to vector<2x32xf32>
    %701 = vector.shape_cast %660 : vector<2x32xf32> to vector<1x2x32xf32>
    tpu.vector_store %arg5[%c1_227, %c0_228, %c0_229], %701 {strides = array<i32>} : memref<3x2x32xf32, #tpu.memory_space<vmem>>, vector<1x2x32xf32>,
    %c1_230 = arith.constant 1 : index
    %c0_231 = arith.constant 0 : index
    %c0_232 = arith.constant 0 : index
    %702 = vector.load %arg6[%c1_230, %c0_231, %c0_232] : memref<3x2x32xf32, #tpu.memory_space<vmem>>, vector<1x2x32xf32>
    %703 = vector.shape_cast %702 : vector<1x2x32xf32> to vector<2x32xf32>
    %704 = vector.shape_cast %662 : vector<2x32xf32> to vector<1x2x32xf32>
    tpu.vector_store %arg6[%c1_230, %c0_231, %c0_232], %704 {strides = array<i32>} : memref<3x2x32xf32, #tpu.memory_space<vmem>>, vector<1x2x32xf32>,
    %c2_233 = arith.constant 2 : index
    %c0_234 = arith.constant 0 : index
    %c0_235 = arith.constant 0 : index
    %705 = vector.load %arg5[%c2_233, %c0_234, %c0_235] : memref<3x2x32xf32, #tpu.memory_space<vmem>>, vector<1x2x32xf32>
    %706 = vector.shape_cast %705 : vector<1x2x32xf32> to vector<2x32xf32>
    %707 = vector.shape_cast %686 : vector<2x32xf32> to vector<1x2x32xf32>
    tpu.vector_store %arg5[%c2_233, %c0_234, %c0_235], %707 {strides = array<i32>} : memref<3x2x32xf32, #tpu.memory_space<vmem>>, vector<1x2x32xf32>,
    %c2_236 = arith.constant 2 : index
    %c0_237 = arith.constant 0 : index
    %c0_238 = arith.constant 0 : index
    %708 = vector.load %arg6[%c2_236, %c0_237, %c0_238] : memref<3x2x32xf32, #tpu.memory_space<vmem>>, vector<1x2x32xf32>
    %709 = vector.shape_cast %708 : vector<1x2x32xf32> to vector<2x32xf32>
    %710 = vector.shape_cast %688 : vector<2x32xf32> to vector<1x2x32xf32>
    tpu.vector_store %arg6[%c2_236, %c0_237, %c0_238], %710 {strides = array<i32>} : memref<3x2x32xf32, #tpu.memory_space<vmem>>, vector<1x2x32xf32>,
    return
  }
  func.func @transform_0(%arg0: i32) -> (i32, i32, i32) {
    %c0_i32 = arith.constant 0 : i32
    %c0_i32_0 = arith.constant 0 : i32
    %c0_i32_1 = arith.constant 0 : i32
    return %arg0, %c0_i32, %c0_i32_0 : i32, i32, i32
  }
  func.func @transform_1(%arg0: i32) -> (i32, i32, i32, i32) {
    %c0_i32 = arith.constant 0 : i32
    %c0_i32_0 = arith.constant 0 : i32
    %c0_i32_1 = arith.constant 0 : i32
    %c0_i32_2 = arith.constant 0 : i32
    %c0_i32_3 = arith.constant 0 : i32
    return %c0_i32, %c0_i32_0, %c0_i32_1, %c0_i32_2 : i32, i32, i32, i32
  }
  func.func @transform_2(%arg0: i32) -> (i32, i32, i32, i32) {
    %c0_i32 = arith.constant 0 : i32
    %c0_i32_0 = arith.constant 0 : i32
    %c0_i32_1 = arith.constant 0 : i32
    %c0_i32_2 = arith.constant 0 : i32
    %c0_i32_3 = arith.constant 0 : i32
    return %c0_i32, %c0_i32_0, %c0_i32_1, %c0_i32_2 : i32, i32, i32, i32
  }
  func.func @transform_3(%arg0: i32) -> (i32, i32, i32) {
    %c0_i32 = arith.constant 0 : i32
    %c0_i32_0 = arith.constant 0 : i32
    %c0_i32_1 = arith.constant 0 : i32
    return %arg0, %c0_i32, %c0_i32_0 : i32, i32, i32
  }
}

</mosaic_0001>

<bundles_post_ra>
// kernel: tpu_custom_call.1
= control target key start
LH: loop header
LB: loop body
LE: loop exit
PB: predicated region body
PF: predicated region fallthrough
CT: control target
= control target key end

     0   :  { %8 = vsyncpa [#allocation5], 0  ;;  %s2656_s0 = inlined_call_operand.hbm [shape: f32[8,2,32], index: 0, kind: input, shape index: {}]   ;;  %s2657_s1 = inlined_call_operand.hbm [shape: f32[5,3,2,32], index: 1, kind: input, shape index: {}]   ;;  %s2658_s2 = inlined_call_operand.hbm [shape: f32[2,2,32,32], index: 2, kind: input, shape index: {}]   ;;  %s2659_s3 = inlined_call_operand.hbm [shape: f32[8,2,32], index: 3, kind: output, shape index: {}]  }
   0x1   :  { %9 = vsyncpa [#allocation8], 0 }
   0x2   :  { %10 = vsyncpa [#allocation6], 0  ;;  %s2036_s12 = smov [#allocation7]   ;;  %s2037_s14 = smov [#allocation4]  }
   0x3   :  { %s28_s13 = sshll.u32 %s2036_s12, 4  ;;  %s16_s15 = sshll.u32 %s2037_s14, 4  ;;  %s29_s13 = int_to_ptr.vmem [resolvable:$true] %s28_s13  ;;  %s17_s15 = int_to_ptr.vmem [resolvable:$true] %s16_s15 }
   0x4   :  { %s1958_s16 = scalar_lea.vmem %s29_s13, 480  ;;  %p1963_p1 = scmp.lt.s32.totalorder %s29_s13, %s29_s13 }
   0x5   :  { %p1959_p0 = scmp.ne.s32.totalorder %s29_s13, %s1958_s16  ;;  %p1964_p2 = scmp.lt.s32.totalorder %s1958_s16, %s1958_s16 }
   0x7   :  { %p1965_p3 = por %p1964_p2, %p1963_p1 }
   0x9   :  { %p1966_p4 = pnand %p1965_p3, %p1959_p0 }
   0xb   :  { %1969 = shalt.err (!%p1966_p4)
}
   0xc   :  { %s2038_s17 = smov 32   ;;  %s2039_s18 = smov 2  }
   0xd   :  { %34 = dma.hbm_to_vmem [thread:$0]  %s2657_s1, 480, %s29_s13, [#allocation8], %s2038_s17, %s2038_s17, %s2039_s18  }
   0xe   :  { %s1978_s21 = scalar_lea.vmem %s17_s15, 256  ;;  %p1983_p6 = scmp.lt.s32.totalorder %s17_s15, %s17_s15 }
   0xf   :  { %p1979_p5 = scmp.ne.s32.totalorder %s17_s15, %s1978_s21  ;;  %p1984_p7 = scmp.lt.s32.totalorder %s1978_s21, %s1978_s21 }
  0x11   :  { %p1985_p8 = por %p1984_p7, %p1983_p6 }
  0x13   :  { %p1986_p9 = pnand %p1985_p8, %p1979_p5 }
  0x15   :  { %1989 = shalt.err (!%p1986_p9)
}
  0x16   :  { %22 = dma.hbm_to_vmem [thread:$0]  %s2656_s0, 256, %s17_s15, [#allocation5], %s2038_s17, %s2038_s17, %s2039_s18  }
  0x17   :  { %s2040_s24 = smov [#allocation9]  }
  0x18   :  { %s40_s25 = sshll.u32 %s2040_s24, 4  ;;  %s41_s25 = int_to_ptr.vmem [resolvable:$true] %s40_s25 }
  0x19   :  { %s1998_s26 = scalar_lea.vmem %s41_s25, 2048  ;;  %p2003_p11 = scmp.lt.s32.totalorder %s41_s25, %s41_s25 }
  0x1a   :  { %p1999_p10 = scmp.ne.s32.totalorder %s41_s25, %s1998_s26  ;;  %p2004_p12 = scmp.lt.s32.totalorder %s1998_s26, %s1998_s26 }
  0x1c   :  { %p2005_p13 = por %p2004_p12, %p2003_p11 }
  0x1e   :  { %p2006_p0 = pnand %p2005_p13, %p1999_p10 }
  0x20   :  { %2009 = shalt.err (!%p2006_p0)
}
  0x21   :  { %s2041_s1 = smov 128   ;;  %s2042_s27 = smov 8  }
  0x22   :  { %46 = dma.hbm_to_vmem [thread:$0]  %s2658_s2, 2048, %s41_s25, [#allocation8], %s2041_s1, %s2041_s1, %s2042_s27  }
  0x23   :  { %2030 = dma.done.wait [#allocation5], 256  }
  0x24   :  { %2031 = vsyncadd [#allocation5], 4294967040 }
  0x25   :  { %2032 = dma.done.wait [#allocation8], 2528  }
  0x26   :  { %2033 = vsyncadd [#allocation8], 4294964768  ;;  %vm60_vm0 = vcmask 254976   ;;  %v2043_v0 = vmov -65.0   ;;  %v65_v1 = vld [vmem:[#allocation7 + $0x6] sm:$0x3]  ;;  %v124_v11 = vlaneseq }
  0x27   :  { %61 = vst.msk [vmem:[#allocation2] sm:$0x3] %vm60_vm0, %v2043_v0  ;;  %63 = vst.msk [vmem:[#allocation2 + $0x4] sm:$0x3] %vm60_vm0, %v2043_v0  ;;  %v68_v2 = vmul.f32 -65.0, %v65_v1  ;;  %v2044_v28 = vmov 0.0  }
  0x28   :  { %62 = vst.msk [vmem:[#allocation2 + $0x2] sm:$0x3] %vm60_vm0, %v2043_v0  ;;  %v90_v3 = vld [vmem:[#allocation7 + $0x18] sm:$0x3]  ;;  %v2085_v6 = vld [vmem:[#allocation7 + $0x6] sm:$0x3] }
  0x29   :  { %71 = vst.msk [vmem:[#allocation3] sm:$0x3] %vm60_vm0, %v68_v2  ;;  %v2087_v7 = vadd.f32 140.0, %v90_v3  ;;  %v2091_v13 = vld [vmem:[#allocation7] sm:$0x3]  ;;  %v125_v18 = vshrl.u32 %v124_v11, 7 }
  0x2a   :  { %v106_v15 = vld [vmem:[#allocation4] sm:$0x3]  ;;  %v2094_v21 = vld [vmem:[#allocation7 + $0x12] sm:$0x3]  ;;  %v2096_v22 = vld [vmem:[#allocation7 + $0xc] sm:$0x3] }
  0x2b   :  { %v2098_v25 = vsub.s32 1, %v125_v18  ;;  %v2100_v26 = vsub.s32 0, %v125_v18  ;;  %v66_v41 = vld [vmem:[#allocation7 + $0x8] sm:$0x3]  ;;  %v332_v42 = vld [vmem:[#allocation4 + $0x2] sm:$0x3] }
  0x2c   :  { %v69_v43 = vmul.f32 -65.0, %v66_v41  ;;  %v555_v61 = vld [vmem:[#allocation4 + $0x4] sm:$0x3]  ;;  %v778_v18 = vld [vmem:[#allocation4 + $0x6] sm:$0x3]  ;;  %vm178_vm9 = vcmask 261120  }
  0x2d   :  { %v1001_v41 = vld [vmem:[#allocation4 + $0x8] sm:$0x3]  ;;  %vm212_vm10 = vcmask 1041409   ;;  %s2045_s0 = smov [#allocation10]  }
  0x2e   :  { %v96_v4 = vld [vmem:[#allocation2] sm:$0x3]  ;;  %72 = vst.msk [vmem:[#allocation3 + $0x2] sm:$0x3] %vm60_vm0, %v69_v43  ;;  %s1903_s2 = sshll.u32 %s2045_s0, 4  ;;  %s1904_s2 = int_to_ptr.vmem [resolvable:$true] %s1903_s2 }
  0x2f   :  { %v107_v5 = vmul.f32 0.04, %v96_v4  ;;  %v113_v10 = vmul.f32 %v96_v4, %v2085_v6  ;;  %s2010_s30 = scalar_lea.vmem %s1904_s2, 256  ;;  %p2015_p2 = scmp.lt.s32.totalorder %s1904_s2, %s1904_s2 }
  0x30   :  { %v101_v14 = vld [vmem:[#allocation3] sm:$0x3]  ;;  %p2011_p1 = scmp.ne.s32.totalorder %s1904_s2, %s2010_s30  ;;  %p2016_p3 = scmp.lt.s32.totalorder %s2010_s30, %s2010_s30 }
  0x31   :  { %v108_v8 = vadd.f32 5.0, %v107_v5  ;;  %v114_v17 = vsub.f32 %v113_v10, %v101_v14 }
  0x32   :  { %p2017_p4 = por %p2016_p3, %p2015_p2 }
  0x33   :  { %v109_v9 = vmul.f32 %v108_v8, %v96_v4  ;;  %v115_v20 = vmul.f32 %v114_v17, %v2091_v13 }
  0x34   :  { %p2018_p5 = pnand %p2017_p4, %p2011_p1 }
  0x35   :  { %v110_v12 = vadd.f32 %v109_v9, %v2087_v7  ;;  %v117_v24 = vadd.f32 %v115_v20, %v101_v14 }
  0x37   :  { %v111_v16 = vsub.f32 %v110_v12, %v101_v14  ;;  %v122_v27 = vadd.f32 %v117_v24, %v2094_v21 }
  0x39   :  { %v112_v19 = vadd.f32 %v111_v16, %v106_v15 }
  0x3b   :  { %v116_v23 = vadd.f32 %v112_v19, %v96_v4 }
  0x3d   :  { %vm118_vm1 = vcmp.gt.f32.partialorder %v116_v23, 30.0 }
  0x3e   :  { %v1916_v29 = vsel %vm118_vm1, 1.0, %v2044_v28  ;;  %v121_v30 = vsel %vm118_vm1, %v2096_v22, %v116_v23  ;;  %v123_v34 = vsel %vm118_vm1, %v122_v27, %v117_v24 }
  0x3f   :  { %v146_v31 = vrot.slane %v1916_v29, %v2098_v25  ;;  %v333_v32 = vmul.f32 0.04, %v121_v30  ;;  %v339_v33 = vmul.f32 %v121_v30, %v2085_v6  ;;  %v127_v35 = vrot.slane %v1916_v29, %v2100_v26 }
  0x41   :  { %v334_v36 = vadd.f32 5.0, %v333_v32  ;;  %v340_v37 = vsub.f32 %v339_v33, %v123_v34  ;;  %148 = vbcast.lane.b32.xlu1 %v146_v31, 256  ;;  %129 = vbcast.lane.b32.xlu0 %v127_v35, 256 }
  0x43   :  { %v335_v38 = vmul.f32 %v334_v36, %v121_v30  ;;  %v341_v39 = vmul.f32 %v340_v37, %v2091_v13 }
  0x45   :  { %v336_v40 = vadd.f32 %v335_v38, %v2087_v7  ;;  %152 = vbcast.lane.b32.xlu1 %v146_v31, 264  ;;  %133 = vbcast.lane.b32.xlu0 %v127_v35, 264  ;;  %v343_v45 = vadd.f32 %v341_v39, %v123_v34 }
  0x47   :  { %v337_v44 = vsub.f32 %v336_v40, %v123_v34  ;;  %v348_v48 = vadd.f32 %v343_v45, %v2094_v21 }
  0x49   :  { %156 = vbcast.lane.b32.xlu1 %v146_v31, 272  ;;  %v338_v46 = vadd.f32 %v337_v44, %v332_v42  ;;  %137 = vbcast.lane.b32.xlu0 %v127_v35, 272 }
  0x4b   :  { %v342_v47 = vadd.f32 %v338_v46, %v121_v30 }
  0x4d   :  { %160 = vbcast.lane.b32.xlu1 %v146_v31, 280  ;;  %vm344_vm2 = vcmp.gt.f32.partialorder %v342_v47, 30.0  ;;  %141 = vbcast.lane.b32.xlu0 %v127_v35, 280 }
  0x4e   :  { %v1919_v49 = vsel %vm344_vm2, 1.0, %v2044_v28  ;;  %v347_v50 = vsel %vm344_vm2, %v2096_v22, %v342_v47  ;;  %v349_v54 = vsel %vm344_vm2, %v348_v48, %v343_v45 }
  0x4f   :  { %v353_v51 = vrot.slane %v1919_v49, %v2100_v26  ;;  %v556_v52 = vmul.f32 0.04, %v347_v50  ;;  %v562_v53 = vmul.f32 %v347_v50, %v2085_v6  ;;  %v372_v57 = vrot.slane %v1919_v49, %v2098_v25 }
  0x51   :  { %v557_v55 = vadd.f32 5.0, %v556_v52  ;;  %v563_v56 = vsub.f32 %v562_v53, %v349_v54  ;;  %359 = vbcast.lane.b32.xlu1 %v353_v51, 264  ;;  %355 = vbcast.lane.b32.xlu0 %v353_v51, 256 }
  0x53   :  { %v558_v58 = vmul.f32 %v557_v55, %v347_v50  ;;  %v564_v59 = vmul.f32 %v563_v56, %v2091_v13 }
  0x55   :  { %v559_v60 = vadd.f32 %v558_v58, %v2087_v7  ;;  %378 = vbcast.lane.b32.xlu1 %v372_v57, 264  ;;  %374 = vbcast.lane.b32.xlu0 %v372_v57, 256  ;;  %v566_v63 = vadd.f32 %v564_v59, %v349_v54  ;;  %v1224_v59 = vld [vmem:[#allocation4 + $0xa] sm:$0x3] }
  0x57   :  { %v560_v62 = vsub.f32 %v559_v60, %v349_v54  ;;  %v571_v2 = vadd.f32 %v566_v63, %v2094_v21 }
  0x59   :  { %382 = vbcast.lane.b32.xlu1 %v372_v57, 272  ;;  %v561_v0 = vadd.f32 %v560_v62, %v555_v61  ;;  %363 = vbcast.lane.b32.xlu0 %v353_v51, 272 }
  0x5b   :  { %v565_v1 = vadd.f32 %v561_v0, %v347_v50 }
  0x5d   :  { %386 = vbcast.lane.b32.xlu1 %v372_v57, 280  ;;  %vm567_vm3 = vcmp.gt.f32.partialorder %v565_v1, 30.0  ;;  %367 = vbcast.lane.b32.xlu0 %v353_v51, 280 }
  0x5e   :  { %v1922_v3 = vsel %vm567_vm3, 1.0, %v2044_v28  ;;  %v570_v4 = vsel %vm567_vm3, %v2096_v22, %v565_v1  ;;  %v572_v10 = vsel %vm567_vm3, %v571_v2, %v566_v63 }
  0x5f   :  { %v576_v5 = vrot.slane %v1922_v3, %v2100_v26  ;;  %v779_v8 = vmul.f32 0.04, %v570_v4  ;;  %v785_v9 = vmul.f32 %v570_v4, %v2085_v6  ;;  %v595_v14 = vrot.slane %v1922_v3, %v2098_v25 }
  0x61   :  { %v780_v11 = vadd.f32 5.0, %v779_v8  ;;  %v786_v12 = vsub.f32 %v785_v9, %v572_v10  ;;  %582 = vbcast.lane.b32.xlu1 %v576_v5, 264  ;;  %578 = vbcast.lane.b32.xlu0 %v576_v5, 256 }
  0x63   :  { %v781_v15 = vmul.f32 %v780_v11, %v570_v4  ;;  %v787_v16 = vmul.f32 %v786_v12, %v2091_v13 }
  0x65   :  { %v782_v17 = vadd.f32 %v781_v15, %v2087_v7  ;;  %601 = vbcast.lane.b32.xlu1 %v595_v14, 264  ;;  %597 = vbcast.lane.b32.xlu0 %v595_v14, 256  ;;  %v789_v20 = vadd.f32 %v787_v16, %v572_v10  ;;  %v1447_v16 = vld [vmem:[#allocation4 + $0xc] sm:$0x3] }
  0x67   :  { %v783_v19 = vsub.f32 %v782_v17, %v572_v10  ;;  %v794_v27 = vadd.f32 %v789_v20, %v2094_v21 }
  0x69   :  { %605 = vbcast.lane.b32.xlu1 %v595_v14, 272  ;;  %v784_v23 = vadd.f32 %v783_v19, %v778_v18  ;;  %586 = vbcast.lane.b32.xlu0 %v576_v5, 272 }
  0x6b   :  { %v788_v24 = vadd.f32 %v784_v23, %v570_v4 }
  0x6d   :  { %609 = vbcast.lane.b32.xlu1 %v595_v14, 280  ;;  %vm790_vm4 = vcmp.gt.f32.partialorder %v788_v24, 30.0  ;;  %590 = vbcast.lane.b32.xlu0 %v576_v5, 280 }
  0x6e   :  { %v1925_v29 = vsel %vm790_vm4, 1.0, %v2044_v28  ;;  %v793_v30 = vsel %vm790_vm4, %v2096_v22, %v788_v24  ;;  %v795_v34 = vsel %vm790_vm4, %v794_v27, %v789_v20 }
  0x6f   :  { %v799_v31 = vrot.slane %v1925_v29, %v2100_v26  ;;  %v1002_v32 = vmul.f32 0.04, %v793_v30  ;;  %v1008_v33 = vmul.f32 %v793_v30, %v2085_v6  ;;  %v818_v37 = vrot.slane %v1925_v29, %v2098_v25 }
  0x71   :  { %v1003_v35 = vadd.f32 5.0, %v1002_v32  ;;  %v1009_v36 = vsub.f32 %v1008_v33, %v795_v34  ;;  %805 = vbcast.lane.b32.xlu1 %v799_v31, 264  ;;  %801 = vbcast.lane.b32.xlu0 %v799_v31, 256 }
  0x73   :  { %v1004_v38 = vmul.f32 %v1003_v35, %v793_v30  ;;  %v1010_v39 = vmul.f32 %v1009_v36, %v2091_v13 }
  0x75   :  { %v1005_v40 = vadd.f32 %v1004_v38, %v2087_v7  ;;  %824 = vbcast.lane.b32.xlu1 %v818_v37, 264  ;;  %820 = vbcast.lane.b32.xlu0 %v818_v37, 256  ;;  %v1012_v43 = vadd.f32 %v1010_v39, %v795_v34 }
  0x77   :  { %v1006_v42 = vsub.f32 %v1005_v40, %v795_v34  ;;  %v1017_v46 = vadd.f32 %v1012_v43, %v2094_v21  ;;  %v1670_v40 = vld [vmem:[#allocation4 + $0xe] sm:$0x3] }
  0x79   :  { %828 = vbcast.lane.b32.xlu1 %v818_v37, 272  ;;  %v1007_v44 = vadd.f32 %v1006_v42, %v1001_v41  ;;  %809 = vbcast.lane.b32.xlu0 %v799_v31, 272 }
  0x7b   :  { %v1011_v45 = vadd.f32 %v1007_v44, %v793_v30 }
  0x7d   :  { %832 = vbcast.lane.b32.xlu1 %v818_v37, 280  ;;  %vm1013_vm5 = vcmp.gt.f32.partialorder %v1011_v45, 30.0  ;;  %813 = vbcast.lane.b32.xlu0 %v799_v31, 280 }
  0x7e   :  { %v1928_v47 = vsel %vm1013_vm5, 1.0, %v2044_v28  ;;  %v1016_v48 = vsel %vm1013_vm5, %v2096_v22, %v1011_v45  ;;  %v1018_v52 = vsel %vm1013_vm5, %v1017_v46, %v1012_v43 }
  0x7f   :  { %v1022_v49 = vrot.slane %v1928_v47, %v2100_v26  ;;  %v1225_v50 = vmul.f32 0.04, %v1016_v48  ;;  %v1231_v51 = vmul.f32 %v1016_v48, %v2085_v6  ;;  %v1041_v55 = vrot.slane %v1928_v47, %v2098_v25 }
  0x81   :  { %v1226_v53 = vadd.f32 5.0, %v1225_v50  ;;  %v1232_v54 = vsub.f32 %v1231_v51, %v1018_v52  ;;  %1028 = vbcast.lane.b32.xlu1 %v1022_v49, 264  ;;  %1024 = vbcast.lane.b32.xlu0 %v1022_v49, 256  ;;  %v2172_v51 = vld [vmem:[#allocation9] sm:$0xff] }
  0x83   :  { %v1227_v56 = vmul.f32 %v1226_v53, %v1016_v48  ;;  %v1233_v57 = vmul.f32 %v1232_v54, %v2091_v13 }
  0x85   :  { %v1228_v58 = vadd.f32 %v1227_v56, %v2087_v7  ;;  %1047 = vbcast.lane.b32.xlu1 %v1041_v55, 264  ;;  %1043 = vbcast.lane.b32.xlu0 %v1041_v55, 256  ;;  %v1235_v61 = vadd.f32 %v1233_v57, %v1018_v52  ;;  %v2179_v57 = vld [vmem:[#allocation9 + $0x10] sm:$0xff] }
  0x87   :  { %v1229_v60 = vsub.f32 %v1228_v58, %v1018_v52  ;;  %v1240_v0 = vadd.f32 %v1235_v61, %v2094_v21 }
  0x89   :  { %1051 = vbcast.lane.b32.xlu1 %v1041_v55, 272  ;;  %v1230_v62 = vadd.f32 %v1229_v60, %v1224_v59  ;;  %1032 = vbcast.lane.b32.xlu0 %v1022_v49, 272 }
  0x8b   :  { %v1234_v63 = vadd.f32 %v1230_v62, %v1016_v48  ;;  %v2166_v48 = vld [vmem:[#allocation9 + $0x28] sm:$0xff] }
  0x8d   :  { %1055 = vbcast.lane.b32.xlu1 %v1041_v55, 280  ;;  %vm1236_vm6 = vcmp.gt.f32.partialorder %v1234_v63, 30.0  ;;  %1036 = vbcast.lane.b32.xlu0 %v1022_v49, 280  ;;  %v2168_v49 = vld [vmem:[#allocation9 + $0x8] sm:$0xff]  ;;  %v2176_v55 = vld [vmem:[#allocation9 + $0x30] sm:$0xff] }
  0x8e   :  { %v1931_v1 = vsel %vm1236_vm6, 1.0, %v2044_v28  ;;  %v1239_v2 = vsel %vm1236_vm6, %v2096_v22, %v1234_v63  ;;  %v1241_v8 = vsel %vm1236_vm6, %v1240_v0, %v1235_v61  ;;  %v2184_v63 = vld [vmem:[#allocation2 + $0x2] sm:$0x3] }
  0x8f   :  { %v1245_v3 = vrot.slane %v1931_v1, %v2100_v26  ;;  %v1448_v4 = vmul.f32 0.04, %v1239_v2  ;;  %v1454_v5 = vmul.f32 %v1239_v2, %v2085_v6  ;;  %v1264_v11 = vrot.slane %v1931_v1, %v2098_v25 }
  0x91   :  { %v1449_v9 = vadd.f32 5.0, %v1448_v4  ;;  %v1455_v10 = vsub.f32 %v1454_v5, %v1241_v8  ;;  %1251 = vbcast.lane.b32.xlu1 %v1245_v3, 264  ;;  %1247 = vbcast.lane.b32.xlu0 %v1245_v3, 256  ;;  %v2192_v5 = vld [vmem:[#allocation9 + $0x18] sm:$0xff] }
  0x93   :  { %v1450_v12 = vmul.f32 %v1449_v9, %v1239_v2  ;;  %v1456_v14 = vmul.f32 %v1455_v10, %v2091_v13 }
  0x95   :  { %v1451_v15 = vadd.f32 %v1450_v12, %v2087_v7  ;;  %1270 = vbcast.lane.b32.xlu1 %v1264_v11, 264  ;;  %1266 = vbcast.lane.b32.xlu0 %v1264_v11, 256  ;;  %v1458_v18 = vadd.f32 %v1456_v14, %v1241_v8  ;;  %v205_v12 = vmul.f32 0.04, %v2184_v63 }
  0x97   :  { %v1452_v17 = vsub.f32 %v1451_v15, %v1241_v8  ;;  %v1463_v23 = vadd.f32 %v1458_v18, %v2094_v21 }
  0x99   :  { %1274 = vbcast.lane.b32.xlu1 %v1264_v11, 272  ;;  %v1453_v19 = vadd.f32 %v1452_v17, %v1447_v16  ;;  %1255 = vbcast.lane.b32.xlu0 %v1245_v3, 272 }
  0x9b   :  { %v1457_v20 = vadd.f32 %v1453_v19, %v1239_v2  ;;  %v2188_v2 = vld [vmem:[#allocation9 + $0x38] sm:$0xff] }
  0x9d   :  { %1278 = vbcast.lane.b32.xlu1 %v1264_v11, 280  ;;  %vm1459_vm7 = vcmp.gt.f32.partialorder %v1457_v20, 30.0  ;;  %1259 = vbcast.lane.b32.xlu0 %v1245_v3, 280 }
  0x9e   :  { %v1934_v24 = vsel %vm1459_vm7, 1.0, %v2044_v28  ;;  %v1462_v27 = vsel %vm1459_vm7, %v2096_v22, %v1457_v20  ;;  %v1464_v32 = vsel %vm1459_vm7, %v1463_v23, %v1458_v18 }
  0x9f   :  { %v1468_v29 = vrot.slane %v1934_v24, %v2100_v26  ;;  %v1671_v30 = vmul.f32 0.04, %v1462_v27  ;;  %v1677_v31 = vmul.f32 %v1462_v27, %v2085_v6  ;;  %v1487_v35 = vrot.slane %v1934_v24, %v2098_v25 }
  0xa1   :  { %v1672_v33 = vadd.f32 5.0, %v1671_v30  ;;  %v1678_v34 = vsub.f32 %v1677_v31, %v1464_v32  ;;  %1474 = vbcast.lane.b32.xlu1 %v1468_v29, 264  ;;  %1470 = vbcast.lane.b32.xlu0 %v1468_v29, 256 }
  0xa3   :  { %v1673_v36 = vmul.f32 %v1672_v33, %v1462_v27  ;;  %v1679_v37 = vmul.f32 %v1678_v34, %v2091_v13 }
  0xa5   :  { %v1674_v38 = vadd.f32 %v1673_v36, %v2087_v7  ;;  %1493 = vbcast.lane.b32.xlu1 %v1487_v35, 264  ;;  %v1681_v39 = vadd.f32 %v1679_v37, %v1464_v32  ;;  %1489 = vbcast.lane.b32.xlu0 %v1487_v35, 256  ;;  %v2201_v37 = vld [vmem:[#allocation7 + $0x8] sm:$0x3] }
  0xa7   :  { %v1675_v41 = vsub.f32 %v1674_v38, %v1464_v32  ;;  %v1686_v6 = vadd.f32 %v1681_v39, %v2094_v21  ;;  %v91_v32 = vld [vmem:[#allocation7 + $0x1a] sm:$0x3] }
  0xa8   :  { %v2203_v38 = vadd.f32 140.0, %v91_v32 }
  0xa9   :  { %1497 = vbcast.lane.b32.xlu1 %v1487_v35, 272  ;;  %v1676_v42 = vadd.f32 %v1675_v41, %v1670_v40  ;;  %1478 = vbcast.lane.b32.xlu0 %v1468_v29, 272 }
  0xab   :  { %v1680_v43 = vadd.f32 %v1676_v42, %v1462_v27 }
  0xad   :  { %1501 = vbcast.lane.b32.xlu1 %v1487_v35, 280  ;;  %vm1682_vm8 = vcmp.gt.f32.partialorder %v1680_v43, 30.0  ;;  %1482 = vbcast.lane.b32.xlu0 %v1468_v29, 280  ;;  %v206_v29 = vadd.f32 5.0, %v205_v12 }
  0xae   :  { %v1937_v44 = vsel %vm1682_vm8, 1.0, %v2044_v28  ;;  %v1685_v13 = vsel %vm1682_vm8, %v2096_v22, %v1680_v43  ;;  %v1687_v45 = vsel %vm1682_vm8, %v1686_v6, %v1681_v39  ;;  %v2170_v22 = vld [vmem:[#allocation9 + $0x20] sm:$0xff] }
  0xaf   :  { %v1691_v7 = vrot.slane %v1937_v44, %v2100_v26  ;;  %1892 = vst.msk [vmem:[#allocation2] sm:$0x3] %vm60_vm0, %v1685_v13  ;;  %1893 = vst.msk [vmem:[#allocation3] sm:$0x3] %vm60_vm0, %v1687_v45  ;;  %v1710_v46 = vrot.slane %v1937_v44, %v2098_v25  ;;  %v207_v39 = vmul.f32 %v206_v29, %v2184_v63 }
  0xb1   :  { %1697 = vbcast.lane.b32.xlu1 %v1691_v7, 264  ;;  %1693 = vbcast.lane.b32.xlu0 %v1691_v7, 256 }
  0xb3   :  { %v149_v21 = vpop.permute.xlu1 %148  ;;  %v130_v47 = vpop.permute.xlu0 %129 }
  0xb4   :  { %v174_v56 = vmul.f32 %v2170_v22, %v149_v21  ;;  %v170_v58 = vmul.f32 %v2172_v51, %v130_v47  ;;  %v103_v47 = vld [vmem:[#allocation3 + $0x2] sm:$0x3] }
  0xb5   :  { %1716 = vbcast.lane.b32.xlu1 %v1710_v46, 264  ;;  %1712 = vbcast.lane.b32.xlu0 %v1710_v46, 256 }
  0xb6   :  { %v192_v3 = vsel %vm178_vm9, %v174_v56, 0.0  ;;  %v179_v8 = vsel %vm178_vm9, %v170_v58, 0.0 }
  0xb7   :  { %v153_v50 = vpop.permute.xlu1 %152  ;;  %v134_v53 = vpop.permute.xlu0 %133 }
  0xb8   :  { %v175_v52 = vmul.f32 %v2166_v48, %v153_v50  ;;  %v171_v54 = vmul.f32 %v2168_v49, %v134_v53  ;;  %v208_v50 = vadd.f32 %v207_v39, %v2203_v38 }
  0xb9   :  { %1720 = vbcast.lane.b32.xlu1 %v1710_v46, 272  ;;  %1701 = vbcast.lane.b32.xlu0 %v1691_v7, 272 }
  0xba   :  { %v193_v60 = vsel %vm178_vm9, %v175_v52, 0.0  ;;  %v180_v0 = vsel %vm178_vm9, %v171_v54, 0.0  ;;  %v209_v12 = vsub.f32 %v208_v50, %v103_v47 }
  0xbb   :  { %v157_v59 = vpop.permute.xlu1 %156  ;;  %v138_v62 = vpop.permute.xlu0 %137  ;;  %v194_v9 = vadd.f32 %v193_v60, %v192_v3  ;;  %v181_v14 = vadd.f32 %v180_v0, %v179_v8 }
  0xbc   :  { %v176_v61 = vmul.f32 %v2176_v55, %v157_v59  ;;  %v172_v1 = vmul.f32 %v2179_v57, %v138_v62 }
  0xbd   :  { %1724 = vbcast.lane.b32.xlu1 %v1710_v46, 280  ;;  %1705 = vbcast.lane.b32.xlu0 %v1691_v7, 280  ;;  %v216_v7 = vmul.f32 %v2184_v63, %v2201_v37 }
  0xbe   :  { %v195_v4 = vsel %vm178_vm9, %v176_v61, 0.0  ;;  %v182_v10 = vsel %vm178_vm9, %v172_v1, 0.0 }
  0xbf   :  { %v161_v11 = vpop.permute.xlu1 %160  ;;  %v142_v16 = vpop.permute.xlu0 %141  ;;  %v196_v17 = vadd.f32 %v195_v4, %v194_v9  ;;  %v183_v19 = vadd.f32 %v182_v10, %v181_v14  ;;  %v217_v3 = vsub.f32 %v216_v7, %v103_v47 }
  0xc0   :  { %v177_v15 = vmul.f32 %v2188_v2, %v161_v11  ;;  %v173_v18 = vmul.f32 %v2192_v5, %v142_v16  ;;  %v2221_v11 = vld [vmem:[#allocation7 + $0x2] sm:$0x3] }
  0xc2   :  { %v197_v20 = vsel %vm178_vm9, %v177_v15, 0.0  ;;  %v184_v24 = vsel %vm178_vm9, %v173_v18, 0.0 }
  0xc3   :  { %v198_v23 = vadd.f32 %v197_v20, %v196_v17  ;;  %v360_v27 = vpop.permute.xlu1 %359  ;;  %v185_v30 = vadd.f32 %v184_v24, %v183_v19  ;;  %v356_v31 = vpop.permute.xlu0 %355 }
  0xc4   :  { %v397_v43 = vmul.f32 %v360_v27, %v2168_v49  ;;  %v396_v44 = vmul.f32 %v356_v31, %v2172_v51  ;;  %v218_v27 = vmul.f32 %v217_v3, %v2221_v11 }
  0xc5   :  { %v199_v33 = vrot.slane %v198_v23, 4  ;;  %v186_v34 = vrot.slane %v185_v30, 4 }
  0xc6   :  { %v405_v60 = vsel %vm178_vm9, %v397_v43, 0.0  ;;  %v404_v61 = vsel %vm178_vm9, %v396_v44, 0.0 }
  0xc7   :  { %v200_v35 = vadd.f32 %v199_v33, %v198_v23  ;;  %v379_v36 = vpop.permute.xlu1 %378  ;;  %v187_v40 = vadd.f32 %v186_v34, %v185_v30  ;;  %v375_v42 = vpop.permute.xlu0 %374  ;;  %v406_v15 = vadd.f32 %v405_v60, %v404_v61 }
  0xc8   :  { %v401_v41 = vmul.f32 %v379_v36, %v2166_v48  ;;  %v400_v13 = vmul.f32 %v375_v42, %v2170_v22  ;;  %v2232_v42 = vld [vmem:[#allocation7 + $0xe] sm:$0x3] }
  0xc9   :  { %v201_v6 = vrot.slane %v200_v35, 2  ;;  %v188_v45 = vrot.slane %v187_v40, 2 }
  0xca   :  { %v418_v53 = vsel %vm178_vm9, %v401_v41, 0.0  ;;  %v417_v54 = vsel %vm178_vm9, %v400_v13, 0.0  ;;  %v2234_v13 = vld [vmem:[#allocation7 + $0x14] sm:$0x3] }
  0xcb   :  { %v202_v46 = vadd.f32 %v201_v6, %v200_v35  ;;  %v383_v21 = vpop.permute.xlu1 %382  ;;  %v189_v52 = vadd.f32 %v188_v45, %v187_v40  ;;  %v364_v58 = vpop.permute.xlu0 %363  ;;  %v419_v8 = vadd.f32 %v418_v53, %v417_v54  ;;  %v220_v6 = vadd.f32 %v218_v27, %v103_v47 }
  0xcc   :  { %v402_v56 = vmul.f32 %v383_v21, %v2176_v55  ;;  %v398_v62 = vmul.f32 %v364_v58, %v2179_v57 }
  0xcd   :  { %v203_v59 = vrot.slane %v202_v46, 1  ;;  %v190_v0 = vrot.slane %v189_v52, 1 }
  0xce   :  { %v420_v1 = vsel %vm178_vm9, %v402_v56, 0.0  ;;  %v407_v9 = vsel %vm178_vm9, %v398_v62, 0.0  ;;  %v225_v56 = vadd.f32 %v220_v6, %v2234_v13 }
  0xcf   :  { %v204_v4 = vadd.f32 %v203_v59, %v202_v46  ;;  %v387_v10 = vpop.permute.xlu1 %386  ;;  %v191_v14 = vadd.f32 %v190_v0, %v189_v52  ;;  %v368_v17 = vpop.permute.xlu0 %367  ;;  %v421_v18 = vadd.f32 %v420_v1, %v419_v8  ;;  %v408_v23 = vadd.f32 %v407_v9, %v406_v15 }
  0xd0   :  { %v403_v16 = vmul.f32 %v387_v10, %v2188_v2  ;;  %v399_v19 = vmul.f32 %v368_v17, %v2192_v5 }
  0xd1   :  { %v213_v20 = vsel %vm212_vm10, %v204_v4, %v191_v14 }
  0xd2   :  { %v422_v24 = vsel %vm178_vm9, %v403_v16, 0.0  ;;  %v409_v30 = vsel %vm178_vm9, %v399_v19, 0.0  ;;  %v215_v32 = vadd.f32 %v213_v20, %v209_v12 }
  0xd3   :  { %v423_v29 = vadd.f32 %v422_v24, %v421_v18  ;;  %v583_v31 = vpop.permute.xlu1 %582  ;;  %v410_v33 = vadd.f32 %v409_v30, %v408_v23  ;;  %v579_v35 = vpop.permute.xlu0 %578 }
  0xd4   :  { %v620_v34 = vmul.f32 %v583_v31, %v2168_v49  ;;  %v619_v39 = vmul.f32 %v579_v35, %v2172_v51  ;;  %v219_v40 = vadd.f32 %v215_v32, %v2184_v63 }
  0xd5   :  { %v424_v36 = vrot.slane %v423_v29, 4  ;;  %v411_v41 = vrot.slane %v410_v33, 4 }
  0xd6   :  { %vm221_vm11 = vcmp.gt.f32.partialorder %v219_v40, 30.0  ;;  %v628_v7 = vsel %vm178_vm9, %v620_v34, 0.0  ;;  %v627_v46 = vsel %vm178_vm9, %v619_v39, 0.0 }
  0xd7   :  { %v425_v43 = vadd.f32 %v424_v36, %v423_v29  ;;  %v602_v44 = vpop.permute.xlu1 %601  ;;  %v412_v45 = vadd.f32 %v411_v41, %v410_v33  ;;  %v598_v21 = vpop.permute.xlu0 %597  ;;  %v1917_v50 = vsel %vm221_vm11, 1.0, %v2044_v28  ;;  %v224_v47 = vsel %vm221_vm11, %v2232_v42, %v219_v40 }
  0xd8   :  { %v624_v63 = vmul.f32 %v602_v44, %v2166_v48  ;;  %v623_v53 = vmul.f32 %v598_v21, %v2170_v22  ;;  %v230_v58 = vrot.slane %v1917_v50, %v2100_v26  ;;  %v430_v59 = vmul.f32 0.04, %v224_v47 }
  0xd9   :  { %v426_v52 = vrot.slane %v425_v43, 2  ;;  %v413_v54 = vrot.slane %v412_v45, 2  ;;  %v440_v61 = vmul.f32 %v224_v47, %v2201_v37  ;;  %v629_v1 = vadd.f32 %v628_v7, %v627_v46 }
  0xda   :  { %v431_v3 = vadd.f32 5.0, %v430_v59  ;;  %236 = vbcast.lane.b32.xlu1 %v230_v58, 264  ;;  %232 = vbcast.lane.b32.xlu0 %v230_v58, 256  ;;  %v641_v10 = vsel %vm178_vm9, %v624_v63, 0.0  ;;  %v640_v12 = vsel %vm178_vm9, %v623_v53, 0.0  ;;  %v226_v16 = vsel %vm221_vm11, %v225_v56, %v220_v6 }
  0xdb   :  { %v427_v60 = vadd.f32 %v426_v52, %v425_v43  ;;  %v606_v62 = vpop.permute.xlu1 %605  ;;  %v414_v0 = vadd.f32 %v413_v54, %v412_v45  ;;  %v587_v8 = vpop.permute.xlu0 %586  ;;  %v249_v18 = vrot.slane %v1917_v50, %v2098_v25  ;;  %v441_v20 = vsub.f32 %v440_v61, %v226_v16  ;;  %v67_v63 = vld [vmem:[#allocation7 + $0xa] sm:$0x3] }
  0xdc   :  { %v625_v4 = vmul.f32 %v606_v62, %v2176_v55  ;;  %v621_v14 = vmul.f32 %v587_v8, %v2179_v57  ;;  %v432_v17 = vmul.f32 %v431_v3, %v224_v47  ;;  %v642_v30 = vadd.f32 %v641_v10, %v640_v12 }
  0xdd   :  { %v428_v9 = vrot.slane %v427_v60, 1  ;;  %v415_v15 = vrot.slane %v414_v0, 1  ;;  %v442_v41 = vmul.f32 %v441_v20, %v2221_v11 }
  0xde   :  { %v643_v23 = vsel %vm178_vm9, %v625_v4, 0.0  ;;  %v630_v24 = vsel %vm178_vm9, %v621_v14, 0.0  ;;  %v433_v31 = vadd.f32 %v432_v17, %v2203_v38  ;;  %255 = vbcast.lane.b32.xlu1 %v249_v18, 264  ;;  %251 = vbcast.lane.b32.xlu0 %v249_v18, 256 }
  0xdf   :  { %v429_v19 = vadd.f32 %v428_v9, %v427_v60  ;;  %v610_v27 = vpop.permute.xlu1 %609  ;;  %v416_v29 = vadd.f32 %v415_v15, %v414_v0  ;;  %v591_v32 = vpop.permute.xlu0 %590  ;;  %v644_v39 = vadd.f32 %v643_v23, %v642_v30  ;;  %v631_v40 = vadd.f32 %v630_v24, %v629_v1 }
  0xe0   :  { %v626_v33 = vmul.f32 %v610_v27, %v2188_v2  ;;  %v622_v34 = vmul.f32 %v591_v32, %v2192_v5  ;;  %v434_v36 = vsub.f32 %v433_v31, %v226_v16  ;;  %v444_v53 = vadd.f32 %v442_v41, %v226_v16 }
  0xe1   :  { %v437_v35 = vsel %vm212_vm10, %v429_v19, %v416_v29  ;;  %v70_v60 = vmul.f32 -65.0, %v67_v63 }
  0xe2   :  { %v645_v6 = vsel %vm178_vm9, %v626_v33, 0.0  ;;  %v632_v43 = vsel %vm178_vm9, %v622_v34, 0.0  ;;  %259 = vbcast.lane.b32.xlu1 %v249_v18, 272  ;;  %240 = vbcast.lane.b32.xlu0 %v230_v58, 272  ;;  %v439_v21 = vadd.f32 %v437_v35, %v434_v36 }
  0xe3   :  { %v806_v44 = vpop.permute.xlu1 %805  ;;  %v646_v45 = vadd.f32 %v645_v6, %v644_v39  ;;  %v633_v7 = vadd.f32 %v632_v43, %v631_v40  ;;  %v802_v46 = vpop.permute.xlu0 %801  ;;  %73 = vst.msk [vmem:[#allocation3 + $0x4] sm:$0x3] %vm60_vm0, %v70_v60 }
  0xe4   :  { %v843_v54 = vmul.f32 %v806_v44, %v2168_v49  ;;  %v443_v59 = vadd.f32 %v439_v21, %v224_v47  ;;  %v842_v1 = vmul.f32 %v802_v46, %v2172_v51 }
  0xe5   :  { %v647_v50 = vrot.slane %v646_v45, 4  ;;  %v634_v52 = vrot.slane %v633_v7, 4 }
  0xe6   :  { %263 = vbcast.lane.b32.xlu1 %v249_v18, 280  ;;  %244 = vbcast.lane.b32.xlu0 %v230_v58, 280  ;;  %vm445_vm12 = vcmp.gt.f32.partialorder %v443_v59, 30.0  ;;  %v449_v58 = vadd.f32 %v444_v53, %v2234_v13  ;;  %v851_v12 = vsel %vm178_vm9, %v843_v54, 0.0  ;;  %v850_v24 = vsel %vm178_vm9, %v842_v1, 0.0 }
  0xe7   :  { %v825_v56 = vpop.permute.xlu1 %824  ;;  %v648_v61 = vadd.f32 %v647_v50, %v646_v45  ;;  %v635_v62 = vadd.f32 %v634_v52, %v633_v7  ;;  %v821_v0 = vpop.permute.xlu0 %820  ;;  %v1920_v47 = vsel %vm445_vm12, 1.0, %v2044_v28  ;;  %v448_v10 = vsel %vm445_vm12, %v2232_v42, %v443_v59 }
  0xe8   :  { %v847_v3 = vmul.f32 %v825_v56, %v2166_v48  ;;  %v846_v4 = vmul.f32 %v821_v0, %v2170_v22  ;;  %v454_v15 = vrot.slane %v1920_v47, %v2100_v26  ;;  %v653_v20 = vmul.f32 0.04, %v448_v10 }
  0xe9   :  { %v649_v8 = vrot.slane %v648_v61, 2  ;;  %v636_v9 = vrot.slane %v635_v62, 2  ;;  %v663_v27 = vmul.f32 %v448_v10, %v2201_v37  ;;  %v450_v33 = vsel %vm445_vm12, %v449_v58, %v444_v53 }
  0xea   :  { %v864_v14 = vsel %vm178_vm9, %v847_v3, 0.0  ;;  %v863_v19 = vsel %vm178_vm9, %v846_v4, 0.0  ;;  %460 = vbcast.lane.b32.xlu1 %v454_v15, 264  ;;  %456 = vbcast.lane.b32.xlu0 %v454_v15, 256  ;;  %v654_v34 = vadd.f32 5.0, %v653_v20  ;;  %v473_v40 = vrot.slane %v1920_v47, %v2098_v25 }
  0xeb   :  { %v829_v16 = vpop.permute.xlu1 %828  ;;  %v650_v17 = vadd.f32 %v649_v8, %v648_v61  ;;  %v637_v18 = vadd.f32 %v636_v9, %v635_v62  ;;  %v810_v23 = vpop.permute.xlu0 %809  ;;  %v865_v35 = vadd.f32 %v864_v14, %v863_v19  ;;  %v664_v36 = vsub.f32 %v663_v27, %v450_v33 }
  0xec   :  { %v848_v29 = vmul.f32 %v829_v16, %v2176_v55  ;;  %v844_v30 = vmul.f32 %v810_v23, %v2179_v57  ;;  %v655_v44 = vmul.f32 %v654_v34, %v448_v10  ;;  %v852_v46 = vadd.f32 %v851_v12, %v850_v24 }
  0xed   :  { %v651_v31 = vrot.slane %v650_v17, 1  ;;  %v638_v32 = vrot.slane %v637_v18, 1  ;;  %v665_v52 = vmul.f32 %v664_v36, %v2221_v11 }
  0xee   :  { %v866_v39 = vsel %vm178_vm9, %v848_v29, 0.0  ;;  %v853_v45 = vsel %vm178_vm9, %v844_v30, 0.0  ;;  %479 = vbcast.lane.b32.xlu1 %v473_v40, 264  ;;  %475 = vbcast.lane.b32.xlu0 %v473_v40, 256  ;;  %v656_v50 = vadd.f32 %v655_v44, %v2203_v38 }
  0xef   :  { %v833_v41 = vpop.permute.xlu1 %832  ;;  %v652_v6 = vadd.f32 %v651_v31, %v650_v17  ;;  %v639_v43 = vadd.f32 %v638_v32, %v637_v18  ;;  %v814_v7 = vpop.permute.xlu0 %813  ;;  %v867_v63 = vadd.f32 %v866_v39, %v865_v35  ;;  %v854_v56 = vadd.f32 %v853_v45, %v852_v46 }
  0xf0   :  { %v849_v21 = vmul.f32 %v833_v41, %v2188_v2  ;;  %v845_v53 = vmul.f32 %v814_v7, %v2192_v5  ;;  %v657_v61 = vsub.f32 %v656_v50, %v450_v33  ;;  %v667_v4 = vadd.f32 %v665_v52, %v450_v33 }
  0xf1   :  { %v660_v54 = vsel %vm212_vm10, %v652_v6, %v639_v43 }
  0xf2   :  { %v868_v59 = vsel %vm178_vm9, %v849_v21, 0.0  ;;  %v855_v0 = vsel %vm178_vm9, %v845_v53, 0.0  ;;  %483 = vbcast.lane.b32.xlu1 %v473_v40, 272  ;;  %464 = vbcast.lane.b32.xlu0 %v454_v15, 272  ;;  %v662_v9 = vadd.f32 %v660_v54, %v657_v61  ;;  %v672_v24 = vadd.f32 %v667_v4, %v2234_v13 }
  0xf3   :  { %v1029_v60 = vpop.permute.xlu1 %1028  ;;  %v869_v62 = vadd.f32 %v868_v59, %v867_v63  ;;  %v1025_v1 = vpop.permute.xlu0 %1024  ;;  %v856_v3 = vadd.f32 %v855_v0, %v854_v56 }
  0xf4   :  { %v1066_v58 = vmul.f32 %v1029_v60, %v2168_v49  ;;  %v1065_v16 = vmul.f32 %v1025_v1, %v2172_v51  ;;  %v666_v19 = vadd.f32 %v662_v9, %v448_v10 }
  0xf5   :  { %v870_v8 = vrot.slane %v869_v62, 4  ;;  %v857_v47 = vrot.slane %v856_v3, 4 }
  0xf6   :  { %487 = vbcast.lane.b32.xlu1 %v473_v40, 280  ;;  %468 = vbcast.lane.b32.xlu0 %v454_v15, 280  ;;  %vm668_vm13 = vcmp.gt.f32.partialorder %v666_v19, 30.0  ;;  %v1074_v34 = vsel %vm178_vm9, %v1066_v58, 0.0  ;;  %v1073_v35 = vsel %vm178_vm9, %v1065_v16, 0.0 }
  0xf7   :  { %v1048_v12 = vpop.permute.xlu1 %1047  ;;  %v871_v14 = vadd.f32 %v870_v8, %v869_v62  ;;  %v1044_v18 = vpop.permute.xlu0 %1043  ;;  %v858_v20 = vadd.f32 %v857_v47, %v856_v3  ;;  %v1923_v32 = vsel %vm668_vm13, 1.0, %v2044_v28  ;;  %v2302_v10 = vsel %vm668_vm13, %v2232_v42, %v666_v19 }
  0xf8   :  { %v1070_v17 = vmul.f32 %v1048_v12, %v2166_v48  ;;  %v1069_v23 = vmul.f32 %v1044_v18, %v2170_v22  ;;  %v677_v36 = vrot.slane %v1923_v32, %v2100_v26  ;;  %v876_v41 = vmul.f32 0.04, %v2302_v10 }
  0xf9   :  { %v872_v27 = vrot.slane %v871_v14, 2  ;;  %v859_v30 = vrot.slane %v858_v20, 2  ;;  %v886_v6 = vmul.f32 %v2302_v10, %v2201_v37  ;;  %v673_v7 = vsel %vm668_vm13, %v672_v24, %v667_v4 }
  0xfa   :  { %v1087_v29 = vsel %vm178_vm9, %v1070_v17, 0.0  ;;  %v1086_v31 = vsel %vm178_vm9, %v1069_v23, 0.0  ;;  %683 = vbcast.lane.b32.xlu1 %v677_v36, 264  ;;  %679 = vbcast.lane.b32.xlu0 %v677_v36, 256  ;;  %v877_v50 = vadd.f32 5.0, %v876_v41  ;;  %v696_v59 = vrot.slane %v1923_v32, %v2098_v25 }
  0xfb   :  { %v1052_v33 = vpop.permute.xlu1 %1051  ;;  %v873_v15 = vadd.f32 %v872_v27, %v871_v14  ;;  %v1033_v39 = vpop.permute.xlu0 %1032  ;;  %v860_v40 = vadd.f32 %v859_v30, %v858_v20  ;;  %v1088_v45 = vadd.f32 %v1087_v29, %v1086_v31  ;;  %v887_v52 = vsub.f32 %v886_v6, %v673_v7 }
  0xfc   :  { %v1071_v43 = vmul.f32 %v1052_v33, %v2176_v55  ;;  %v1067_v46 = vmul.f32 %v1033_v39, %v2179_v57  ;;  %v1075_v0 = vadd.f32 %v1074_v34, %v1073_v35  ;;  %v878_v1 = vmul.f32 %v877_v50, %v2302_v10 }
  0xfd   :  { %v874_v44 = vrot.slane %v873_v15, 1  ;;  %v861_v21 = vrot.slane %v860_v40, 1  ;;  %v888_v4 = vmul.f32 %v887_v52, %v2221_v11 }
  0xfe   :  { %v1089_v63 = vsel %vm178_vm9, %v1071_v43, 0.0  ;;  %v1076_v56 = vsel %vm178_vm9, %v1067_v46, 0.0  ;;  %702 = vbcast.lane.b32.xlu1 %v696_v59, 264  ;;  %698 = vbcast.lane.b32.xlu0 %v696_v59, 256  ;;  %v879_v47 = vadd.f32 %v878_v1, %v2203_v38 }
  0xff   :  { %v1056_v53 = vpop.permute.xlu1 %1055  ;;  %v875_v54 = vadd.f32 %v874_v44, %v873_v15  ;;  %v1037_v61 = vpop.permute.xlu0 %1036  ;;  %v862_v62 = vadd.f32 %v861_v21, %v860_v40  ;;  %v1090_v3 = vadd.f32 %v1089_v63, %v1088_v45  ;;  %v1077_v58 = vadd.f32 %v1076_v56, %v1075_v0 }
 0x100   :  { %v1072_v60 = vmul.f32 %v1056_v53, %v2188_v2  ;;  %v1068_v9 = vmul.f32 %v1037_v61, %v2192_v5  ;;  %v880_v19 = vsub.f32 %v879_v47, %v673_v7  ;;  %v890_v24 = vadd.f32 %v888_v4, %v673_v7 }
 0x101   :  { %v883_v16 = vsel %vm212_vm10, %v875_v54, %v862_v62 }
 0x102   :  { %v1091_v8 = vsel %vm178_vm9, %v1072_v60, 0.0  ;;  %v1078_v17 = vsel %vm178_vm9, %v1068_v9, 0.0  ;;  %706 = vbcast.lane.b32.xlu1 %v696_v59, 272  ;;  %687 = vbcast.lane.b32.xlu0 %v677_v36, 272  ;;  %v885_v33 = vadd.f32 %v883_v16, %v880_v19  ;;  %v895_v41 = vadd.f32 %v890_v24, %v2234_v13 }
 0x103   :  { %v1092_v12 = vadd.f32 %v1091_v8, %v1090_v3  ;;  %v1252_v14 = vpop.permute.xlu1 %1251  ;;  %v1248_v18 = vpop.permute.xlu0 %1247  ;;  %v1079_v23 = vadd.f32 %v1078_v17, %v1077_v58 }
 0x104   :  { %v1289_v27 = vmul.f32 %v1252_v14, %v2168_v49  ;;  %v1288_v31 = vmul.f32 %v1248_v18, %v2172_v51  ;;  %v889_v6 = vadd.f32 %v885_v33, %v2302_v10 }
 0x105   :  { %v1093_v20 = vrot.slane %v1092_v12, 4  ;;  %v1080_v30 = vrot.slane %v1079_v23, 4 }
 0x106   :  { %710 = vbcast.lane.b32.xlu1 %v696_v59, 280  ;;  %691 = vbcast.lane.b32.xlu0 %v677_v36, 280  ;;  %v1297_v45 = vsel %vm178_vm9, %v1289_v27, 0.0  ;;  %v1296_v7 = vsel %vm178_vm9, %v1288_v31, 0.0  ;;  %vm891_vm14 = vcmp.gt.f32.partialorder %v889_v6, 30.0 }
 0x107   :  { %v1094_v29 = vadd.f32 %v1093_v20, %v1092_v12  ;;  %v1271_v32 = vpop.permute.xlu1 %1270  ;;  %v1267_v34 = vpop.permute.xlu0 %1266  ;;  %v1081_v39 = vadd.f32 %v1080_v30, %v1079_v23  ;;  %v1926_v36 = vsel %vm891_vm14, 1.0, %v2044_v28  ;;  %v894_v10 = vsel %vm891_vm14, %v2232_v42, %v889_v6 }
 0x108   :  { %v1293_v15 = vmul.f32 %v1271_v32, %v2166_v48  ;;  %v1292_v40 = vmul.f32 %v1267_v34, %v2170_v22  ;;  %v900_v56 = vrot.slane %v1926_v36, %v2100_v26  ;;  %v1099_v59 = vmul.f32 0.04, %v894_v10 }
 0x109   :  { %v1095_v35 = vrot.slane %v1094_v29, 2  ;;  %v1082_v44 = vrot.slane %v1081_v39, 2  ;;  %v1109_v60 = vmul.f32 %v894_v10, %v2201_v37  ;;  %v896_v62 = vsel %vm891_vm14, %v895_v41, %v890_v24 }
 0x10a   :  { %v1310_v21 = vsel %vm178_vm9, %v1293_v15, 0.0  ;;  %v1309_v50 = vsel %vm178_vm9, %v1292_v40, 0.0  ;;  %v1298_v4 = vadd.f32 %v1297_v45, %v1296_v7  ;;  %v1100_v9 = vadd.f32 5.0, %v1099_v59  ;;  %906 = vbcast.lane.b32.xlu1 %v900_v56, 264  ;;  %902 = vbcast.lane.b32.xlu0 %v900_v56, 256 }
 0x10b   :  { %v1096_v43 = vadd.f32 %v1095_v35, %v1094_v29  ;;  %v1275_v46 = vpop.permute.xlu1 %1274  ;;  %v1256_v63 = vpop.permute.xlu0 %1255  ;;  %v1083_v54 = vadd.f32 %v1082_v44, %v1081_v39  ;;  %v1311_v8 = vadd.f32 %v1310_v21, %v1309_v50  ;;  %v1110_v47 = vsub.f32 %v1109_v60, %v896_v62 }
 0x10c   :  { %v1294_v52 = vmul.f32 %v1275_v46, %v2176_v55  ;;  %v1290_v1 = vmul.f32 %v1256_v63, %v2179_v57  ;;  %v1101_v19 = vmul.f32 %v1100_v9, %v894_v10  ;;  %v919_v23 = vrot.slane %v1926_v36, %v2098_v25 }
 0x10d   :  { %v1097_v53 = vrot.slane %v1096_v43, 1  ;;  %v1084_v61 = vrot.slane %v1083_v54, 1  ;;  %v1111_v24 = vmul.f32 %v1110_v47, %v2221_v11 }
 0x10e   :  { %v1312_v0 = vsel %vm178_vm9, %v1294_v52, 0.0  ;;  %v1299_v14 = vsel %vm178_vm9, %v1290_v1, 0.0  ;;  %v1102_v32 = vadd.f32 %v1101_v19, %v2203_v38  ;;  %925 = vbcast.lane.b32.xlu1 %v919_v23, 264  ;;  %921 = vbcast.lane.b32.xlu0 %v919_v23, 256 }
 0x10f   :  { %v1279_v3 = vpop.permute.xlu1 %1278  ;;  %v1260_v58 = vpop.permute.xlu0 %1259  ;;  %v1098_v12 = vadd.f32 %v1097_v53, %v1096_v43  ;;  %v1085_v18 = vadd.f32 %v1084_v61, %v1083_v54  ;;  %v1313_v20 = vadd.f32 %v1312_v0, %v1311_v8  ;;  %v1300_v27 = vadd.f32 %v1299_v14, %v1298_v4 }
 0x110   :  { %v1295_v16 = vmul.f32 %v1279_v3, %v2188_v2  ;;  %v1291_v17 = vmul.f32 %v1260_v58, %v2192_v5  ;;  %v1103_v39 = vsub.f32 %v1102_v32, %v896_v62  ;;  %v1113_v41 = vadd.f32 %v1111_v24, %v896_v62 }
 0x111   :  { %v1106_v35 = vsel %vm212_vm10, %v1098_v12, %v1085_v18 }
 0x112   :  { %v1314_v29 = vsel %vm178_vm9, %v1295_v16, 0.0  ;;  %v1301_v30 = vsel %vm178_vm9, %v1291_v17, 0.0  ;;  %929 = vbcast.lane.b32.xlu1 %v919_v23, 272  ;;  %910 = vbcast.lane.b32.xlu0 %v900_v56, 272  ;;  %v1108_v52 = vadd.f32 %v1106_v35, %v1103_v39  ;;  %v1118_v54 = vadd.f32 %v1113_v41, %v2234_v13 }
 0x113   :  { %v1475_v31 = vpop.permute.xlu1 %1474  ;;  %v1315_v33 = vadd.f32 %v1314_v29, %v1313_v20  ;;  %v1471_v15 = vpop.permute.xlu0 %1470  ;;  %v1302_v34 = vadd.f32 %v1301_v30, %v1300_v27 }
 0x114   :  { %v1512_v45 = vmul.f32 %v1475_v31, %v2168_v49  ;;  %v1511_v7 = vmul.f32 %v1471_v15, %v2172_v51  ;;  %v1112_v59 = vadd.f32 %v1108_v52, %v894_v10 }
 0x115   :  { %v1316_v40 = vrot.slane %v1315_v33, 4  ;;  %v1303_v6 = vrot.slane %v1302_v34, 4 }
 0x116   :  { %v1520_v62 = vsel %vm178_vm9, %v1512_v45, 0.0  ;;  %v1519_v0 = vsel %vm178_vm9, %v1511_v7, 0.0  ;;  %933 = vbcast.lane.b32.xlu1 %v919_v23, 280  ;;  %914 = vbcast.lane.b32.xlu0 %v900_v56, 280  ;;  %vm1114_vm15 = vcmp.gt.f32.partialorder %v1112_v59, 30.0 }
 0x117   :  { %v1494_v43 = vpop.permute.xlu1 %1493  ;;  %v1317_v44 = vadd.f32 %v1316_v40, %v1315_v33  ;;  %v1490_v46 = vpop.permute.xlu0 %1489  ;;  %v1304_v21 = vadd.f32 %v1303_v6, %v1302_v34  ;;  %v1929_v8 = vsel %vm1114_vm15, 1.0, %v2044_v28  ;;  %v1117_v9 = vsel %vm1114_vm15, %v2232_v42, %v1112_v59 }
 0x118   :  { %v1516_v50 = vmul.f32 %v1494_v43, %v2166_v48  ;;  %v1515_v53 = vmul.f32 %v1490_v46, %v2170_v22  ;;  %v1123_v58 = vrot.slane %v1929_v8, %v2100_v26  ;;  %v1322_v56 = vmul.f32 0.04, %v1117_v9 }
 0x119   :  { %v1318_v63 = vrot.slane %v1317_v44, 2  ;;  %v1305_v36 = vrot.slane %v1304_v21, 2  ;;  %v1521_v14 = vadd.f32 %v1520_v62, %v1519_v0  ;;  %v1142_v24 = vrot.slane %v1929_v8, %v2098_v25  ;;  %v1732_v0 = vld [vmem:[#allocation9 + $0x30] sm:$0xff] }
 0x11a   :  { %v1533_v3 = vsel %vm178_vm9, %v1516_v50, 0.0  ;;  %v1532_v10 = vsel %vm178_vm9, %v1515_v53, 0.0  ;;  %v1323_v19 = vadd.f32 5.0, %v1322_v56  ;;  %1129 = vbcast.lane.b32.xlu1 %v1123_v58, 264  ;;  %1125 = vbcast.lane.b32.xlu0 %v1123_v58, 256  ;;  %v1730_v50 = vld [vmem:[#allocation9 + $0x20] sm:$0xff] }
 0x11b   :  { %v1498_v60 = vpop.permute.xlu1 %1497  ;;  %v1319_v61 = vadd.f32 %v1318_v63, %v1317_v44  ;;  %v1479_v1 = vpop.permute.xlu0 %1478  ;;  %v1306_v48 = vadd.f32 %v1305_v36, %v1304_v21  ;;  %v1534_v18 = vadd.f32 %v1533_v3, %v1532_v10  ;;  %v1731_v44 = vld [vmem:[#allocation9 + $0x28] sm:$0xff]  ;;  %v1728_v3 = vld [vmem:[#allocation9 + $0x10] sm:$0xff] }
 0x11c   :  { %v1517_v51 = vmul.f32 %v1498_v60, %v2176_v55  ;;  %v1513_v22 = vmul.f32 %v1479_v1, %v2179_v57  ;;  %v1332_v55 = vmul.f32 %v1117_v9, %v2201_v37  ;;  %v1119_v57 = vsel %vm1114_vm15, %v1118_v54, %v1113_v41 }
 0x11d   :  { %v1320_v4 = vrot.slane %v1319_v61, 1  ;;  %v1307_v47 = vrot.slane %v1306_v48, 1  ;;  %v1324_v31 = vmul.f32 %v1323_v19, %v1117_v9 }
 0x11e   :  { %v1535_v16 = vsel %vm178_vm9, %v1517_v51, 0.0  ;;  %v1522_v20 = vsel %vm178_vm9, %v1513_v22, 0.0  ;;  %v1333_v32 = vsub.f32 %v1332_v55, %v1119_v57  ;;  %1148 = vbcast.lane.b32.xlu1 %v1142_v24, 264  ;;  %1144 = vbcast.lane.b32.xlu0 %v1142_v24, 256 }
 0x11f   :  { %v1502_v12 = vpop.permute.xlu1 %1501  ;;  %v1483_v17 = vpop.permute.xlu0 %1482  ;;  %v1321_v23 = vadd.f32 %v1320_v4, %v1319_v61  ;;  %v1308_v30 = vadd.f32 %v1307_v47, %v1306_v48  ;;  %v1536_v33 = vadd.f32 %v1535_v16, %v1534_v18  ;;  %v1523_v34 = vadd.f32 %v1522_v20, %v1521_v14 }
 0x120   :  { %v1518_v27 = vmul.f32 %v1502_v12, %v2188_v2  ;;  %v1514_v29 = vmul.f32 %v1483_v17, %v2192_v5  ;;  %v1325_v41 = vadd.f32 %v1324_v31, %v2203_v38  ;;  %v1726_v2 = vld [vmem:[#allocation9] sm:$0xff]  ;;  %v1334_v7 = vmul.f32 %v1333_v32, %v2221_v11 }
 0x121   :  { %v1329_v5 = vsel %vm212_vm10, %v1321_v23, %v1308_v30 }
 0x122   :  { %v1537_v35 = vsel %vm178_vm9, %v1518_v27, 0.0  ;;  %v1524_v39 = vsel %vm178_vm9, %v1514_v29, 0.0  ;;  %v1326_v45 = vsub.f32 %v1325_v41, %v1119_v57  ;;  %1152 = vbcast.lane.b32.xlu1 %v1142_v24, 272  ;;  %1133 = vbcast.lane.b32.xlu0 %v1123_v58, 272  ;;  %v1336_v51 = vadd.f32 %v1334_v7, %v1119_v57  ;;  %v1729_v29 = vld [vmem:[#allocation9 + $0x18] sm:$0xff] }
 0x123   :  { %v1698_v15 = vpop.permute.xlu1 %1697  ;;  %v1694_v40 = vpop.permute.xlu0 %1693  ;;  %v1538_v6 = vadd.f32 %v1537_v35, %v1536_v33  ;;  %v1525_v43 = vadd.f32 %v1524_v39, %v1523_v34 }
 0x124   :  { %v1735_v63 = vmul.f32 %v1698_v15, %v2168_v49  ;;  %v1734_v36 = vmul.f32 %v1726_v2, %v1694_v40  ;;  %v1331_v62 = vadd.f32 %v1329_v5, %v1326_v45  ;;  %v1341_v17 = vadd.f32 %v1336_v51, %v2234_v13 }
 0x125   :  { %v1539_v46 = vrot.slane %v1538_v6, 4  ;;  %v1526_v52 = vrot.slane %v1525_v43, 4 }
 0x126   :  { %v1743_v4 = vsel %vm178_vm9, %v1735_v63, 0.0  ;;  %v1335_v10 = vadd.f32 %v1331_v62, %v1117_v9  ;;  %v1742_v47 = vsel %vm178_vm9, %v1734_v36, 0.0  ;;  %1156 = vbcast.lane.b32.xlu1 %v1142_v24, 280  ;;  %1137 = vbcast.lane.b32.xlu0 %v1123_v58, 280  ;;  %v1733_v24 = vld [vmem:[#allocation9 + $0x38] sm:$0xff] }
 0x127   :  { %v1717_v21 = vpop.permute.xlu1 %1716  ;;  %v1713_v53 = vpop.permute.xlu0 %1712  ;;  %v1540_v54 = vadd.f32 %v1539_v46, %v1538_v6  ;;  %v1527_v60 = vadd.f32 %v1526_v52, %v1525_v43  ;;  %v1744_v31 = vadd.f32 %v1743_v4, %v1742_v47 }
 0x128   :  { %v1739_v59 = vmul.f32 %v1731_v44, %v1717_v21  ;;  %v1738_v61 = vmul.f32 %v1730_v50, %v1713_v53  ;;  %vm1337_vm1 = vcmp.gt.f32.partialorder %v1335_v10, 30.0 }
 0x129   :  { %v1541_v1 = vrot.slane %v1540_v54, 2  ;;  %v1528_v22 = vrot.slane %v1527_v60, 2  ;;  %v1932_v9 = vsel %vm1337_vm1, 1.0, %v2044_v28  ;;  %v1340_v57 = vsel %vm1337_vm1, %v2232_v42, %v1335_v10 }
 0x12a   :  { %v1756_v56 = vsel %vm178_vm9, %v1739_v59, 0.0  ;;  %v1755_v14 = vsel %vm178_vm9, %v1738_v61, 0.0  ;;  %v1346_v58 = vrot.slane %v1932_v9, %v2100_v26  ;;  %v1545_v20 = vmul.f32 0.04, %v1340_v57 }
 0x12b   :  { %v1721_v48 = vpop.permute.xlu1 %1720  ;;  %v1702_v8 = vpop.permute.xlu0 %1701  ;;  %v1542_v49 = vadd.f32 %v1541_v1, %v1540_v54  ;;  %v1529_v12 = vadd.f32 %v1528_v22, %v1527_v60  ;;  %v1555_v23 = vmul.f32 %v1340_v57, %v2201_v37  ;;  %v1757_v32 = vadd.f32 %v1756_v56, %v1755_v14 }
 0x12c   :  { %v1740_v55 = vmul.f32 %v1732_v0, %v1721_v48  ;;  %v1736_v16 = vmul.f32 %v1728_v3, %v1702_v8  ;;  %v1342_v34 = vsel %vm1337_vm1, %v1341_v17, %v1336_v51  ;;  %v1546_v35 = vadd.f32 5.0, %v1545_v20  ;;  %1352 = vbcast.lane.b32.xlu1 %v1346_v58, 264  ;;  %1348 = vbcast.lane.b32.xlu0 %v1346_v58, 256 }
 0x12d   :  { %v1543_v18 = vrot.slane %v1542_v49, 1  ;;  %v1530_v19 = vrot.slane %v1529_v12, 1  ;;  %v1556_v41 = vsub.f32 %v1555_v23, %v1342_v34  ;;  %v1365_v5 = vrot.slane %v1932_v9, %v2098_v25 }
 0x12e   :  { %v1758_v33 = vsel %vm178_vm9, %v1740_v55, 0.0  ;;  %v1745_v39 = vsel %vm178_vm9, %v1736_v16, 0.0  ;;  %v1547_v2 = vmul.f32 %v1546_v35, %v1340_v57 }
 0x12f   :  { %v1725_v27 = vpop.permute.xlu1 %1724  ;;  %v1706_v30 = vpop.permute.xlu0 %1705  ;;  %v1544_v15 = vadd.f32 %v1543_v18, %v1542_v49  ;;  %v1531_v40 = vadd.f32 %v1530_v19, %v1529_v12  ;;  %v1759_v44 = vadd.f32 %v1758_v33, %v1757_v32  ;;  %v1746_v45 = vadd.f32 %v1745_v39, %v1744_v31  ;;  %v2417_v39 = vld [vmem:[#allocation9 + $0x60] sm:$0xff] }
 0x130   :  { %v1741_v6 = vmul.f32 %v1733_v24, %v1725_v27  ;;  %v1737_v43 = vmul.f32 %v1729_v29, %v1706_v30  ;;  %v1548_v21 = vadd.f32 %v1547_v2, %v2203_v38  ;;  %1371 = vbcast.lane.b32.xlu1 %v1365_v5, 264  ;;  %1367 = vbcast.lane.b32.xlu0 %v1365_v5, 256 }
 0x131   :  { %v1552_v52 = vsel %vm212_vm10, %v1544_v15, %v1531_v40  ;;  %v1557_v63 = vmul.f32 %v1556_v41, %v2221_v11  ;;  %v2408_v15 = vld [vmem:[#allocation9 + $0x48] sm:$0xff] }
 0x132   :  { %v1760_v7 = vsel %vm178_vm9, %v1741_v6, 0.0  ;;  %v1747_v46 = vsel %vm178_vm9, %v1737_v43, 0.0  ;;  %v1549_v54 = vsub.f32 %v1548_v21, %v1342_v34 }
 0x133   :  { %v1761_v50 = vadd.f32 %v1760_v7, %v1759_v44  ;;  %v1748_v53 = vadd.f32 %v1747_v46, %v1746_v45  ;;  %v1559_v62 = vadd.f32 %v1557_v63, %v1342_v34  ;;  %v2410_v34 = vld [vmem:[#allocation9 + $0x40] sm:$0xff]  ;;  %v2424_v44 = vld [vmem:[#allocation9 + $0x70] sm:$0xff] }
 0x134   :  { %1375 = vbcast.lane.b32.xlu1 %v1365_v5, 272  ;;  %1356 = vbcast.lane.b32.xlu0 %v1346_v58, 272  ;;  %v1554_v61 = vadd.f32 %v1552_v52, %v1549_v54  ;;  %v2436_v54 = vld [vmem:[#allocation9 + $0x78] sm:$0xff] }
 0x135   :  { %v1762_v36 = vrot.slane %v1761_v50, 4  ;;  %v1749_v59 = vrot.slane %v1748_v53, 4  ;;  %v1564_v22 = vadd.f32 %v1559_v62, %v2234_v13 }
 0x136   :  { %v1558_v1 = vadd.f32 %v1554_v61, %v1340_v57 }
 0x137   :  { %v1763_v60 = vadd.f32 %v1762_v36, %v1761_v50  ;;  %v1750_v0 = vadd.f32 %v1749_v59, %v1748_v53  ;;  %v2430_v50 = vld [vmem:[#allocation2 + $0x4] sm:$0x3]  ;;  %v2438_v36 = vld [vmem:[#allocation9 + $0x58] sm:$0xff] }
 0x138   :  { %1379 = vbcast.lane.b32.xlu1 %v1365_v5, 280  ;;  %1360 = vbcast.lane.b32.xlu0 %v1346_v58, 280  ;;  %vm1560_vm2 = vcmp.gt.f32.partialorder %v1558_v1, 30.0  ;;  %v2426_v5 = vld [vmem:[#allocation9 + $0x50] sm:$0xff]  ;;  %v308_v61 = vmul.f32 0.04, %v2430_v50 }
 0x139   :  { %v1764_v51 = vrot.slane %v1763_v60, 2  ;;  %v1751_v48 = vrot.slane %v1750_v0, 2  ;;  %v1935_v10 = vsel %vm1560_vm2, 1.0, %v2044_v28  ;;  %v1563_v8 = vsel %vm1560_vm2, %v2232_v42, %v1558_v1 }
 0x13a   :  { %v1569_v47 = vrot.slane %v1935_v10, %v2100_v26  ;;  %v1768_v56 = vmul.f32 0.04, %v1563_v8  ;;  %v1778_v55 = vmul.f32 %v1563_v8, %v2201_v37  ;;  %v1565_v14 = vsel %vm1560_vm2, %v1564_v22, %v1559_v62 }
 0x13b   :  { %v1765_v3 = vadd.f32 %v1764_v51, %v1763_v60  ;;  %v1752_v4 = vadd.f32 %v1751_v48, %v1750_v0  ;;  %v1588_v19 = vrot.slane %v1935_v10, %v2098_v25 }
 0x13c   :  { %v1769_v16 = vadd.f32 5.0, %v1768_v56  ;;  %v1779_v17 = vsub.f32 %v1778_v55, %v1565_v14  ;;  %1575 = vbcast.lane.b32.xlu1 %v1569_v47, 264  ;;  %1571 = vbcast.lane.b32.xlu0 %v1569_v47, 256  ;;  %v92_v56 = vld [vmem:[#allocation7 + $0x1c] sm:$0x3] }
 0x13d   :  { %v1766_v49 = vrot.slane %v1765_v3, 1  ;;  %v1753_v12 = vrot.slane %v1752_v4, 1 }
 0x13e   :  { %v1770_v57 = vmul.f32 %v1769_v16, %v1563_v8  ;;  %v1780_v58 = vmul.f32 %v1779_v17, %v2221_v11 }
 0x13f   :  { %v1767_v18 = vadd.f32 %v1766_v49, %v1765_v3  ;;  %v1754_v9 = vadd.f32 %v1753_v12, %v1752_v4  ;;  %v2447_v12 = vld [vmem:[#allocation7 + $0xa] sm:$0x3] }
 0x140   :  { %v1771_v20 = vadd.f32 %v1770_v57, %v2203_v38  ;;  %1594 = vbcast.lane.b32.xlu1 %v1588_v19, 264  ;;  %1590 = vbcast.lane.b32.xlu0 %v1588_v19, 256  ;;  %v1782_v24 = vadd.f32 %v1780_v58, %v1565_v14  ;;  %v318_v58 = vmul.f32 %v2430_v50, %v2447_v12 }
 0x141   :  { %v1775_v23 = vsel %vm212_vm10, %v1767_v18, %v1754_v9  ;;  %v2449_v9 = vadd.f32 140.0, %v92_v56 }
 0x142   :  { %v1772_v37 = vsub.f32 %v1771_v20, %v1565_v14  ;;  %v1787_v30 = vadd.f32 %v1782_v24, %v2234_v13  ;;  %v2415_v13 = vld [vmem:[#allocation9 + $0x68] sm:$0xff] }
 0x144   :  { %1598 = vbcast.lane.b32.xlu1 %v1588_v19, 272  ;;  %1579 = vbcast.lane.b32.xlu0 %v1569_v47, 272  ;;  %v1777_v27 = vadd.f32 %v1775_v23, %v1772_v37  ;;  %v105_v23 = vld [vmem:[#allocation3 + $0x4] sm:$0x3] }
 0x146   :  { %v1781_v29 = vadd.f32 %v1777_v27, %v1563_v8  ;;  %v309_v8 = vadd.f32 5.0, %v308_v61 }
 0x148   :  { %1602 = vbcast.lane.b32.xlu1 %v1588_v19, 280  ;;  %1583 = vbcast.lane.b32.xlu0 %v1569_v47, 280  ;;  %vm1783_vm3 = vcmp.gt.f32.partialorder %v1781_v29, 30.0  ;;  %v310_v57 = vmul.f32 %v309_v8, %v2430_v50 }
 0x149   :  { %v1938_v11 = vsel %vm1783_vm3, 1.0, %v2044_v28  ;;  %v1786_v38 = vsel %vm1783_vm3, %v2232_v42, %v1781_v29  ;;  %v1788_v33 = vsel %vm1783_vm3, %v1787_v30, %v1782_v24 }
 0x14a   :  { %v1792_v35 = vrot.slane %v1938_v11, %v2100_v26  ;;  %1894 = vst.msk [vmem:[#allocation2 + $0x2] sm:$0x3] %vm60_vm0, %v1786_v38  ;;  %1895 = vst.msk [vmem:[#allocation3 + $0x2] sm:$0x3] %vm60_vm0, %v1788_v33  ;;  %v1811_v2 = vrot.slane %v1938_v11, %v2098_v25  ;;  %v311_v38 = vadd.f32 %v310_v57, %v2449_v9 }
 0x14c   :  { %v237_v31 = vpop.permute.xlu1 %236  ;;  %v233_v32 = vpop.permute.xlu0 %232  ;;  %1798 = vbcast.lane.b32.xlu1 %v1792_v35, 264  ;;  %1794 = vbcast.lane.b32.xlu0 %v1792_v35, 256 }
 0x14d   :  { %v275_v40 = vmul.f32 %v2408_v15, %v237_v31  ;;  %v274_v42 = vmul.f32 %v2410_v34, %v233_v32 }
 0x14f   :  { %v283_v45 = vsel %vm178_vm9, %v275_v40, 0.0  ;;  %v282_v7 = vsel %vm178_vm9, %v274_v42, 0.0 }
 0x150   :  { %v256_v41 = vpop.permute.xlu1 %255  ;;  %v252_v6 = vpop.permute.xlu0 %251  ;;  %1817 = vbcast.lane.b32.xlu1 %v1811_v2, 264  ;;  %1813 = vbcast.lane.b32.xlu0 %v1811_v2, 256  ;;  %v284_v62 = vadd.f32 %v283_v45, %v282_v7 }
 0x151   :  { %v279_v43 = vmul.f32 %v2415_v13, %v256_v41  ;;  %v278_v26 = vmul.f32 %v2417_v39, %v252_v6 }
 0x153   :  { %v296_v52 = vsel %vm178_vm9, %v279_v43, 0.0  ;;  %v295_v63 = vsel %vm178_vm9, %v278_v26, 0.0 }
 0x154   :  { %v260_v46 = vpop.permute.xlu1 %259  ;;  %v241_v21 = vpop.permute.xlu0 %240  ;;  %v297_v0 = vadd.f32 %v296_v52, %v295_v63  ;;  %1821 = vbcast.lane.b32.xlu1 %v1811_v2, 272  ;;  %1802 = vbcast.lane.b32.xlu0 %v1792_v35, 272  ;;  %v312_v52 = vsub.f32 %v311_v38, %v105_v23  ;;  %v2465_v63 = vld [vmem:[#allocation7 + $0x4] sm:$0x3] }
 0x155   :  { %v280_v25 = vmul.f32 %v2424_v44, %v260_v46  ;;  %v276_v53 = vmul.f32 %v2426_v5, %v241_v21 }
 0x157   :  { %v298_v59 = vsel %vm178_vm9, %v280_v25, 0.0  ;;  %v285_v60 = vsel %vm178_vm9, %v276_v53, 0.0 }
 0x158   :  { %v264_v51 = vpop.permute.xlu1 %263  ;;  %v245_v1 = vpop.permute.xlu0 %244  ;;  %v299_v22 = vadd.f32 %v298_v59, %v297_v0  ;;  %v286_v4 = vadd.f32 %v285_v60, %v284_v62  ;;  %1825 = vbcast.lane.b32.xlu1 %v1811_v2, 280  ;;  %1806 = vbcast.lane.b32.xlu0 %v1792_v35, 280  ;;  %v319_v35 = vsub.f32 %v318_v58, %v105_v23  ;;  %v2478_v58 = vld [vmem:[#allocation7 + $0x16] sm:$0x3] }
 0x159   :  { %v281_v48 = vmul.f32 %v2436_v54, %v264_v51  ;;  %v277_v3 = vmul.f32 %v2438_v36, %v245_v1 }
 0x15b   :  { %v300_v10 = vsel %vm178_vm9, %v281_v48, 0.0  ;;  %v287_v49 = vsel %vm178_vm9, %v277_v3, 0.0  ;;  %v320_v3 = vmul.f32 %v319_v35, %v2465_v63 }
 0x15c   :  { %v301_v47 = vadd.f32 %v300_v10, %v299_v22  ;;  %v288_v55 = vadd.f32 %v287_v49, %v286_v4  ;;  %v461_v14 = vpop.permute.xlu1 %460  ;;  %v457_v16 = vpop.permute.xlu0 %456 }
 0x15d   :  { %v498_v37 = vmul.f32 %v461_v14, %v2408_v15  ;;  %v497_v24 = vmul.f32 %v457_v16, %v2410_v34  ;;  %v2476_v14 = vld [vmem:[#allocation7 + $0x10] sm:$0x3] }
 0x15e   :  { %v302_v17 = vrot.slane %v301_v47, 4  ;;  %v289_v18 = vrot.slane %v288_v55, 4 }
 0x15f   :  { %v506_v42 = vsel %vm178_vm9, %v498_v37, 0.0  ;;  %v505_v41 = vsel %vm178_vm9, %v497_v24, 0.0 }
 0x160   :  { %v303_v19 = vadd.f32 %v302_v17, %v301_v47  ;;  %v290_v20 = vadd.f32 %v289_v18, %v288_v55  ;;  %v480_v27 = vpop.permute.xlu1 %479  ;;  %v476_v29 = vpop.permute.xlu0 %475  ;;  %v507_v61 = vadd.f32 %v506_v42, %v505_v41  ;;  %v322_v17 = vadd.f32 %v320_v3, %v105_v23 }
 0x161   :  { %v502_v32 = vmul.f32 %v480_v27, %v2415_v13  ;;  %v501_v11 = vmul.f32 %v476_v29, %v2417_v39 }
 0x162   :  { %v304_v30 = vrot.slane %v303_v19, 2  ;;  %v291_v31 = vrot.slane %v290_v20, 2  ;;  %v327_v23 = vadd.f32 %v322_v17, %v2478_v58 }
 0x163   :  { %v519_v6 = vsel %vm178_vm9, %v502_v32, 0.0  ;;  %v518_v43 = vsel %vm178_vm9, %v501_v11, 0.0 }
 0x164   :  { %v305_v33 = vadd.f32 %v304_v30, %v303_v19  ;;  %v292_v40 = vadd.f32 %v291_v31, %v290_v20  ;;  %v484_v26 = vpop.permute.xlu1 %483  ;;  %v465_v2 = vpop.permute.xlu0 %464  ;;  %v520_v62 = vadd.f32 %v519_v6, %v518_v43 }
 0x165   :  { %v503_v46 = vmul.f32 %v484_v26, %v2424_v44  ;;  %v499_v21 = vmul.f32 %v465_v2, %v2426_v5 }
 0x166   :  { %v306_v45 = vrot.slane %v305_v33, 1  ;;  %v293_v7 = vrot.slane %v292_v40, 1 }
 0x167   :  { %v521_v59 = vsel %vm178_vm9, %v503_v46, 0.0  ;;  %v508_v60 = vsel %vm178_vm9, %v499_v21, 0.0 }
 0x168   :  { %v307_v25 = vadd.f32 %v306_v45, %v305_v33  ;;  %v294_v53 = vadd.f32 %v293_v7, %v292_v40  ;;  %v488_v0 = vpop.permute.xlu1 %487  ;;  %v469_v51 = vpop.permute.xlu0 %468  ;;  %v522_v10 = vadd.f32 %v521_v59, %v520_v62  ;;  %v509_v8 = vadd.f32 %v508_v60, %v507_v61 }
 0x169   :  { %v504_v48 = vmul.f32 %v488_v0, %v2436_v54  ;;  %v500_v22 = vmul.f32 %v469_v51, %v2438_v36 }
 0x16a   :  { %v315_v1 = vsel %vm212_vm10, %v307_v25, %v294_v53 }
 0x16b   :  { %v317_v4 = vadd.f32 %v315_v1, %v312_v52  ;;  %v523_v49 = vsel %vm178_vm9, %v504_v48, 0.0  ;;  %v510_v47 = vsel %vm178_vm9, %v500_v22, 0.0 }
 0x16c   :  { %v524_v55 = vadd.f32 %v523_v49, %v522_v10  ;;  %v511_v16 = vadd.f32 %v510_v47, %v509_v8  ;;  %v684_v18 = vpop.permute.xlu1 %683  ;;  %v680_v57 = vpop.permute.xlu0 %679 }
 0x16d   :  { %v321_v56 = vadd.f32 %v317_v4, %v2430_v50  ;;  %v721_v33 = vmul.f32 %v684_v18, %v2408_v15  ;;  %v720_v35 = vmul.f32 %v680_v57, %v2410_v34 }
 0x16e   :  { %v525_v19 = vrot.slane %v524_v55, 4  ;;  %v512_v20 = vrot.slane %v511_v16, 4 }
 0x16f   :  { %vm323_vm4 = vcmp.gt.f32.partialorder %v321_v56, 30.0  ;;  %v729_v59 = vsel %vm178_vm9, %v721_v33, 0.0  ;;  %v728_v60 = vsel %vm178_vm9, %v720_v35, 0.0 }
 0x170   :  { %v1918_v37 = vsel %vm323_vm4, 1.0, %v2044_v28  ;;  %v326_v24 = vsel %vm323_vm4, %v2476_v14, %v321_v56  ;;  %v526_v50 = vadd.f32 %v525_v19, %v524_v55  ;;  %v513_v29 = vadd.f32 %v512_v20, %v511_v16  ;;  %v703_v30 = vpop.permute.xlu1 %702  ;;  %v699_v31 = vpop.permute.xlu0 %698 }
 0x171   :  { %330 = vst.msk [vmem:[#allocation10] sm:$0x3] %vm60_vm0, %v1918_v37  ;;  %v531_v27 = vmul.f32 0.04, %v326_v24  ;;  %v725_v40 = vmul.f32 %v703_v30, %v2415_v13  ;;  %v724_v42 = vmul.f32 %v699_v31, %v2417_v39  ;;  %v541_v43 = vmul.f32 %v326_v24, %v2447_v12 }
 0x172   :  { %v527_v32 = vrot.slane %v526_v50, 2  ;;  %v514_v38 = vrot.slane %v513_v29, 2  ;;  %v328_v2 = vsel %vm323_vm4, %v327_v23, %v322_v17  ;;  %v730_v47 = vadd.f32 %v729_v59, %v728_v60 }
 0x173   :  { %v532_v11 = vadd.f32 5.0, %v531_v27  ;;  %v742_v45 = vsel %vm178_vm9, %v725_v40, 0.0  ;;  %v741_v53 = vsel %vm178_vm9, %v724_v42, 0.0  ;;  %v542_v1 = vsub.f32 %v541_v43, %v328_v2 }
 0x174   :  { %v528_v41 = vadd.f32 %v527_v32, %v526_v50  ;;  %v515_v26 = vadd.f32 %v514_v38, %v513_v29  ;;  %v707_v7 = vpop.permute.xlu1 %706  ;;  %v688_v46 = vpop.permute.xlu0 %687  ;;  %v743_v3 = vadd.f32 %v742_v45, %v741_v53 }
 0x175   :  { %v533_v6 = vmul.f32 %v532_v11, %v326_v24  ;;  %v726_v61 = vmul.f32 %v707_v7, %v2424_v44  ;;  %v722_v62 = vmul.f32 %v688_v46, %v2426_v5  ;;  %v543_v18 = vmul.f32 %v542_v1, %v2465_v63 }
 0x176   :  { %v529_v21 = vrot.slane %v528_v41, 1  ;;  %v516_v25 = vrot.slane %v515_v26, 1 }
 0x177   :  { %v534_v52 = vadd.f32 %v533_v6, %v2449_v9  ;;  %v744_v22 = vsel %vm178_vm9, %v726_v61, 0.0  ;;  %v731_v4 = vsel %vm178_vm9, %v722_v62, 0.0  ;;  %v545_v31 = vadd.f32 %v543_v18, %v328_v2 }
 0x178   :  { %v530_v0 = vadd.f32 %v529_v21, %v528_v41  ;;  %v517_v48 = vadd.f32 %v516_v25, %v515_v26  ;;  %v711_v10 = vpop.permute.xlu1 %710  ;;  %v692_v8 = vpop.permute.xlu0 %691  ;;  %v745_v16 = vadd.f32 %v744_v22, %v743_v3  ;;  %v732_v57 = vadd.f32 %v731_v4, %v730_v47 }
 0x179   :  { %v535_v51 = vsub.f32 %v534_v52, %v328_v2  ;;  %v727_v56 = vmul.f32 %v711_v10, %v2436_v54  ;;  %v723_v17 = vmul.f32 %v692_v8, %v2438_v36  ;;  %v550_v2 = vadd.f32 %v545_v31, %v2478_v58 }
 0x17a   :  { %v538_v49 = vsel %vm212_vm10, %v530_v0, %v517_v48 }
 0x17b   :  { %v540_v55 = vadd.f32 %v538_v49, %v535_v51  ;;  %v746_v19 = vsel %vm178_vm9, %v727_v56, 0.0  ;;  %v733_v50 = vsel %vm178_vm9, %v723_v17, 0.0 }
 0x17c   :  { %v747_v37 = vadd.f32 %v746_v19, %v745_v16  ;;  %v734_v27 = vadd.f32 %v733_v50, %v732_v57  ;;  %v907_v23 = vpop.permute.xlu1 %906  ;;  %v903_v30 = vpop.permute.xlu0 %902 }
 0x17d   :  { %v544_v20 = vadd.f32 %v540_v55, %v326_v24  ;;  %v944_v40 = vmul.f32 %v907_v23, %v2408_v15  ;;  %v943_v6 = vmul.f32 %v903_v30, %v2410_v34 }
 0x17e   :  { %v748_v29 = vrot.slane %v747_v37, 4  ;;  %v735_v38 = vrot.slane %v734_v27, 4 }
 0x17f   :  { %vm546_vm5 = vcmp.gt.f32.partialorder %v544_v20, 30.0  ;;  %v952_v60 = vsel %vm178_vm9, %v944_v40, 0.0  ;;  %v951_v0 = vsel %vm178_vm9, %v943_v6, 0.0 }
 0x180   :  { %v1921_v32 = vsel %vm546_vm5, 1.0, %v2044_v28  ;;  %v549_v11 = vsel %vm546_vm5, %v2476_v14, %v544_v20  ;;  %v749_v33 = vadd.f32 %v748_v29, %v747_v37  ;;  %v736_v35 = vadd.f32 %v735_v38, %v734_v27  ;;  %v926_v43 = vpop.permute.xlu1 %925  ;;  %v922_v26 = vpop.permute.xlu0 %921 }
 0x181   :  { %553 = vst.msk [vmem:[#allocation10 + $0x2] sm:$0x3] %vm60_vm0, %v1921_v32  ;;  %v754_v24 = vmul.f32 0.04, %v549_v11  ;;  %v948_v7 = vmul.f32 %v926_v43, %v2415_v13  ;;  %v947_v46 = vmul.f32 %v922_v26, %v2417_v39  ;;  %v764_v25 = vmul.f32 %v549_v11, %v2447_v12 }
 0x182   :  { %v750_v42 = vrot.slane %v749_v33, 2  ;;  %v737_v45 = vrot.slane %v736_v35, 2  ;;  %v551_v53 = vsel %vm546_vm5, %v550_v2, %v545_v31  ;;  %v953_v17 = vadd.f32 %v952_v60, %v951_v0 }
 0x183   :  { %v755_v41 = vadd.f32 5.0, %v754_v24  ;;  %v965_v51 = vsel %vm178_vm9, %v948_v7, 0.0  ;;  %v964_v22 = vsel %vm178_vm9, %v947_v46, 0.0  ;;  %v765_v47 = vsub.f32 %v764_v25, %v551_v53 }
 0x184   :  { %v751_v21 = vadd.f32 %v750_v42, %v749_v33  ;;  %v738_v59 = vadd.f32 %v737_v45, %v736_v35  ;;  %v930_v1 = vpop.permute.xlu1 %929  ;;  %v911_v48 = vpop.permute.xlu0 %910  ;;  %v966_v18 = vadd.f32 %v965_v51, %v964_v22 }
 0x185   :  { %v756_v52 = vmul.f32 %v755_v41, %v549_v11  ;;  %v949_v4 = vmul.f32 %v930_v1, %v2424_v44  ;;  %v945_v10 = vmul.f32 %v911_v48, %v2426_v5  ;;  %v766_v27 = vmul.f32 %v765_v47, %v2465_v63 }
 0x186   :  { %v752_v61 = vrot.slane %v751_v21, 1  ;;  %v739_v3 = vrot.slane %v738_v59, 1 }
 0x187   :  { %v757_v62 = vadd.f32 %v756_v52, %v2449_v9  ;;  %v967_v55 = vsel %vm178_vm9, %v949_v4, 0.0  ;;  %v954_v16 = vsel %vm178_vm9, %v945_v10, 0.0  ;;  %v768_v42 = vadd.f32 %v766_v27, %v551_v53 }
 0x188   :  { %v753_v8 = vadd.f32 %v752_v61, %v751_v21  ;;  %v740_v56 = vadd.f32 %v739_v3, %v738_v59  ;;  %v934_v57 = vpop.permute.xlu1 %933  ;;  %v915_v19 = vpop.permute.xlu0 %914  ;;  %v968_v23 = vadd.f32 %v967_v55, %v966_v18  ;;  %v955_v30 = vadd.f32 %v954_v16, %v953_v17 }
 0x189   :  { %v758_v49 = vsub.f32 %v757_v62, %v551_v53  ;;  %v950_v37 = vmul.f32 %v934_v57, %v2436_v54  ;;  %v946_v50 = vmul.f32 %v915_v19, %v2438_v36  ;;  %v773_v52 = vadd.f32 %v768_v42, %v2478_v58 }
 0x18a   :  { %v761_v20 = vsel %vm212_vm10, %v753_v8, %v740_v56 }
 0x18b   :  { %v763_v29 = vadd.f32 %v761_v20, %v758_v49  ;;  %v969_v31 = vsel %vm178_vm9, %v950_v37, 0.0  ;;  %v956_v32 = vsel %vm178_vm9, %v946_v50, 0.0 }
 0x18c   :  { %v970_v33 = vadd.f32 %v969_v31, %v968_v23  ;;  %v957_v24 = vadd.f32 %v956_v32, %v955_v30  ;;  %v1130_v35 = vpop.permute.xlu1 %1129  ;;  %v1126_v40 = vpop.permute.xlu0 %1125 }
 0x18d   :  { %v767_v38 = vadd.f32 %v763_v29, %v549_v11  ;;  %v1167_v60 = vmul.f32 %v1130_v35, %v2408_v15  ;;  %v1166_v61 = vmul.f32 %v1126_v40, %v2410_v34 }
 0x18e   :  { %v971_v41 = vrot.slane %v970_v33, 4  ;;  %v958_v6 = vrot.slane %v957_v24, 4 }
 0x18f   :  { %vm769_vm6 = vcmp.gt.f32.partialorder %v767_v38, 30.0  ;;  %v1175_v16 = vsel %vm178_vm9, %v1167_v60, 0.0  ;;  %v1174_v17 = vsel %vm178_vm9, %v1166_v61, 0.0 }
 0x190   :  { %v1924_v43 = vsel %vm769_vm6, 1.0, %v2044_v28  ;;  %v772_v26 = vsel %vm769_vm6, %v2476_v14, %v767_v38  ;;  %v972_v2 = vadd.f32 %v971_v41, %v970_v33  ;;  %v959_v7 = vadd.f32 %v958_v6, %v957_v24  ;;  %v1149_v46 = vpop.permute.xlu1 %1148  ;;  %v1145_v21 = vpop.permute.xlu0 %1144 }
 0x191   :  { %776 = vst.msk [vmem:[#allocation10 + $0x4] sm:$0x3] %vm60_vm0, %v1924_v43  ;;  %v977_v45 = vmul.f32 0.04, %v772_v26  ;;  %v987_v11 = vmul.f32 %v772_v26, %v2447_v12  ;;  %v1171_v62 = vmul.f32 %v1149_v46, %v2415_v13  ;;  %v1170_v0 = vmul.f32 %v1145_v21, %v2417_v39 }
 0x192   :  { %v973_v25 = vrot.slane %v972_v2, 2  ;;  %v960_v59 = vrot.slane %v959_v7, 2  ;;  %v774_v1 = vsel %vm769_vm6, %v773_v52, %v768_v42  ;;  %v1176_v38 = vadd.f32 %v1175_v16, %v1174_v17 }
 0x193   :  { %v978_v53 = vadd.f32 5.0, %v977_v45  ;;  %v988_v22 = vsub.f32 %v987_v11, %v774_v1  ;;  %v1188_v4 = vsel %vm178_vm9, %v1171_v62, 0.0  ;;  %v1187_v55 = vsel %vm178_vm9, %v1170_v0, 0.0 }
 0x194   :  { %v974_v51 = vadd.f32 %v973_v25, %v972_v2  ;;  %v961_v3 = vadd.f32 %v960_v59, %v959_v7  ;;  %v1153_v10 = vpop.permute.xlu1 %1152  ;;  %v1134_v8 = vpop.permute.xlu0 %1133  ;;  %v1189_v50 = vadd.f32 %v1188_v4, %v1187_v55 }
 0x195   :  { %v979_v48 = vmul.f32 %v978_v53, %v772_v26  ;;  %v1172_v18 = vmul.f32 %v1153_v10, %v2424_v44  ;;  %v1168_v57 = vmul.f32 %v1134_v8, %v2426_v5  ;;  %v989_v31 = vmul.f32 %v988_v22, %v2465_v63 }
 0x196   :  { %v975_v49 = vrot.slane %v974_v51, 1  ;;  %v962_v56 = vrot.slane %v961_v3, 1 }
 0x197   :  { %v980_v47 = vadd.f32 %v979_v48, %v2449_v9  ;;  %v1190_v27 = vsel %vm178_vm9, %v1172_v18, 0.0  ;;  %v1177_v29 = vsel %vm178_vm9, %v1168_v57, 0.0  ;;  %v991_v45 = vadd.f32 %v989_v31, %v774_v1 }
 0x198   :  { %v976_v19 = vadd.f32 %v975_v49, %v974_v51  ;;  %v963_v37 = vadd.f32 %v962_v56, %v961_v3  ;;  %v1157_v23 = vpop.permute.xlu1 %1156  ;;  %v1138_v30 = vpop.permute.xlu0 %1137  ;;  %v1191_v35 = vadd.f32 %v1190_v27, %v1189_v50  ;;  %v1178_v42 = vadd.f32 %v1177_v29, %v1176_v38 }
 0x199   :  { %v981_v20 = vsub.f32 %v980_v47, %v774_v1  ;;  %v1173_v33 = vmul.f32 %v1157_v23, %v2436_v54  ;;  %v1169_v40 = vmul.f32 %v1138_v30, %v2438_v36  ;;  %v996_v61 = vadd.f32 %v991_v45, %v2478_v58 }
 0x19a   :  { %v984_v32 = vsel %vm212_vm10, %v976_v19, %v963_v37 }
 0x19b   :  { %v986_v24 = vadd.f32 %v984_v32, %v981_v20  ;;  %v1192_v41 = vsel %vm178_vm9, %v1173_v33, 0.0  ;;  %v1179_v2 = vsel %vm178_vm9, %v1169_v40, 0.0 }
 0x19c   :  { %v1193_v43 = vadd.f32 %v1192_v41, %v1191_v35  ;;  %v1180_v7 = vadd.f32 %v1179_v2, %v1178_v42 }
 0x19d   :  { %v990_v6 = vadd.f32 %v986_v24, %v772_v26 }
 0x19e   :  { %v1353_v11 = vpop.permute.xlu1 %1352  ;;  %v1349_v46 = vpop.permute.xlu0 %1348  ;;  %v1194_v21 = vrot.slane %v1193_v43, 4  ;;  %v1181_v53 = vrot.slane %v1180_v7, 4 }
 0x19f   :  { %vm992_vm7 = vcmp.gt.f32.partialorder %v990_v6, 30.0  ;;  %v1390_v0 = vmul.f32 %v1353_v11, %v2408_v15  ;;  %v1389_v51 = vmul.f32 %v1349_v46, %v2410_v34 }
 0x1a0   :  { %v1927_v52 = vsel %vm992_vm7, 1.0, %v2044_v28  ;;  %v995_v25 = vsel %vm992_vm7, %v2476_v14, %v990_v6  ;;  %v1195_v59 = vadd.f32 %v1194_v21, %v1193_v43  ;;  %v1182_v62 = vadd.f32 %v1181_v53, %v1180_v7 }
 0x1a1   :  { %999 = vst.msk [vmem:[#allocation10 + $0x6] sm:$0x3] %vm60_vm0, %v1927_v52  ;;  %v1200_v26 = vmul.f32 0.04, %v995_v25  ;;  %v1210_v60 = vmul.f32 %v995_v25, %v2447_v12  ;;  %v997_v4 = vsel %vm992_vm7, %v996_v61, %v991_v45  ;;  %v1398_v17 = vsel %vm178_vm9, %v1390_v0, 0.0 }
 0x1a2   :  { %v1372_v1 = vpop.permute.xlu1 %1371  ;;  %v1368_v48 = vpop.permute.xlu0 %1367  ;;  %v1196_v3 = vrot.slane %v1195_v59, 2  ;;  %v1183_v10 = vrot.slane %v1182_v62, 2  ;;  %v1397_v18 = vsel %vm178_vm9, %v1389_v51, 0.0 }
 0x1a3   :  { %v1201_v22 = vadd.f32 5.0, %v1200_v26  ;;  %v1394_v8 = vmul.f32 %v1372_v1, %v2415_v13  ;;  %v1393_v49 = vmul.f32 %v1368_v48, %v2417_v39  ;;  %v1211_v55 = vsub.f32 %v1210_v60, %v997_v4 }
 0x1a4   :  { %v1197_v47 = vadd.f32 %v1196_v3, %v1195_v59  ;;  %v1184_v16 = vadd.f32 %v1183_v10, %v1182_v62  ;;  %v1399_v33 = vadd.f32 %v1398_v17, %v1397_v18 }
 0x1a5   :  { %v1202_v56 = vmul.f32 %v1201_v22, %v995_v25  ;;  %v1411_v50 = vsel %vm178_vm9, %v1394_v8, 0.0  ;;  %v1410_v27 = vsel %vm178_vm9, %v1393_v49, 0.0  ;;  %v1212_v38 = vmul.f32 %v1211_v55, %v2465_v63 }
 0x1a6   :  { %v1376_v57 = vpop.permute.xlu1 %1375  ;;  %v1357_v19 = vpop.permute.xlu0 %1356  ;;  %v1198_v20 = vrot.slane %v1197_v47, 1  ;;  %v1185_v29 = vrot.slane %v1184_v16, 1  ;;  %v1412_v35 = vadd.f32 %v1411_v50, %v1410_v27 }
 0x1a7   :  { %v1203_v37 = vadd.f32 %v1202_v56, %v2449_v9  ;;  %v1395_v23 = vmul.f32 %v1376_v57, %v2424_v44  ;;  %v1391_v30 = vmul.f32 %v1357_v19, %v2426_v5  ;;  %v1214_v46 = vadd.f32 %v1212_v38, %v997_v4 }
 0x1a8   :  { %v1199_v31 = vadd.f32 %v1198_v20, %v1197_v47  ;;  %v1186_v24 = vadd.f32 %v1185_v29, %v1184_v16 }
 0x1a9   :  { %v1204_v32 = vsub.f32 %v1203_v37, %v997_v4  ;;  %v1413_v40 = vsel %vm178_vm9, %v1395_v23, 0.0  ;;  %v1400_v42 = vsel %vm178_vm9, %v1391_v30, 0.0  ;;  %v1219_v1 = vadd.f32 %v1214_v46, %v2478_v58 }
 0x1aa   :  { %v1380_v41 = vpop.permute.xlu1 %1379  ;;  %v1361_v6 = vpop.permute.xlu0 %1360  ;;  %v1207_v45 = vsel %vm212_vm10, %v1199_v31, %v1186_v24  ;;  %v1414_v7 = vadd.f32 %v1413_v40, %v1412_v35  ;;  %v1401_v11 = vadd.f32 %v1400_v42, %v1399_v33 }
 0x1ab   :  { %v1396_v43 = vmul.f32 %v1380_v41, %v2436_v54  ;;  %v1392_v2 = vmul.f32 %v1361_v6, %v2438_v36  ;;  %v1209_v21 = vadd.f32 %v1207_v45, %v1204_v32 }
 0x1ad   :  { %v1415_v52 = vsel %vm178_vm9, %v1396_v43, 0.0  ;;  %v1402_v53 = vsel %vm178_vm9, %v1392_v2, 0.0  ;;  %v1213_v62 = vadd.f32 %v1209_v21, %v995_v25 }
 0x1ae   :  { %v1416_v59 = vadd.f32 %v1415_v52, %v1414_v7  ;;  %v1403_v26 = vadd.f32 %v1402_v53, %v1401_v11  ;;  %v1576_v60 = vpop.permute.xlu1 %1575  ;;  %v1572_v61 = vpop.permute.xlu0 %1571 }
 0x1af   :  { %vm1215_vm8 = vcmp.gt.f32.partialorder %v1213_v62, 30.0  ;;  %v1613_v4 = vmul.f32 %v1576_v60, %v2408_v15  ;;  %v1612_v56 = vmul.f32 %v1572_v61, %v2410_v34 }
 0x1b0   :  { %v1417_v0 = vrot.slane %v1416_v59, 4  ;;  %v1404_v51 = vrot.slane %v1403_v26, 4  ;;  %v1930_v48 = vsel %vm1215_vm8, 1.0, %v2044_v28  ;;  %v1218_v22 = vsel %vm1215_vm8, %v2476_v14, %v1213_v62 }
 0x1b1   :  { %1222 = vst.msk [vmem:[#allocation10 + $0x8] sm:$0x3] %vm60_vm0, %v1930_v48  ;;  %v1423_v49 = vmul.f32 0.04, %v1218_v22  ;;  %v1433_v47 = vmul.f32 %v1218_v22, %v2447_v12  ;;  %v1220_v18 = vsel %vm1215_vm8, %v1219_v1, %v1214_v46  ;;  %v1621_v50 = vsel %vm178_vm9, %v1613_v4, 0.0 }
 0x1b2   :  { %v1418_v3 = vadd.f32 %v1417_v0, %v1416_v59  ;;  %v1595_v10 = vpop.permute.xlu1 %1594  ;;  %v1591_v8 = vpop.permute.xlu0 %1590  ;;  %v1405_v25 = vadd.f32 %v1404_v51, %v1403_v26  ;;  %v1620_v31 = vsel %vm178_vm9, %v1612_v56, 0.0 }
 0x1b3   :  { %v1617_v16 = vmul.f32 %v1595_v10, %v2415_v13  ;;  %v1616_v17 = vmul.f32 %v1591_v8, %v2417_v39  ;;  %v1424_v57 = vadd.f32 5.0, %v1423_v49  ;;  %v1434_v37 = vsub.f32 %v1433_v47, %v1220_v18 }
 0x1b4   :  { %v1419_v55 = vrot.slane %v1418_v3, 2  ;;  %v1406_v19 = vrot.slane %v1405_v25, 2  ;;  %v1622_v21 = vadd.f32 %v1621_v50, %v1620_v31 }
 0x1b5   :  { %v1425_v23 = vmul.f32 %v1424_v57, %v1218_v22  ;;  %v1634_v32 = vsel %vm178_vm9, %v1617_v16, 0.0  ;;  %v1633_v33 = vsel %vm178_vm9, %v1616_v17, 0.0  ;;  %v1435_v6 = vmul.f32 %v1434_v37, %v2465_v63 }
 0x1b6   :  { %v1420_v20 = vadd.f32 %v1419_v55, %v1418_v3  ;;  %v1599_v27 = vpop.permute.xlu1 %1598  ;;  %v1580_v29 = vpop.permute.xlu0 %1579  ;;  %v1407_v30 = vadd.f32 %v1406_v19, %v1405_v25  ;;  %v1635_v52 = vadd.f32 %v1634_v32, %v1633_v33 }
 0x1b7   :  { %v1618_v24 = vmul.f32 %v1599_v27, %v2424_v44  ;;  %v1614_v35 = vmul.f32 %v1580_v29, %v2426_v5  ;;  %v1426_v40 = vadd.f32 %v1425_v23, %v2449_v9  ;;  %v1437_v62 = vadd.f32 %v1435_v6, %v1220_v18 }
 0x1b8   :  { %v1421_v38 = vrot.slane %v1420_v20, 1  ;;  %v1408_v42 = vrot.slane %v1407_v30, 1 }
 0x1b9   :  { %v1636_v43 = vsel %vm178_vm9, %v1618_v24, 0.0  ;;  %v1623_v2 = vsel %vm178_vm9, %v1614_v35, 0.0  ;;  %v1427_v11 = vsub.f32 %v1426_v40, %v1220_v18  ;;  %v1442_v55 = vadd.f32 %v1437_v62, %v2478_v58 }
 0x1ba   :  { %v1422_v41 = vadd.f32 %v1421_v38, %v1420_v20  ;;  %v1603_v45 = vpop.permute.xlu1 %1602  ;;  %v1584_v7 = vpop.permute.xlu0 %1583  ;;  %v1409_v46 = vadd.f32 %v1408_v42, %v1407_v30  ;;  %v1637_v60 = vadd.f32 %v1636_v43, %v1635_v52  ;;  %v1624_v61 = vadd.f32 %v1623_v2, %v1622_v21 }
 0x1bb   :  { %v1619_v53 = vmul.f32 %v1603_v45, %v2436_v54  ;;  %v1615_v59 = vmul.f32 %v1584_v7, %v2438_v36 }
 0x1bc   :  { %v1430_v26 = vsel %vm212_vm10, %v1422_v41, %v1409_v46 }
 0x1bd   :  { %v1432_v0 = vadd.f32 %v1430_v26, %v1427_v11  ;;  %v1638_v51 = vsel %vm178_vm9, %v1619_v53, 0.0  ;;  %v1625_v1 = vsel %vm178_vm9, %v1615_v59, 0.0 }
 0x1be   :  { %v1799_v48 = vpop.permute.xlu1 %1798  ;;  %v1795_v3 = vpop.permute.xlu0 %1794  ;;  %v1639_v4 = vadd.f32 %v1638_v51, %v1637_v60  ;;  %v1626_v10 = vadd.f32 %v1625_v1, %v1624_v61 }
 0x1bf   :  { %v1836_v8 = vmul.f32 %v1799_v48, %v2408_v15  ;;  %v1436_v49 = vadd.f32 %v1432_v0, %v1218_v22  ;;  %v1835_v56 = vmul.f32 %v1795_v3, %v2410_v34 }
 0x1c0   :  { %v1640_v47 = vrot.slane %v1639_v4, 4  ;;  %v1627_v25 = vrot.slane %v1626_v10, 4 }
 0x1c1   :  { %vm1438_vm11 = vcmp.gt.f32.partialorder %v1436_v49, 30.0  ;;  %v1844_v20 = vsel %vm178_vm9, %v1836_v8, 0.0  ;;  %v1843_v29 = vsel %vm178_vm9, %v1835_v56, 0.0 }
 0x1c2   :  { %v1818_v16 = vpop.permute.xlu1 %1817  ;;  %v1814_v17 = vpop.permute.xlu0 %1813  ;;  %v1933_v18 = vsel %vm1438_vm11, 1.0, %v2044_v28  ;;  %v1641_v57 = vadd.f32 %v1640_v47, %v1639_v4  ;;  %v1441_v19 = vsel %vm1438_vm11, %v2476_v14, %v1436_v49  ;;  %v1628_v37 = vadd.f32 %v1627_v25, %v1626_v10 }
 0x1c3   :  { %1445 = vst.msk [vmem:[#allocation10 + $0xa] sm:$0x3] %vm60_vm0, %v1933_v18  ;;  %v1646_v15 = vmul.f32 0.04, %v1441_v19  ;;  %v1656_v22 = vmul.f32 %v1441_v19, %v2447_v12  ;;  %v1840_v34 = vmul.f32 %v1818_v16, %v2415_v13  ;;  %v1443_v27 = vsel %vm1438_vm11, %v1442_v55, %v1437_v62 }
 0x1c4   :  { %v1642_v50 = vrot.slane %v1641_v57, 2  ;;  %v1839_v23 = vmul.f32 %v1814_v17, %v2417_v39  ;;  %v1629_v32 = vrot.slane %v1628_v37, 2  ;;  %v1845_v11 = vadd.f32 %v1844_v20, %v1843_v29 }
 0x1c5   :  { %v1647_v30 = vadd.f32 5.0, %v1646_v15  ;;  %v1657_v31 = vsub.f32 %v1656_v22, %v1443_v27  ;;  %v1857_v38 = vsel %vm178_vm9, %v1840_v34, 0.0 }
 0x1c6   :  { %v1822_v33 = vpop.permute.xlu1 %1821  ;;  %v1803_v24 = vpop.permute.xlu0 %1802  ;;  %v1643_v35 = vadd.f32 %v1642_v50, %v1641_v57  ;;  %v1856_v40 = vsel %vm178_vm9, %v1839_v23, 0.0  ;;  %v1630_v6 = vadd.f32 %v1629_v32, %v1628_v37 }
 0x1c7   :  { %v1841_v42 = vmul.f32 %v1822_v33, %v2424_v44  ;;  %v1837_v13 = vmul.f32 %v1803_v24, %v2426_v5  ;;  %v1648_v41 = vmul.f32 %v1647_v30, %v1441_v19  ;;  %v1858_v46 = vadd.f32 %v1857_v38, %v1856_v40 }
 0x1c8   :  { %v1644_v43 = vrot.slane %v1643_v35, 1  ;;  %v1631_v7 = vrot.slane %v1630_v6, 1  ;;  %v1658_v59 = vmul.f32 %v1657_v31, %v2465_v63 }
 0x1c9   :  { %v1859_v2 = vsel %vm178_vm9, %v1841_v42, 0.0  ;;  %v1846_v39 = vsel %vm178_vm9, %v1837_v13, 0.0  ;;  %v1649_v45 = vadd.f32 %v1648_v41, %v2449_v9 }
 0x1ca   :  { %v1826_v21 = vpop.permute.xlu1 %1825  ;;  %v1807_v52 = vpop.permute.xlu0 %1806  ;;  %v1645_v53 = vadd.f32 %v1644_v43, %v1643_v35  ;;  %v1632_v60 = vadd.f32 %v1631_v7, %v1630_v6  ;;  %v1860_v61 = vadd.f32 %v1859_v2, %v1858_v46  ;;  %v1847_v62 = vadd.f32 %v1846_v39, %v1845_v11 }
 0x1cb   :  { %v1842_v44 = vmul.f32 %v1826_v21, %v2436_v54  ;;  %v1838_v5 = vmul.f32 %v1807_v52, %v2438_v36  ;;  %v1650_v26 = vsub.f32 %v1649_v45, %v1443_v27  ;;  %v1660_v10 = vadd.f32 %v1658_v59, %v1443_v27 }
 0x1cc   :  { %v1653_v1 = vsel %vm212_vm10, %v1645_v53, %v1632_v60 }
 0x1cd   :  { %v1861_v0 = vsel %vm178_vm9, %v1842_v44, 0.0  ;;  %v1848_v51 = vsel %vm178_vm9, %v1838_v5, 0.0  ;;  %v1655_v4 = vadd.f32 %v1653_v1, %v1650_v26  ;;  %v1665_v36 = vadd.f32 %v1660_v10, %v2478_v58 }
 0x1ce   :  { %v1862_v48 = vadd.f32 %v1861_v0, %v1860_v61  ;;  %v1849_v3 = vadd.f32 %v1848_v51, %v1847_v62 }
 0x1cf   :  { %v1659_v47 = vadd.f32 %v1655_v4, %v1441_v19 }
 0x1d0   :  { %v1863_v8 = vrot.slane %v1862_v48, 4  ;;  %v1850_v49 = vrot.slane %v1849_v3, 4 }
 0x1d1   :  { %vm1661_vm12 = vcmp.gt.f32.partialorder %v1659_v47, 30.0 }
 0x1d2   :  { %v1864_v54 = vadd.f32 %v1863_v8, %v1862_v48  ;;  %v1851_v25 = vadd.f32 %v1850_v49, %v1849_v3  ;;  %v1936_v56 = vsel %vm1661_vm12, 1.0, %v2044_v28  ;;  %v1664_v16 = vsel %vm1661_vm12, %v2476_v14, %v1659_v47 }
 0x1d3   :  { %1668 = vst.msk [vmem:[#allocation10 + $0xc] sm:$0x3] %vm60_vm0, %v1936_v56  ;;  %v1869_v17 = vmul.f32 0.04, %v1664_v16  ;;  %v1879_v18 = vmul.f32 %v1664_v16, %v2447_v12  ;;  %v1666_v15 = vsel %vm1661_vm12, %v1665_v36, %v1660_v10 }
 0x1d4   :  { %v1865_v55 = vrot.slane %v1864_v54, 2  ;;  %v1852_v57 = vrot.slane %v1851_v25, 2 }
 0x1d5   :  { %v1870_v22 = vadd.f32 5.0, %v1869_v17  ;;  %v1880_v19 = vsub.f32 %v1879_v18, %v1666_v15 }
 0x1d6   :  { %v1866_v20 = vadd.f32 %v1865_v55, %v1864_v54  ;;  %v1853_v37 = vadd.f32 %v1852_v57, %v1851_v25 }
 0x1d7   :  { %v1871_v50 = vmul.f32 %v1870_v22, %v1664_v16  ;;  %v1881_v23 = vmul.f32 %v1880_v19, %v2465_v63 }
 0x1d8   :  { %v1867_v34 = vrot.slane %v1866_v20, 1  ;;  %v1854_v27 = vrot.slane %v1853_v37, 1 }
 0x1d9   :  { %v1872_v30 = vadd.f32 %v1871_v50, %v2449_v9  ;;  %v1883_v33 = vadd.f32 %v1881_v23, %v1666_v15 }
 0x1da   :  { %v1868_v29 = vadd.f32 %v1867_v34, %v1866_v20  ;;  %v1855_v31 = vadd.f32 %v1854_v27, %v1853_v37 }
 0x1db   :  { %v1873_v32 = vsub.f32 %v1872_v30, %v1666_v15  ;;  %v1888_v35 = vadd.f32 %v1883_v33, %v2478_v58 }
 0x1dc   :  { %v1876_v38 = vsel %vm212_vm10, %v1868_v29, %v1855_v31 }
 0x1dd   :  { %v1878_v12 = vadd.f32 %v1876_v38, %v1873_v32 }
 0x1df   :  { %v1882_v24 = vadd.f32 %v1878_v12, %v1664_v16 }
 0x1e1   :  { %vm1884_vm9 = vcmp.gt.f32.partialorder %v1882_v24, 30.0 }
 0x1e2   :  { %v1939_v40 = vsel %vm1884_vm9, 1.0, %v2044_v28  ;;  %v1887_v42 = vsel %vm1884_vm9, %v2476_v14, %v1882_v24  ;;  %v1889_v63 = vsel %vm1884_vm9, %v1888_v35, %v1883_v33 }
 0x1e3   :  { %1891 = vst.msk [vmem:[#allocation10 + $0xe] sm:$0x3] %vm60_vm0, %v1939_v40  ;;  %1896 = vst.msk [vmem:[#allocation2 + $0x4] sm:$0x3] %vm60_vm0, %v1887_v42 }
 0x1e4   :  { %1897 = vst.msk [vmem:[#allocation3 + $0x4] sm:$0x3] %vm60_vm0, %v1889_v63 }
 0x1e5   :  { %2021 = shalt.err (!%p2018_p5)
}
 0x1e6   :  { %1909 = dma.vmem_to_hbm [thread:$0]  %s1904_s2, 256, %s2659_s3, [#allocation6], %s2038_s17, %s2038_s17, %s2039_s18  }
 0x1e7   :  { %2034 = dma.done.wait [#allocation6], 256  }
 0x1e8   :  { %2035 = vsyncadd [#allocation6], 4294967040 }
 0x1e9   :  { %1913 = vsyncpa [#allocation5], 1 }
 0x1ea   :  { %1914 = vsyncpa [#allocation8], 1 }
 0x1eb   :  { %1915 = vsyncpa [#allocation6], 1 }

</bundles_post_ra>
